<compile_context>
chip_gen: v7x
topology: tpu7x:2x2x1
jax: 0.10.0
libtpu: 0.0.40
codegen_flags: <defaults>
</compile_context>

<pallas_src>
import functools

import jax
import jax.numpy as jnp
from jax.experimental import pallas as pl
from jax.experimental.pallas import tpu as pltpu

_LANE = 128      # vreg lane width
_SUBLANE = 8     # f32 sublane width


def _round_up(v, m):
    return ((v + m - 1) // m) * m


# ---------------------------------------------------------------------------
# Chip introspection (robust: every query has a safe fallback)
# ---------------------------------------------------------------------------
def _chip_info():
    """Returns (vmem_capacity_bytes, num_tensorcores, bf16_valu_ok)."""
    vmem = 64 * 1024 * 1024          # v7x physical VMEM = smallest across targets
    num_tc = 1
    bf16_ok = True
    try:
        info = pltpu.get_tpu_info()
        vmem = int(getattr(info, "vmem_capacity_bytes", vmem))
    except Exception:
        pass
    try:
        kind = jax.devices()[0].device_kind.lower()
        if ("v7" in kind) or ("7x" in kind):
            num_tc = 2               # two TensorCores per chip on v7x
        if any(g in kind for g in ("v2", "v3", "v4", "v5")):
            bf16_ok = False          # no bf16 VALU/EUP on <= v5 generations
    except Exception:
        pass
    return vmem, num_tc, bf16_ok


# ---------------------------------------------------------------------------
# Kernel (trace-time specialized on the compute dtype)
# ---------------------------------------------------------------------------
def _make_kernel(bf16_compute):
    """Fused encoder+decoder: 4 matmuls + bias + ReLU on one batch tile."""

    def kernel(x_ref,
               w1_ref, b1_ref,
               w2_ref, b2_ref,
               w3_ref, b3_ref,
               w4_ref, b4_ref,
               o_ref):
        if bf16_compute:
            # bf16 MXU operands, f32 accumulation; bf16 bias+ReLU epilogue for
            # layers 1-3 feeds the next matmul directly (no separate astype).
            x = x_ref[...]
            if x.dtype != jnp.bfloat16:
                x = x.astype(jnp.bfloat16)
            h = jnp.dot(x, w1_ref[...], preferred_element_type=jnp.float32)
            h = jnp.maximum(h.astype(jnp.bfloat16) + b1_ref[...], 0.0)
            h = jnp.dot(h, w2_ref[...], preferred_element_type=jnp.float32)
            h = jnp.maximum(h.astype(jnp.bfloat16) + b2_ref[...], 0.0)
            h = jnp.dot(h, w3_ref[...], preferred_element_type=jnp.float32)
            h = jnp.maximum(h.astype(jnp.bfloat16) + b3_ref[...], 0.0)
            # Final layer: f32 bias add + ReLU, cast only at the store.
            h = jnp.dot(h, w4_ref[...], preferred_element_type=jnp.float32) + b4_ref[...]
            o_ref[...] = jnp.maximum(h, 0.0).astype(o_ref.dtype)
        else:
            # Pure-f32 path (v5e): no casts, exact vs. the f32 reference.
            h = jnp.maximum(
                jnp.dot(x_ref[...], w1_ref[...],
                        preferred_element_type=jnp.float32) + b1_ref[...], 0.0)
            h = jnp.maximum(
                jnp.dot(h, w2_ref[...],
                        preferred_element_type=jnp.float32) + b2_ref[...], 0.0)
            h = jnp.maximum(
                jnp.dot(h, w3_ref[...],
                        preferred_element_type=jnp.float32) + b3_ref[...], 0.0)
            h = jnp.dot(h, w4_ref[...],
                        preferred_element_type=jnp.float32) + b4_ref[...]
            o_ref[...] = jnp.maximum(h, 0.0).astype(o_ref.dtype)

    return kernel


# ---------------------------------------------------------------------------
# Tiling
# ---------------------------------------------------------------------------
def _pick_block_b(B, per_row_bytes, fixed_bytes, vmem_budget, num_tc):
    """Pick the batch tile.

    Goal: grid has 2 steps per TensorCore (2 on v5e/v6e, 4 on v7x) so the
    pipeline overlaps DMA/compute on every core while per-step overhead is
    amortized over the biggest possible tile.  The tile must divide B, be a
    multiple of 8 (f32 sublane) and keep the per-step footprint inside the
    VMEM budget.
    """
    if B <= _SUBLANE:
        return B                                  # single full block (legal)
    cap = (vmem_budget - fixed_bytes) // max(per_row_bytes, 1)
    cap = max(_SUBLANE, min(cap, B // 2))         # fits budget, >= 2 steps
    want = max(_SUBLANE, B // (2 * max(num_tc, 1)))   # 2 steps per core
    bb = (min(cap, want) // _SUBLANE) * _SUBLANE
    while bb >= _SUBLANE:
        if B % bb == 0:
            return bb
        bb -= _SUBLANE
    # No multiple-of-8 divisor of B: fall back to a single full block.  This
    # is correct but disables pipelining / v7x core sharding.
    return B


# ---------------------------------------------------------------------------
# Wrapper
# ---------------------------------------------------------------------------
@functools.partial(jax.jit, static_argnames=("block_b",))
def autoencoder_forward(x, packed, *, block_b=None):
    """x: (B, in_dim).  packed: lane-padded params from pack_params()."""
    B, in_dim = x.shape
    assert packed["w1"].shape[0] == in_dim
    assert packed["w4"].shape[1] == in_dim
    h1p = packed["w1"].shape[1]
    h2p = packed["w2"].shape[1]
    use_bf16 = packed["w1"].dtype == jnp.bfloat16

    vmem_cap, num_tc, _ = _chip_info()

    # Per-step VMEM footprint (bytes per batch row + fixed resident params).
    xb = x.dtype.itemsize
    wb = packed["w1"].dtype.itemsize
    ab = 2 if use_bf16 else 4                     # post-epilogue activations
    per_row = xb * in_dim * 2                     # x tile (double-buffered)
    per_row += xb * in_dim * 2                    # out tile (double-buffered)
    per_row += 4 * (h1p + h2p + h1p + in_dim)     # f32 accumulators
    per_row += ab * (h1p + h2p + h1p)             # layer-1..3 activations
    if use_bf16 and xb == 4:
        per_row += 2 * in_dim                     # in-kernel x bf16 cast
    fixed = 2 * wb * (in_dim * h1p + h1p * h2p + h2p * h1p + h1p * in_dim)
    fixed += 2 * (ab * (h1p + h2p + h1p) + 4 * in_dim)   # biases (2 bufs)

    if block_b is None:
        block_b = _pick_block_b(B, per_row, fixed, int(0.4 * vmem_cap), num_tc)
    assert B % block_b == 0, "block_b must divide the batch"
    assert block_b == B or block_b % _SUBLANE == 0, "block_b must be a multiple of 8"
    grid = (B // block_b,)

    # Honest VMEM limit: real footprint with ~30% headroom (a few MiB here),
    # no artificial 32/60 MiB clamp.
    vmem_limit = int(1.3 * (fixed + 2 * per_row * block_b))
    vmem_limit = max(vmem_limit, 4 * 1024 * 1024)   # tiny floor for safety

    # Weights/biases: constant index_map => VMEM-resident across grid steps.
    def resident_spec(shape):
        return pl.BlockSpec(shape, lambda i: (0, 0))

    return pl.pallas_call(
        _make_kernel(use_bf16),
        out_shape=jax.ShapeDtypeStruct((B, in_dim), x.dtype),
        grid_spec=pltpu.PrefetchScalarGridSpec(
            num_scalar_prefetch=0,
            grid=grid,
            in_specs=[
                pl.BlockSpec((block_b, in_dim), lambda i: (i, 0)),   # x tile
                resident_spec(packed["w1"].shape), resident_spec(packed["b1"].shape),
                resident_spec(packed["w2"].shape), resident_spec(packed["b2"].shape),
                resident_spec(packed["w3"].shape), resident_spec(packed["b3"].shape),
                resident_spec(packed["w4"].shape), resident_spec(packed["b4"].shape),
            ],
            out_specs=pl.BlockSpec((block_b, in_dim), lambda i: (i, 0)),
        ),
        compiler_params=pltpu.CompilerParams(
            dimension_semantics=("parallel",),
            vmem_limit_bytes=vmem_limit),
    )(x,
      packed["w1"], packed["b1"],
      packed["w2"], packed["b2"],
      packed["w3"], packed["b3"],
      packed["w4"], packed["b4"])


# ---------------------------------------------------------------------------
# Parameters
# ---------------------------------------------------------------------------
def init_params(key, in_dim, hid_dim1, hid_dim2):
    """nn.Linear-style U(-1/sqrt(fan_in), 1/sqrt(fan_in)) init, f32.

    Weights are stored transposed vs. PyTorch: (in_features, out_features).
    Biases are (1, out_features).
    """
    dims = [(in_dim, hid_dim1), (hid_dim1, hid_dim2),
            (hid_dim2, hid_dim1), (hid_dim1, in_dim)]
    params = {}
    keys = jax.random.split(key, 2 * len(dims))
    for idx, (fan_in, fan_out) in enumerate(dims):
        bound = 1.0 / (fan_in ** 0.5)
        params[f"w{idx + 1}"] = jax.random.uniform(
            keys[2 * idx], (fan_in, fan_out),
            minval=-bound, maxval=bound, dtype=jnp.float32)
        params[f"b{idx + 1}"] = jax.random.uniform(
            keys[2 * idx + 1], (1, fan_out),
            minval=-bound, maxval=bound, dtype=jnp.float32)
    return params


def pack_params(params, use_bf16=None):
    """Zero-pad hidden dims to the 128-lane width; pick compute dtype per chip.

    Zero padding is exact: padded activation columns are relu(0 + 0) == 0 and
    padded weight rows only multiply those zeros, so the unpadded math is
    unchanged.  On bf16-capable chips (v6e/v7x) weights and hidden biases are
    bf16; on v5e everything stays f32 (no bf16 VALU; kernel is DMA-bound so
    f32 MXU passes are hidden and numerics tighten for free).
    """
    if use_bf16 is None:
        use_bf16 = _chip_info()[2]
    in_dim, h1 = params["w1"].shape
    h2 = params["w2"].shape[1]
    h1p, h2p = _round_up(h1, _LANE), _round_up(h2, _LANE)
    w_dtype = jnp.bfloat16 if use_bf16 else jnp.float32
    hid_b_dtype = jnp.bfloat16 if use_bf16 else jnp.float32

    def pad_w(w, rows, cols):
        out = jnp.zeros((rows, cols), jnp.float32)
        return out.at[: w.shape[0], : w.shape[1]].set(w).astype(w_dtype)

    def pad_b(b, cols, dtype):
        out = jnp.zeros((1, cols), jnp.float32)
        return out.at[:, : b.shape[1]].set(b).astype(dtype)

    return {
        "w1": pad_w(params["w1"], in_dim, h1p), "b1": pad_b(params["b1"], h1p, hid_b_dtype),
        "w2": pad_w(params["w2"], h1p, h2p),    "b2": pad_b(params["b2"], h2p, hid_b_dtype),
        "w3": pad_w(params["w3"], h2p, h1p),    "b3": pad_b(params["b3"], h1p, hid_b_dtype),
        "w4": pad_w(params["w4"], h1p, in_dim), "b4": pad_b(params["b4"], in_dim, jnp.float32),
    }


def reference_forward(x, params):
    h = jnp.maximum(x @ params["w1"] + params["b1"], 0.0)
    h = jnp.maximum(h @ params["w2"] + params["b2"], 0.0)
    h = jnp.maximum(h @ params["w3"] + params["b3"], 0.0)
    return jnp.maximum(h @ params["w4"] + params["b4"], 0.0)


# ---------------------------------------------------------------------------
if __name__ == "__main__":
    # Shapes consistent with AutoEncoder(in_dim, hid_dim1, hid_dim2); batch is
    # large enough for a multi-step grid (2 steps on v5e/v6e, 4 on v7x).
    B, IN_DIM, HID1, HID2 = 2048, 128, 64, 32

    key = jax.random.PRNGKey(0)
    kx, kp = jax.random.split(key)
    x = jax.random.normal(kx, (B, IN_DIM), dtype=jnp.float32)
    params = init_params(kp, IN_DIM, HID1, HID2)
    packed = pack_params(params)

    cons_x = jax.block_until_ready(autoencoder_forward(x, packed))
    ref = reference_forward(x, params)
    assert cons_x.shape == (B, IN_DIM)

    if packed["w1"].dtype == jnp.bfloat16:
        atol = rtol = 5e-2       # bf16 operands + bf16 epilogue vs f32 reference
    else:
        atol = rtol = 1e-5       # pure f32 path (v5e)
    max_err = float(jnp.max(jnp.abs(cons_x - ref)))
    assert jnp.allclose(cons_x, ref, atol=atol, rtol=rtol), (
        f"mismatch vs reference (max abs err={max_err})")
    print("KERNEL_OK")
</pallas_src>

<mosaic_0001>
module attributes {stable_mosaic.version = 11 : i64} {
  func.func @kernel(%arg0: i32, %arg1: memref<1024x128xf32, #tpu.memory_space<vmem>>, %arg2: memref<128x128xbf16, #tpu.memory_space<vmem>>, %arg3: memref<1x128xbf16, #tpu.memory_space<vmem>>, %arg4: memref<128x128xbf16, #tpu.memory_space<vmem>>, %arg5: memref<1x128xbf16, #tpu.memory_space<vmem>>, %arg6: memref<128x128xbf16, #tpu.memory_space<vmem>>, %arg7: memref<1x128xbf16, #tpu.memory_space<vmem>>, %arg8: memref<128x128xbf16, #tpu.memory_space<vmem>>, %arg9: memref<1x128xf32, #tpu.memory_space<vmem>>, %arg10: memref<1024x128xf32, #tpu.memory_space<vmem>>) attributes {dimension_semantics = [#tpu.dimension_semantics<parallel>], iteration_bounds = array<i64: 2>, scalar_prefetch = 0 : i64, scratch_operands = 0 : i64, tpu.core_type = #tpu.core_type<tc>, window_params = [{transform_indices = @transform_0, window_bounds = array<i64: 1024, 128>}, {pipeline_mode = #tpu.pipeline_mode<synchronous>, transform_indices = @transform_1, window_bounds = array<i64: 128, 128>}, {pipeline_mode = #tpu.pipeline_mode<synchronous>, transform_indices = @transform_2, window_bounds = array<i64: 1, 128>}, {pipeline_mode = #tpu.pipeline_mode<synchronous>, transform_indices = @transform_3, window_bounds = array<i64: 128, 128>}, {pipeline_mode = #tpu.pipeline_mode<synchronous>, transform_indices = @transform_4, window_bounds = array<i64: 1, 128>}, {pipeline_mode = #tpu.pipeline_mode<synchronous>, transform_indices = @transform_5, window_bounds = array<i64: 128, 128>}, {pipeline_mode = #tpu.pipeline_mode<synchronous>, transform_indices = @transform_6, window_bounds = array<i64: 1, 128>}, {pipeline_mode = #tpu.pipeline_mode<synchronous>, transform_indices = @transform_7, window_bounds = array<i64: 128, 128>}, {pipeline_mode = #tpu.pipeline_mode<synchronous>, transform_indices = @transform_8, window_bounds = array<i64: 1, 128>}, {transform_indices = @transform_9, window_bounds = array<i64: 1024, 128>}]} {
    %c0 = arith.constant 0 : index
    %c0_0 = arith.constant 0 : index
    %0 = vector.load %arg1[%c0, %c0_0] : memref<1024x128xf32, #tpu.memory_space<vmem>>, vector<1024x128xf32>
    %1 = arith.truncf %0 : vector<1024x128xf32> to vector<1024x128xbf16>
    %c0_1 = arith.constant 0 : index
    %c0_2 = arith.constant 0 : index
    %2 = vector.load %arg2[%c0_1, %c0_2] : memref<128x128xbf16, #tpu.memory_space<vmem>>, vector<128x128xbf16>
    %cst = arith.constant dense<0.000000e+00> : vector<1024x128xf32>
    %3 = tpu.matmul %1, %2, %cst {dimension_numbers = #tpu.dot_dimension_numbers<[1], [0], [0], [1], [0, 0, 1, 1], [], []>} : vector<1024x128xbf16>, vector<128x128xbf16>, vector<1024x128xf32> -> vector<1024x128xf32>
    %4 = arith.truncf %3 : vector<1024x128xf32> to vector<1024x128xbf16>
    %c0_3 = arith.constant 0 : index
    %c0_4 = arith.constant 0 : index
    %5 = vector.load %arg3[%c0_3, %c0_4] : memref<1x128xbf16, #tpu.memory_space<vmem>>, vector<1x128xbf16>
    %6 = vector.broadcast %5 : vector<1x128xbf16> to vector<1024x128xbf16>
    %7 = arith.addf %4, %6 : vector<1024x128xbf16>
    %cst_5 = arith.constant 0.000000e+00 : bf16
    %8 = vector.broadcast %cst_5 : bf16 to vector<1024x128xbf16>
    %9 = arith.maximumf %7, %8 : vector<1024x128xbf16>
    %c0_6 = arith.constant 0 : index
    %c0_7 = arith.constant 0 : index
    %10 = vector.load %arg4[%c0_6, %c0_7] : memref<128x128xbf16, #tpu.memory_space<vmem>>, vector<128x128xbf16>
    %cst_8 = arith.constant dense<0.000000e+00> : vector<1024x128xf32>
    %11 = tpu.matmul %9, %10, %cst_8 {dimension_numbers = #tpu.dot_dimension_numbers<[1], [0], [0], [1], [0, 0, 1, 1], [], []>} : vector<1024x128xbf16>, vector<128x128xbf16>, vector<1024x128xf32> -> vector<1024x128xf32>
    %12 = arith.truncf %11 : vector<1024x128xf32> to vector<1024x128xbf16>
    %c0_9 = arith.constant 0 : index
    %c0_10 = arith.constant 0 : index
    %13 = vector.load %arg5[%c0_9, %c0_10] : memref<1x128xbf16, #tpu.memory_space<vmem>>, vector<1x128xbf16>
    %14 = vector.broadcast %13 : vector<1x128xbf16> to vector<1024x128xbf16>
    %15 = arith.addf %12, %14 : vector<1024x128xbf16>
    %cst_11 = arith.constant 0.000000e+00 : bf16
    %16 = vector.broadcast %cst_11 : bf16 to vector<1024x128xbf16>
    %17 = arith.maximumf %15, %16 : vector<1024x128xbf16>
    %c0_12 = arith.constant 0 : index
    %c0_13 = arith.constant 0 : index
    %18 = vector.load %arg6[%c0_12, %c0_13] : memref<128x128xbf16, #tpu.memory_space<vmem>>, vector<128x128xbf16>
    %cst_14 = arith.constant dense<0.000000e+00> : vector<1024x128xf32>
    %19 = tpu.matmul %17, %18, %cst_14 {dimension_numbers = #tpu.dot_dimension_numbers<[1], [0], [0], [1], [0, 0, 1, 1], [], []>} : vector<1024x128xbf16>, vector<128x128xbf16>, vector<1024x128xf32> -> vector<1024x128xf32>
    %20 = arith.truncf %19 : vector<1024x128xf32> to vector<1024x128xbf16>
    %c0_15 = arith.constant 0 : index
    %c0_16 = arith.constant 0 : index
    %21 = vector.load %arg7[%c0_15, %c0_16] : memref<1x128xbf16, #tpu.memory_space<vmem>>, vector<1x128xbf16>
    %22 = vector.broadcast %21 : vector<1x128xbf16> to vector<1024x128xbf16>
    %23 = arith.addf %20, %22 : vector<1024x128xbf16>
    %cst_17 = arith.constant 0.000000e+00 : bf16
    %24 = vector.broadcast %cst_17 : bf16 to vector<1024x128xbf16>
    %25 = arith.maximumf %23, %24 : vector<1024x128xbf16>
    %c0_18 = arith.constant 0 : index
    %c0_19 = arith.constant 0 : index
    %26 = vector.load %arg8[%c0_18, %c0_19] : memref<128x128xbf16, #tpu.memory_space<vmem>>, vector<128x128xbf16>
    %cst_20 = arith.constant dense<0.000000e+00> : vector<1024x128xf32>
    %27 = tpu.matmul %25, %26, %cst_20 {dimension_numbers = #tpu.dot_dimension_numbers<[1], [0], [0], [1], [0, 0, 1, 1], [], []>} : vector<1024x128xbf16>, vector<128x128xbf16>, vector<1024x128xf32> -> vector<1024x128xf32>
    %c0_21 = arith.constant 0 : index
    %c0_22 = arith.constant 0 : index
    %28 = vector.load %arg9[%c0_21, %c0_22] : memref<1x128xf32, #tpu.memory_space<vmem>>, vector<1x128xf32>
    %29 = vector.broadcast %28 : vector<1x128xf32> to vector<1024x128xf32>
    %30 = arith.addf %27, %29 : vector<1024x128xf32>
    %cst_23 = arith.constant 0.000000e+00 : f32
    %31 = vector.broadcast %cst_23 : f32 to vector<1024x128xf32>
    %32 = arith.maximumf %30, %31 : vector<1024x128xf32>
    %c0_24 = arith.constant 0 : index
    %c0_25 = arith.constant 0 : index
    %33 = vector.load %arg10[%c0_24, %c0_25] : memref<1024x128xf32, #tpu.memory_space<vmem>>, vector<1024x128xf32>
    tpu.vector_store %arg10[%c0_24, %c0_25], %32 {strides = array<i32>} : memref<1024x128xf32, #tpu.memory_space<vmem>>, vector<1024x128xf32>,
    return
  }
  func.func @transform_0(%arg0: i32) -> (i32, i32) {
    %c0_i32 = arith.constant 0 : i32
    %c0_i32_0 = arith.constant 0 : i32
    return %arg0, %c0_i32 : i32, i32
  }
  func.func @transform_1(%arg0: i32) -> (i32, i32) {
    %c0_i32 = arith.constant 0 : i32
    %c0_i32_0 = arith.constant 0 : i32
    %c0_i32_1 = arith.constant 0 : i32
    return %c0_i32, %c0_i32_0 : i32, i32
  }
  func.func @transform_2(%arg0: i32) -> (i32, i32) {
    %c0_i32 = arith.constant 0 : i32
    %c0_i32_0 = arith.constant 0 : i32
    %c0_i32_1 = arith.constant 0 : i32
    return %c0_i32, %c0_i32_0 : i32, i32
  }
  func.func @transform_3(%arg0: i32) -> (i32, i32) {
    %c0_i32 = arith.constant 0 : i32
    %c0_i32_0 = arith.constant 0 : i32
    %c0_i32_1 = arith.constant 0 : i32
    return %c0_i32, %c0_i32_0 : i32, i32
  }
  func.func @transform_4(%arg0: i32) -> (i32, i32) {
    %c0_i32 = arith.constant 0 : i32
    %c0_i32_0 = arith.constant 0 : i32
    %c0_i32_1 = arith.constant 0 : i32
    return %c0_i32, %c0_i32_0 : i32, i32
  }
  func.func @transform_5(%arg0: i32) -> (i32, i32) {
    %c0_i32 = arith.constant 0 : i32
    %c0_i32_0 = arith.constant 0 : i32
    %c0_i32_1 = arith.constant 0 : i32
    return %c0_i32, %c0_i32_0 : i32, i32
  }
  func.func @transform_6(%arg0: i32) -> (i32, i32) {
    %c0_i32 = arith.constant 0 : i32
    %c0_i32_0 = arith.constant 0 : i32
    %c0_i32_1 = arith.constant 0 : i32
    return %c0_i32, %c0_i32_0 : i32, i32
  }
  func.func @transform_7(%arg0: i32) -> (i32, i32) {
    %c0_i32 = arith.constant 0 : i32
    %c0_i32_0 = arith.constant 0 : i32
    %c0_i32_1 = arith.constant 0 : i32
    return %c0_i32, %c0_i32_0 : i32, i32
  }
  func.func @transform_8(%arg0: i32) -> (i32, i32) {
    %c0_i32 = arith.constant 0 : i32
    %c0_i32_0 = arith.constant 0 : i32
    %c0_i32_1 = arith.constant 0 : i32
    return %c0_i32, %c0_i32_0 : i32, i32
  }
  func.func @transform_9(%arg0: i32) -> (i32, i32) {
    %c0_i32 = arith.constant 0 : i32
    %c0_i32_0 = arith.constant 0 : i32
    return %arg0, %c0_i32 : i32, i32
  }
}

</mosaic_0001>

<bundles_post_ra>
// kernel: autoencoder_forward.1
= control target key start
LH: loop header
LB: loop body
LE: loop exit
PB: predicated region body
PF: predicated region fallthrough
CT: control target
= control target key end

     0   :  { %s6438_s0 = inlined_call_operand.hbm [shape: f32[2048,128], index: 0, kind: input, shape index: {}]   ;;  %s6439_s1 = inlined_call_operand.hbm [shape: bf16[128,128], index: 1, kind: input, shape index: {}]   ;;  %s6440_s2 = inlined_call_operand.vmem [shape: bf16[1,128], index: 2, kind: input, shape index: {}]   ;;  %s6441_s3 = inlined_call_operand.hbm [shape: bf16[128,128], index: 3, kind: input, shape index: {}]   ;;  %s6442_s4 = inlined_call_operand.vmem [shape: bf16[1,128], index: 4, kind: input, shape index: {}]   ;;  %s6443_s5 = inlined_call_operand.hbm [shape: bf16[128,128], index: 5, kind: input, shape index: {}]   ;;  %s6444_s6 = inlined_call_operand.vmem [shape: bf16[1,128], index: 6, kind: input, shape index: {}]   ;;  %s6445_s7 = inlined_call_operand.hbm [shape: bf16[128,128], index: 7, kind: input, shape index: {}]   ;;  %s6446_s8 = inlined_call_operand.vmem [shape: f32[1,128], index: 8, kind: input, shape index: {}]   ;;  %s6447_s9 = inlined_call_operand.hbm [shape: f32[2048,128], index: 9, kind: output, shape index: {}]  }
   0x1   :  { %6454 = sst [smem:[#allocation18_spill]] %s6447_s9 }
   0x2   :  { %14 = vsyncpa [#allocation3], 0 }
   0x3   :  { %16 = vsyncpa [#allocation3 + $0x1], 0 }
   0x4   :  { %17 = vsyncpa [#allocation6], 0 }
   0x5   :  { %18 = vsyncpa [#allocation9], 0 }
   0x6   :  { %19 = vsyncpa [#allocation4], 0 }
   0x7   :  { %21 = vsyncpa [#allocation4 + $0x1], 0  ;;  %s5357_s30 = smov 0   ;;  %s5359_s10 = smov 0  }
   0x8   :  { %s5361_s11 = smov 0   ;;  %s5363_s12 = smov 0  }
   0x9 LB: > { %6455 = sst [smem:[#allocation16_spill]] %s5280_s30  ;;  %s5378_s13 = sadd.s32 4294967295, %s5292_s12   ;;  %s5292_s12 = sphi %s5363_s12, %s6479_s12   ;;  %s5288_s11 = sphi %s5361_s11, %s6478_s11   ;;  %s5284_s10 = sphi %s5359_s10, %s6477_s10   ;;  %s5280_s30 = sphi %s5357_s30, %s6476_s30  }
   0xa   : > { %s4028_s14 = sadd.s32 4294967294, %s5292_s12   ;;  %p47_p0 = scmp.ne.s32.totalorder %s5284_s10, %s5280_s30 }
   0xb   : > { %p6448_p1 = scmp.eq.s32.totalorder %s5378_s13, 0  ;;  %p245_p3 = scmp.eq.s32.totalorder %s4028_s14, 1 }
   0xc   : > { %p4029_p5 = scmp.ge.s32.totalorder %s5292_s12, 1  ;;  %p252_p7 = scmp.lt.s32.totalorder %s5292_s12, 3 }
   0xd   : > { %p5387_p4 = por %p6448_p1, %p47_p0  ;;  %p5392_p6 = por %p245_p3, %p47_p0 }
   0xe   : > { %p5397_p8 = pnand %p4029_p5, %p252_p7  ;;  %s5294_s18 = smov [#allocation5]  }
   0xf   : > { %s6456_s15 = scalar_select %p5387_p4, 1, 0 }
  0x10   : > { %s6457_s16 = scalar_select %p5392_p6, 1, 0 }
  0x11   : > { %s6459_s17 = scalar_select %p5397_p8, 1, 0 }
  0x12   : > { %6458 = sst [smem:[#allocation17_spill]] %s6457_s16  ;;  %s264_s19 = sshll.u32 %s5294_s18, 4  ;;  %s5401_s19 = int_to_ptr.vmem [resolvable:$true] %s264_s19 }
  0x13   : > { %p4969_p9 = pneg %p5397_p8  ;;  %s5295_s21 = smov [#allocation8]  }
  0x14   : > { %s296_s22 = sshll.u32 %s5295_s21, 4  ;;  %s5296_s23 = smov [#allocation7]   ;;  %s5412_s22 = int_to_ptr.vmem [resolvable:$true] %s296_s22 }
  0x15   : > { %p5408_p11 = pnand %p4969_p9, %p6448_p1  ;;  %s5414_s24 = sshll.u32 %s5296_s23, 4  ;;  %s281_s24 = int_to_ptr.vmem [resolvable:$true] %s5414_s24 }
  0x16   : > { %s5076_s27 = scalar_lea.hbm %s6439_s1, 1024 }
  0x17   : > { %p5077_p12 = scmp.ne.s32.totalorder %s6439_s1, %s5076_s27  ;;  %p5424_p13 = pneg %p5408_p11 }
  0x18   : > { %p5083_p5 = scmp.lt.u32.totalorder %s5076_s27, %s6439_s1 }
  0x19   : > { %p5079_p0 = pnand %p5424_p13, %p5077_p12 }
  0x1b   : > { %p5080_p3 = pneg %p5079_p0 }
  0x1d   : > { %p5085_p7 = pnand %p5083_p5, %p5080_p3 }
  0x1f   : > { %5088 = shalt.err (!%p5085_p7)
}
  0x20   : > { %s5089_s23 = scalar_lea.vmem %s5401_s19, 1024  ;;  %p5097_p2 = scmp.lt.s32.totalorder %s5401_s19, %s5401_s19 }
  0x21   : > { %p5090_p9 = scmp.ne.s32.totalorder %s5401_s19, %s5089_s23  ;;  %p5098_p6 = scmp.lt.s32.totalorder %s5089_s23, %s5089_s23 }
  0x23   : > { %p5092_p10 = pnand %p5090_p9, %p5424_p13  ;;  %p5099_p12 = por %p5098_p6, %p5097_p2 }
  0x25   : > { %p5093_p1 = pneg %p5092_p10 }
  0x27   : > { %p5100_p0 = pnand %p5099_p12, %p5093_p1 }
  0x29   : > { %5103 = shalt.err (!%p5100_p0)
}
  0x2a   : > { %s5297_s25 = smov 64   ;;  %s5298_s26 = smov 4  }
  0x2b   : > { %4972 = dma.hbm_to_vmem [thread:$0]  (!%p5408_p11), %s6439_s1, 1024, %s5401_s19, [#allocation6], %s5297_s25, %s5297_s25, %s5298_s26  }
  0x2c   : > { %s5104_s21 = scalar_lea.hbm %s6443_s5, 1024 }
  0x2d   : > { %p5105_p1 = scmp.ne.s32.totalorder %s6443_s5, %s5104_s21  ;;  %p5111_p10 = scmp.lt.u32.totalorder %s5104_s21, %s6443_s5 }
  0x2f   : > { %p5107_p2 = pnand %p5105_p1, %p5424_p13 }
  0x31   : > { %p5108_p6 = pneg %p5107_p2 }
  0x33   : > { %p5113_p3 = pnand %p5111_p10, %p5108_p6 }
  0x35   : > { %5116 = shalt.err (!%p5113_p3)
}
  0x36   : > { %s5117_s19 = scalar_lea.vmem %s5412_s22, 1024  ;;  %p5125_p12 = scmp.lt.s32.totalorder %s5412_s22, %s5412_s22 }
  0x37   : > { %p5118_p5 = scmp.ne.s32.totalorder %s5412_s22, %s5117_s19  ;;  %p5126_p0 = scmp.lt.s32.totalorder %s5117_s19, %s5117_s19 }
  0x39   : > { %p5120_p7 = pnand %p5118_p5, %p5424_p13  ;;  %p5127_p1 = por %p5126_p0, %p5125_p12 }
  0x3b   : > { %p5121_p9 = pneg %p5120_p7 }
  0x3d   : > { %p5128_p2 = pnand %p5127_p1, %p5121_p9 }
  0x3f   : > { %5131 = shalt.err (!%p5128_p2)
}
  0x40   : > { %4978 = dma.hbm_to_vmem [thread:$0]  (!%p5408_p11), %s6443_s5, 1024, %s5412_s22, [#allocation9], %s5297_s25, %s5297_s25, %s5298_s26  }
  0x41   : > { %s5132_s28 = scalar_lea.hbm %s6441_s3, 1024 }
  0x42   : > { %p5133_p6 = scmp.ne.s32.totalorder %s6441_s3, %s5132_s28  ;;  %p5139_p5 = scmp.lt.u32.totalorder %s5132_s28, %s6441_s3 }
  0x44   : > { %p5135_p10 = pnand %p5133_p6, %p5424_p13 }
  0x46   : > { %p5136_p3 = pneg %p5135_p10 }
  0x48   : > { %p5141_p7 = pnand %p5139_p5, %p5136_p3 }
  0x4a   : > { %5144 = shalt.err (!%p5141_p7)
}
  0x4b   : > { %s5145_s19 = scalar_lea.vmem %s281_s24, 1024  ;;  %p5153_p1 = scmp.lt.s32.totalorder %s281_s24, %s281_s24 }
  0x4c   : > { %p5146_p9 = scmp.ne.s32.totalorder %s281_s24, %s5145_s19  ;;  %p5154_p2 = scmp.lt.s32.totalorder %s5145_s19, %s5145_s19 }
  0x4e   : > { %p5148_p12 = pnand %p5146_p9, %p5424_p13  ;;  %p5155_p4 = por %p5154_p2, %p5153_p1 }
  0x50   : > { %p5149_p0 = pneg %p5148_p12 }
  0x52   : > { %p5156_p8 = pnand %p5155_p4, %p5149_p0 }
  0x54   : > { %5159 = shalt.err (!%p5156_p8)
}
  0x55   : > { %4975 = dma.hbm_to_vmem [thread:$0]  (!%p5408_p11), %s6441_s3, 1024, %s281_s24, [#allocation6], %s5297_s25, %s5297_s25, %s5298_s26  }
  0x56   : > { %s5299_s30 = smov [#allocation10]   ;;  %s5160_s29 = scalar_lea.hbm %s6445_s7, 1024 }
  0x57   : > { %s312_s16 = sshll.u32 %s5299_s30, 4  ;;  %p5161_p4 = scmp.ne.s32.totalorder %s6445_s7, %s5160_s29  ;;  %s313_s16 = int_to_ptr.vmem [resolvable:$true] %s312_s16 }
  0x58   : > { %p5167_p10 = scmp.lt.u32.totalorder %s5160_s29, %s6445_s7 }
  0x59   : > { %p5163_p8 = pnand %p5161_p4, %p5424_p13 }
  0x5b   : > { %p5164_p6 = pneg %p5163_p8 }
  0x5d   : > { %p5169_p3 = pnand %p5167_p10, %p5164_p6 }
  0x5f   : > { %5172 = shalt.err (!%p5169_p3)
}
  0x60   : > { %s5173_s24 = scalar_lea.vmem %s313_s16, 1024  ;;  %p5181_p12 = scmp.lt.s32.totalorder %s313_s16, %s313_s16 }
  0x61   : > { %p5174_p5 = scmp.ne.s32.totalorder %s313_s16, %s5173_s24  ;;  %p5182_p0 = scmp.lt.s32.totalorder %s5173_s24, %s5173_s24 }
  0x63   : > { %p5176_p7 = pnand %p5174_p5, %p5424_p13  ;;  %p5183_p1 = por %p5182_p0, %p5181_p12 }
  0x65   : > { %p5177_p9 = pneg %p5176_p7 }
  0x67   : > { %p5184_p2 = pnand %p5183_p1, %p5177_p9 }
  0x69   : > { %5187 = shalt.err (!%p5184_p2)
}
  0x6a   : > { %4981 = dma.hbm_to_vmem [thread:$0]  (!%p5408_p11), %s6445_s7, 1024, %s313_s16, [#allocation9], %s5297_s25, %s5297_s25, %s5298_s26  }
  0x6b   : > { %s5518_s14 = sadd.s32 1, %s5292_s12   ;;  %s34_s20 = sadd.s32 1, %s5288_s11 }
  0x6c   : > { %s31_s30 = ssub.s32 %s5292_s12, %s5518_s14  ;;  %p41_p13 = scmp.ne.s32.totalorder %s5288_s11, %s5284_s10 }
  0x6d   : > { %p32_p4 = scmp.eq.s32.totalorder %s31_s30, 0  ;;  %p42_p8 = scmp.eq.s32.totalorder %s5292_s12, 0 }
  0x6e   : > { %p6462_p6 = scmp.eq.s32.totalorder %s5378_s13, 1  ;;  %p4994_p3 = scmp.lt.s32.totalorder %s5292_s12, 2 }
  0x6f   : > { %s5534_s28 = scalar_select %p32_p4, %s5288_s11, %s34_s20  }
  0x70   : > { %p5528_p10 = por %p6462_p6, %p41_p13  ;;  %p43_p5 = por %p42_p8, %p41_p13 }
  0x71   : > { %s329_s29 = sand.u32 1, %s5288_s11   ;;  %s4083_s25 = sshll.u32 %s5292_s12, 14 }
  0x72   : > { %s4035_s18 = sshll.u32 %s329_s29, 10  ;;  %s5541_s21 = scalar_lea.hbm %s6438_s0, %s4083_s25 }
  0x73   : > { %s333_s23 = scalar_lea.vmem [#allocation2], %s4035_s18  ;;  %p5545_p11 = pnand %p4994_p3, %p43_p5 }
  0x74   : > { %s340_s19 = sshll.u32 %s333_s23, 4  ;;  %s5549_s22 = scalar_lea.sflag [#allocation3], %s329_s29  ;;  %s5543_s19 = int_to_ptr.vmem [resolvable:$true] %s340_s19 }
  0x75   : > { %s5188_s9 = scalar_lea.hbm %s5541_s21, 16384  ;;  %p5190_p9 = pneg %p5545_p11 }
  0x76   : > { %p5189_p7 = scmp.ne.s32.totalorder %s5541_s21, %s5188_s9  ;;  %s5193_s18 = scalar_lea.hbm %s6438_s0, 32768 }
  0x77   : > { %p5194_p1 = scmp.lt.u32.totalorder %s5541_s21, %s6438_s0  ;;  %p5195_p2 = scmp.lt.u32.totalorder %s5193_s18, %s5188_s9 }
  0x78   : > { %p5191_p12 = pnand %p5190_p9, %p5189_p7  ;;  %p5197_p4 = scmp.lt.u32.totalorder %s5188_s9, %s5541_s21 }
  0x79   : > { %p5196_p13 = por %p5195_p2, %p5194_p1 }
  0x7a   : > { %p5192_p0 = pneg %p5191_p12 }
  0x7b   : > { %p5198_p8 = por %p5197_p4, %p5196_p13 }
  0x7d   : > { %p5199_p6 = pnand %p5198_p8, %p5192_p0 }
  0x7f   : > { %5202 = shalt.err (!%p5199_p6)
}
  0x80   : > { %s5203_s29 = scalar_lea.vmem %s5543_s19, 16384  ;;  %s5300_s16 = smov [#allocation2]  }
  0x81   : > { %p5204_p3 = scmp.ne.s32.totalorder %s5543_s19, %s5203_s29  ;;  %s5208_s23 = sshll.u32 %s5300_s16, 4  ;;  %s5209_s23 = int_to_ptr.vmem [resolvable:$false] %s5208_s23 }
  0x82   : > { %s5210_s20 = scalar_lea.vmem %s5209_s23, 32768  ;;  %p5211_p12 = scmp.lt.s32.totalorder %s5543_s19, %s5209_s23 }
  0x83   : > { %p5206_p5 = pnand %p5204_p3, %p5190_p9  ;;  %p5212_p1 = scmp.lt.s32.totalorder %s5210_s20, %s5203_s29 }
  0x85   : > { %p5207_p7 = pneg %p5206_p5  ;;  %p5213_p2 = por %p5212_p1, %p5211_p12 }
  0x87   : > { %p5214_p13 = pnand %p5213_p2, %p5207_p7 }
  0x89   : > { %5217 = shalt.err (!%p5214_p13)
}
  0x8a   : > { %s5301_s9 = smov 128   ;;  %s5302_s30 = smov 8  }
  0x8b   : > { %4985 = dma.hbm_to_vmem [thread:$0]  (!%p5545_p11), %s5541_s21, 16384, %s5543_s19, %s5549_s22, %s5301_s9, %s5301_s9, %s5302_s30  }
  0x8c   : > { %p6465_p9 = scmp.ne.s32.totalorder %s6459_s17, 0 }
  0x8d   : > { %s5580_s18 = sand.u32 (!%p6465_p9), 1, %s5284_s10   ;;  %p6466_p0 = scmp.ne.s32.totalorder (!%p6465_p9), %s6456_s15, 0 }
  0x8e   : > { %352 = sbr.rel (%p6465_p9) target bundleno = 1338 (0x53a), region = 56  ;;  %s4039_s25 = sshll.u32 (!%p6465_p9), %s5580_s18, 10 }
  0x8f   : > { %s355_s26 = scalar_lea.sflag (!%p6465_p9), [#allocation3], %s5580_s18  ;;  %s5586_s29 = scalar_lea.vmem (!%p6465_p9), [#allocation2], %s4039_s25 }
  0x95   : > { %5263 = dma.done.wait (%p6466_p0), %s355_s26, 16384  }
  0x96   : > { %5265 = vsyncadd (%p6466_p0), %s355_s26, 4294950912  ;;  %p6467_p11 = scmp.eq.s32.totalorder %s5378_s13, 0 }
  0x98   : > { %5267 = dma.done.wait (%p6467_p11), [#allocation6], 2048   ;;  %p6468_p4 = pmov %p6467_p11 }
  0x9a   : > { %5269 = vsyncadd (%p6468_p4), [#allocation6], 4294965248  ;;  %p6469_p8 = pmov %p6468_p4 }
  0x9b   : > { %p6470_p6 = pmov %p6468_p4 }
  0x9c   : > { %5271 = dma.done.wait (%p6469_p8), [#allocation9], 2048  }
  0x9d   : > { %5273 = vsyncadd (%p6470_p6), [#allocation9], 4294965248  ;;  %v5043_v0 = vld [vmem:[#allocation5] sm:$0xff]   ;;  %v5044_v1 = vld [vmem:[#allocation5 + $0x8] sm:$0xff]   ;;  %s6127_s20 = scalar_lea.vmem [#allocation11], %s4039_s25  ;;  %s4084_s25 = sshll.u32 %s5378_s13, 14 }
  0x9e   : > { %4373 = vmatprep.subr.bf16.mxu0 %v5043_v0  ;;  %v5045_v2 = vld [vmem:[#allocation5 + $0x10] sm:$0xff]   ;;  %v5046_v3 = vld [vmem:[#allocation5 + $0x18] sm:$0xff]   ;;  %v412_v4 = vld [vmem:[%s5586_s29] sm:$0xff]  ;;  %s3917_s26 = sshll.u32 %s6127_s20, 4  ;;  %s6471_s17 = sld [smem:[#allocation18_spill]]  ;;  %s6391_s26 = int_to_ptr.vmem [resolvable:$true] %s3917_s26 }
  0x9f   : > { %4374 = vmatpush3.bf16.msra.mxu0 %v5043_v0  ;;  %v413_v5 = vld [vmem:[%s5586_s29 + $0x8] sm:$0xff]  ;;  %v5047_v7 = vld [vmem:[#allocation5 + $0x20] sm:$0xff]   ;;  %v5049_v9 = vld [vmem:[#allocation5 + $0x30] sm:$0xff]   ;;  %s3904_s13 = scalar_lea.sflag [#allocation4], %s5580_s18  ;;  %s5218_s19 = scalar_lea.vmem %s6391_s26, 16384 }
  0xa0   : > { %4375 = vmatprep.subr.bf16.mxu0 %v5044_v1  ;;  %v540_v6 = vpack.c.bf16 %v413_v5, %v412_v4  ;;  %v5048_v8 = vld [vmem:[#allocation5 + $0x28] sm:$0xff]   ;;  %v5050_v10 = vld [vmem:[#allocation5 + $0x38] sm:$0xff]   ;;  %v414_v11 = vld [vmem:[%s5586_s29 + $0x10] sm:$0xff]  ;;  %p5219_p3 = scmp.ne.s32.totalorder %s6391_s26, %s5218_s19  ;;  %s5304_s24 = smov [#allocation11]  }
  0xa1   : > { %v415_v12 = vld [vmem:[%s5586_s29 + $0x18] sm:$0xff]  ;;  %v416_v13 = vld [vmem:[%s5586_s29 + $0x20] sm:$0xff]  ;;  %v417_v14 = vld [vmem:[%s5586_s29 + $0x28] sm:$0xff]  ;;  %s5222_s22 = sshll.u32 %s5304_s24, 4  ;;  %s5223_s22 = int_to_ptr.vmem [resolvable:$false] %s5222_s22 }
  0xa2   : > { %4389 = vmatprep.mubr.bf16.mxu0 %v540_v6  ;;  %v541_v15 = vpack.c.bf16 %v415_v12, %v414_v11  ;;  %v542_v16 = vpack.c.bf16 %v417_v14, %v416_v13  ;;  %v418_v17 = vld [vmem:[%s5586_s29 + $0x30] sm:$0xff]  ;;  %v419_v18 = vld [vmem:[%s5586_s29 + $0x38] sm:$0xff]  ;;  %v420_v19 = vld [vmem:[%s5586_s29 + $0x40] sm:$0xff]  ;;  %p5220_p5 = pnand %p5219_p3, %p5528_p10  ;;  %s5224_s16 = scalar_lea.vmem %s5223_s22, 32768 }
  0xa3   : > { %4376 = vmatpush3.bf16.msra.mxu0 %v5044_v1  ;;  %v421_v20 = vld [vmem:[%s5586_s29 + $0x48] sm:$0xff]  ;;  %v543_v21 = vpack.c.bf16 %v419_v18, %v418_v17  ;;  %v422_v23 = vld [vmem:[%s5586_s29 + $0x50] sm:$0xff]  ;;  %v423_v24 = vld [vmem:[%s5586_s29 + $0x58] sm:$0xff]  ;;  %p5225_p12 = scmp.lt.s32.totalorder %s6391_s26, %s5223_s22  ;;  %p5226_p1 = scmp.lt.s32.totalorder %s5224_s16, %s5218_s19 }
  0xa4   : > { %4377 = vmatprep.subr.bf16.mxu0 %v5045_v2  ;;  %v544_v22 = vpack.c.bf16 %v421_v20, %v420_v19  ;;  %v424_v25 = vld [vmem:[%s5586_s29 + $0x60] sm:$0xff]  ;;  %v425_v26 = vld [vmem:[%s5586_s29 + $0x68] sm:$0xff]  ;;  %v545_v27 = vpack.c.bf16 %v423_v24, %v422_v23  ;;  %v426_v29 = vld [vmem:[%s5586_s29 + $0x70] sm:$0xff]  ;;  %s6389_s21 = scalar_lea.hbm %s6471_s17, %s4084_s25  ;;  %p5221_p7 = pneg %p5220_p5 }
  0xa5   : > { %v546_v28 = vpack.c.bf16 %v425_v26, %v424_v25  ;;  %v427_v30 = vld [vmem:[%s5586_s29 + $0x78] sm:$0xff]  ;;  %v428_v31 = vld [vmem:[%s5586_s29 + $0x80] sm:$0xff]  ;;  %v429_v32 = vld [vmem:[%s5586_s29 + $0x88] sm:$0xff]  ;;  %p5227_p2 = por %p5226_p1, %p5225_p12 }
  0xa6   : > { %v547_v33 = vpack.c.bf16 %v427_v30, %v426_v29  ;;  %v548_v34 = vpack.c.bf16 %v429_v32, %v428_v31  ;;  %v430_v35 = vld [vmem:[%s5586_s29 + $0x90] sm:$0xff]  ;;  %v431_v36 = vld [vmem:[%s5586_s29 + $0x98] sm:$0xff]  ;;  %v432_v37 = vld [vmem:[%s5586_s29 + $0xa0] sm:$0xff] }
  0xa7   : > { %4378 = vmatpush3.bf16.msra.mxu0 %v5045_v2  ;;  %v433_v38 = vld [vmem:[%s5586_s29 + $0xa8] sm:$0xff]  ;;  %v549_v39 = vpack.c.bf16 %v431_v36, %v430_v35  ;;  %v434_v41 = vld [vmem:[%s5586_s29 + $0xb0] sm:$0xff]  ;;  %v435_v42 = vld [vmem:[%s5586_s29 + $0xb8] sm:$0xff]  ;;  %p5228_p13 = pnand %p5227_p2, %p5221_p7 }
  0xa8   : > { %4379 = vmatprep.subr.bf16.mxu0 %v5046_v3  ;;  %v550_v40 = vpack.c.bf16 %v433_v38, %v432_v37  ;;  %v436_v43 = vld [vmem:[%s5586_s29 + $0xc0] sm:$0xff]  ;;  %v437_v44 = vld [vmem:[%s5586_s29 + $0xc8] sm:$0xff]  ;;  %v551_v45 = vpack.c.bf16 %v435_v42, %v434_v41  ;;  %v438_v47 = vld [vmem:[%s5586_s29 + $0xd0] sm:$0xff] }
  0xa9   : > { %v552_v46 = vpack.c.bf16 %v437_v44, %v436_v43  ;;  %v439_v48 = vld [vmem:[%s5586_s29 + $0xd8] sm:$0xff]  ;;  %v440_v49 = vld [vmem:[%s5586_s29 + $0xe0] sm:$0xff]  ;;  %v441_v50 = vld [vmem:[%s5586_s29 + $0xe8] sm:$0xff] }
  0xaa   : > { %v553_v51 = vpack.c.bf16 %v439_v48, %v438_v47  ;;  %v554_v52 = vpack.c.bf16 %v441_v50, %v440_v49  ;;  %v442_v53 = vld [vmem:[%s5586_s29 + $0xf0] sm:$0xff]  ;;  %v443_v54 = vld [vmem:[%s5586_s29 + $0xf8] sm:$0xff]  ;;  %v444_v55 = vld [vmem:[%s5586_s29 + $0x100] sm:$0xff] }
  0xab   : > { %4380 = vmatpush3.bf16.msra.mxu0 %v5046_v3  ;;  %v445_v56 = vld [vmem:[%s5586_s29 + $0x108] sm:$0xff]  ;;  %v555_v57 = vpack.c.bf16 %v443_v54, %v442_v53  ;;  %v5051_v59 = vld [vmem:[#allocation8] sm:$0xff]   ;;  %v446_v61 = vld [vmem:[%s5586_s29 + $0x110] sm:$0xff] }
  0xac   : > { %4381 = vmatprep.subr.bf16.mxu0 %v5047_v7  ;;  %v556_v58 = vpack.c.bf16 %v445_v56, %v444_v55  ;;  %v5052_v60 = vld [vmem:[#allocation7] sm:$0xff]   ;;  %v447_v62 = vld [vmem:[%s5586_s29 + $0x118] sm:$0xff]  ;;  %v449_v0 = vld [vmem:[%s5586_s29 + $0x128] sm:$0xff] }
  0xad   : > { %v448_v63 = vld [vmem:[%s5586_s29 + $0x120] sm:$0xff]  ;;  %4517 = vmatprep.subr.bf16.mxu1 %v5052_v60  ;;  %v557_v1 = vpack.c.bf16 %v447_v62, %v446_v61  ;;  %v5053_v3 = vld [vmem:[#allocation7 + $0x8] sm:$0xff]   ;;  %v5054_v4 = vld [vmem:[#allocation7 + $0x10] sm:$0xff]  }
  0xae   : > { %4518 = vmatpush3.bf16.msra.mxu1 %v5052_v60  ;;  %v558_v2 = vpack.c.bf16 %v449_v0, %v448_v63  ;;  %v450_v5 = vld [vmem:[%s5586_s29 + $0x130] sm:$0xff]  ;;  %v451_v6 = vld [vmem:[%s5586_s29 + $0x138] sm:$0xff]  ;;  %v5056_v12 = vld [vmem:[#allocation7 + $0x20] sm:$0xff]  }
  0xaf   : > { %4382 = vmatpush3.bf16.msra.mxu0 %v5047_v7  ;;  %v452_v7 = vld [vmem:[%s5586_s29 + $0x140] sm:$0xff]  ;;  %4519 = vmatprep.subr.bf16.mxu1 %v5053_v3  ;;  %v5055_v11 = vld [vmem:[#allocation7 + $0x18] sm:$0xff]   ;;  %v454_v13 = vld [vmem:[%s5586_s29 + $0x150] sm:$0xff] }
  0xb0   : > { %4383 = vmatprep.subr.bf16.mxu0 %v5048_v8  ;;  %v455_v14 = vld [vmem:[%s5586_s29 + $0x158] sm:$0xff]  ;;  %v5057_v19 = vld [vmem:[#allocation7 + $0x28] sm:$0xff]   ;;  %v458_v20 = vld [vmem:[%s5586_s29 + $0x170] sm:$0xff] }
  0xb1   : > { %v561_v17 = vpack.c.bf16 %v455_v14, %v454_v13  ;;  %v461_v23 = vld [vmem:[%s5586_s29 + $0x188] sm:$0xff]  ;;  %v5058_v25 = vld [vmem:[#allocation7 + $0x30] sm:$0xff]   ;;  %v463_v29 = vld [vmem:[%s5586_s29 + $0x198] sm:$0xff] }
  0xb2   : > { %4520 = vmatpush3.bf16.msra.mxu1 %v5053_v3  ;;  %v464_v30 = vld [vmem:[%s5586_s29 + $0x1a0] sm:$0xff]  ;;  %v465_v31 = vld [vmem:[%s5586_s29 + $0x1a8] sm:$0xff]  ;;  %v466_v35 = vld [vmem:[%s5586_s29 + $0x1b0] sm:$0xff] }
  0xb3   : > { %4384 = vmatpush3.bf16.msra.mxu0 %v5048_v8  ;;  %v453_v8 = vld [vmem:[%s5586_s29 + $0x148] sm:$0xff]  ;;  %4521 = vmatprep.subr.bf16.mxu1 %v5054_v4  ;;  %v467_v36 = vld [vmem:[%s5586_s29 + $0x1b8] sm:$0xff]  ;;  %v468_v37 = vld [vmem:[%s5586_s29 + $0x1c0] sm:$0xff] }
  0xb4   : > { %4385 = vmatprep.subr.bf16.mxu0 %v5049_v9  ;;  %v5060_v32 = vld [vmem:[#allocation8 + $0x8] sm:$0xff]   ;;  %v470_v41 = vld [vmem:[%s5586_s29 + $0x1d0] sm:$0xff]  ;;  %v471_v42 = vld [vmem:[%s5586_s29 + $0x1d8] sm:$0xff] }
  0xb5   : > { %v469_v38 = vld [vmem:[%s5586_s29 + $0x1c8] sm:$0xff]  ;;  %v472_v43 = vld [vmem:[%s5586_s29 + $0x1e0] sm:$0xff]  ;;  %v474_v47 = vld [vmem:[%s5586_s29 + $0x1f0] sm:$0xff] }
  0xb6   : > { %4522 = vmatpush3.bf16.msra.mxu1 %v5054_v4  ;;  %v473_v44 = vld [vmem:[%s5586_s29 + $0x1e8] sm:$0xff]  ;;  %v475_v48 = vld [vmem:[%s5586_s29 + $0x1f8] sm:$0xff]  ;;  %v476_v49 = vld [vmem:[%s5586_s29 + $0x200] sm:$0xff] }
  0xb7   : > { %4386 = vmatpush3.bf16.msra.mxu0 %v5049_v9  ;;  %v559_v9 = vpack.c.bf16 %v451_v6, %v450_v5  ;;  %4523 = vmatprep.subr.bf16.mxu1 %v5055_v11  ;;  %v477_v50 = vld [vmem:[%s5586_s29 + $0x208] sm:$0xff]  ;;  %v478_v53 = vld [vmem:[%s5586_s29 + $0x210] sm:$0xff]  ;;  %v479_v54 = vld [vmem:[%s5586_s29 + $0x218] sm:$0xff] }
  0xb8   : > { %4387 = vmatprep.subr.bf16.mxu0 %v5050_v10  ;;  %v480_v55 = vld [vmem:[%s5586_s29 + $0x220] sm:$0xff]  ;;  %v481_v56 = vld [vmem:[%s5586_s29 + $0x228] sm:$0xff]  ;;  %v482_v60 = vld [vmem:[%s5586_s29 + $0x230] sm:$0xff] }
  0xb9   : > { %v483_v61 = vld [vmem:[%s5586_s29 + $0x238] sm:$0xff]  ;;  %v484_v62 = vld [vmem:[%s5586_s29 + $0x240] sm:$0xff]  ;;  %v485_v63 = vld [vmem:[%s5586_s29 + $0x248] sm:$0xff] }
  0xba   : > { %4524 = vmatpush3.bf16.msra.mxu1 %v5055_v11  ;;  %v575_v0 = vpack.c.bf16 %v483_v61, %v482_v60  ;;  %v487_v3 = vld [vmem:[%s5586_s29 + $0x258] sm:$0xff]  ;;  %v488_v4 = vld [vmem:[%s5586_s29 + $0x260] sm:$0xff]  ;;  %v489_v5 = vld [vmem:[%s5586_s29 + $0x268] sm:$0xff] }
  0xbb   : > { %4388 = vmatpush3.bf16.msra.mxu0 %v5050_v10  ;;  %v560_v10 = vpack.c.bf16 %v453_v8, %v452_v7  ;;  %4525 = vmatprep.subr.bf16.mxu1 %v5056_v12  ;;  %v578_v7 = vpack.c.bf16 %v489_v5, %v488_v4  ;;  %v490_v8 = vld [vmem:[%s5586_s29 + $0x270] sm:$0xff]  ;;  %v493_v11 = vld [vmem:[%s5586_s29 + $0x288] sm:$0xff] }
  0xbc   : > { %4661 = vmatprep.subr.bf16.mxu0 %v5051_v59  ;;  %v494_v14 = vld [vmem:[%s5586_s29 + $0x290] sm:$0xff] }
  0xbe   : > { %4390 = vmatmul.mubr.bf16.vlgmr.msra.gmra.mrb[0].mxu0 %v541_v15  ;;  %v456_v15 = vld [vmem:[%s5586_s29 + $0x160] sm:$0xff]  ;;  %4526 = vmatpush3.bf16.msra.mxu1 %v5056_v12 }
  0xbf   : > { %4393 = vmatprep.mubr.bf16.mxu0 %v542_v16  ;;  %4662 = vmatpush3.bf16.msra.mxu0 %v5051_v59  ;;  %v457_v16 = vld [vmem:[%s5586_s29 + $0x168] sm:$0xff]  ;;  %v574_v59 = vpack.c.bf16 %v481_v56, %v480_v55  ;;  %v520_v55 = vld [vmem:[%s5586_s29 + $0x360] sm:$0xff] }
  0xc0   : > { %v562_v18 = vpack.c.bf16 %v457_v16, %v456_v15  ;;  %4527 = vmatprep.subr.bf16.mxu1 %v5057_v19  ;;  %4663 = vmatprep.subr.bf16.mxu0 %v5060_v32  ;;  %v495_v15 = vld [vmem:[%s5586_s29 + $0x298] sm:$0xff]  ;;  %v496_v16 = vld [vmem:[%s5586_s29 + $0x2a0] sm:$0xff]  ;;  %v521_v56 = vld [vmem:[%s5586_s29 + $0x368] sm:$0xff] }
  0xc1   : > { %v594_v60 = vpack.c.bf16 %v521_v56, %v520_v55 }
  0xc2   : > { %4528 = vmatpush3.bf16.msra.mxu1 %v5057_v19  ;;  %v581_v19 = vpack.c.bf16 %v495_v15, %v494_v14  ;;  %v526_v14 = vld [vmem:[%s5586_s29 + $0x390] sm:$0xff]  ;;  %v527_v15 = vld [vmem:[%s5586_s29 + $0x398] sm:$0xff] }
  0xc3   : > { %4529 = vmatprep.subr.bf16.mxu1 %v5058_v25  ;;  %4664 = vmatpush3.bf16.msra.mxu0 %v5060_v32 }
  0xc6   : > { %4394 = vmatmul.mubr.bf16.gmra.mrb[4].mxu0 %v543_v21  ;;  %v459_v21 = vld [vmem:[%s5586_s29 + $0x178] sm:$0xff]  ;;  %4530 = vmatpush3.bf16.msra.mxu1 %v5058_v25 }
  0xc7   : > { %4397 = vmatprep.mubr.bf16.mxu0 %v544_v22  ;;  %v460_v22 = vld [vmem:[%s5586_s29 + $0x180] sm:$0xff]  ;;  %v563_v24 = vpack.c.bf16 %v459_v21, %v458_v20  ;;  %v498_v21 = vld [vmem:[%s5586_s29 + $0x2b0] sm:$0xff] }
  0xc8   : > { %v564_v26 = vpack.c.bf16 %v461_v23, %v460_v22  ;;  %v499_v22 = vld [vmem:[%s5586_s29 + $0x2b8] sm:$0xff]  ;;  %v500_v23 = vld [vmem:[%s5586_s29 + $0x2c0] sm:$0xff] }
  0xc9   : > { %v583_v25 = vpack.c.bf16 %v499_v22, %v498_v21  ;;  %v5064_v21 = vld [vmem:[#allocation8 + $0x28] sm:$0xff]  }
  0xce   : > { %4398 = vmatmul.mubr.bf16.gmra.mrb[8].mxu0 %v545_v27  ;;  %v5059_v27 = vld [vmem:[#allocation7 + $0x38] sm:$0xff]  }
  0xcf   : > { %4401 = vmatprep.mubr.bf16.mxu0 %v546_v28  ;;  %v462_v28 = vld [vmem:[%s5586_s29 + $0x190] sm:$0xff]  ;;  %4531 = vmatprep.subr.bf16.mxu1 %v5059_v27 }
  0xd0   : > { %4532 = vmatpush3.bf16.msra.mxu1 %v5059_v27  ;;  %v502_v27 = vld [vmem:[%s5586_s29 + $0x2d0] sm:$0xff] }
  0xd6   : > { %4402 = vmatmul.mubr.bf16.gmra.mrb[12].mxu0 %v547_v33  ;;  %v565_v33 = vpack.c.bf16 %v463_v29, %v462_v28  ;;  %v503_v28 = vld [vmem:[%s5586_s29 + $0x2d8] sm:$0xff]  ;;  %v504_v29 = vld [vmem:[%s5586_s29 + $0x2e0] sm:$0xff] }
  0xd7   : > { %4405 = vmatprep.mubr.bf16.mxu0 %v548_v34  ;;  %v566_v34 = vpack.c.bf16 %v465_v31, %v464_v30  ;;  %v505_v30 = vld [vmem:[%s5586_s29 + $0x2e8] sm:$0xff]  ;;  %v585_v31 = vpack.c.bf16 %v503_v28, %v502_v27 }
  0xd8   : > { %v586_v32 = vpack.c.bf16 %v505_v30, %v504_v29 }
  0xde   : > { %4406 = vmatmul.mubr.bf16.gmra.mrb[16].mxu0 %v549_v39  ;;  %v567_v39 = vpack.c.bf16 %v467_v36, %v466_v35  ;;  %v508_v35 = vld [vmem:[%s5586_s29 + $0x300] sm:$0xff]  ;;  %v509_v36 = vld [vmem:[%s5586_s29 + $0x308] sm:$0xff] }
  0xdf   : > { %4409 = vmatprep.mubr.bf16.mxu0 %v550_v40  ;;  %v568_v40 = vpack.c.bf16 %v469_v38, %v468_v37  ;;  %v588_v38 = vpack.c.bf16 %v509_v36, %v508_v35  ;;  %v533_v35 = vld [vmem:[%s5586_s29 + $0x3c8] sm:$0xff] }
  0xe6   : > { %4410 = vmatmul.mubr.bf16.gmra.mrb[20].mxu0 %v551_v45  ;;  %v569_v45 = vpack.c.bf16 %v471_v42, %v470_v41  ;;  %v512_v41 = vld [vmem:[%s5586_s29 + $0x320] sm:$0xff]  ;;  %v513_v42 = vld [vmem:[%s5586_s29 + $0x328] sm:$0xff] }
  0xe7   : > { %4413 = vmatprep.mubr.bf16.mxu0 %v552_v46  ;;  %v570_v46 = vpack.c.bf16 %v473_v44, %v472_v43  ;;  %v5063_v43 = vld [vmem:[#allocation8 + $0x20] sm:$0xff]  }
  0xee   : > { %4414 = vmatmul.mubr.bf16.gmra.mrb[24].mxu0 %v553_v51  ;;  %v571_v51 = vpack.c.bf16 %v475_v48, %v474_v47  ;;  %v515_v47 = vld [vmem:[%s5586_s29 + $0x338] sm:$0xff]  ;;  %v516_v48 = vld [vmem:[%s5586_s29 + $0x340] sm:$0xff] }
  0xef   : > { %4417 = vmatprep.mubr.bf16.mxu0 %v554_v52  ;;  %v572_v52 = vpack.c.bf16 %v477_v50, %v476_v49  ;;  %v517_v49 = vld [vmem:[%s5586_s29 + $0x348] sm:$0xff] }
  0xf6   : > { %4418 = vmatmul.mubr.bf16.gmra.mrb[28].mxu0 %v555_v57  ;;  %v5061_v57 = vld [vmem:[#allocation8 + $0x10] sm:$0xff]  }
  0xf7   : > { %4421 = vmatprep.mubr.bf16.mxu0 %v556_v58  ;;  %v573_v58 = vpack.c.bf16 %v479_v54, %v478_v53  ;;  %4665 = vmatprep.subr.bf16.mxu0 %v5061_v57  ;;  %v518_v53 = vld [vmem:[%s5586_s29 + $0x350] sm:$0xff]  ;;  %v519_v54 = vld [vmem:[%s5586_s29 + $0x358] sm:$0xff] }
  0xf8   : > { %4666 = vmatpush3.bf16.msra.mxu0 %v5061_v57  ;;  %v593_v57 = vpack.c.bf16 %v519_v54, %v518_v53 }
  0xfe   : > { %4422 = vmatmul.mubr.bf16.gmra.mrb[32].mxu0 %v557_v1  ;;  %v576_v1 = vpack.c.bf16 %v485_v63, %v484_v62  ;;  %v522_v63 = vld [vmem:[%s5586_s29 + $0x370] sm:$0xff] }
  0xff   : > { %4425 = vmatprep.mubr.bf16.mxu0 %v558_v2  ;;  %v486_v2 = vld [vmem:[%s5586_s29 + $0x250] sm:$0xff] }
 0x100   : > { %v577_v6 = vpack.c.bf16 %v487_v3, %v486_v2  ;;  %v525_v2 = vld [vmem:[%s5586_s29 + $0x388] sm:$0xff] }
 0x106   : > { %4426 = vmatmul.mubr.bf16.gmra.mrb[36].mxu0 %v559_v9  ;;  %v491_v9 = vld [vmem:[%s5586_s29 + $0x278] sm:$0xff] }
 0x107   : > { %4429 = vmatprep.mubr.bf16.mxu0 %v560_v10  ;;  %v492_v10 = vld [vmem:[%s5586_s29 + $0x280] sm:$0xff]  ;;  %v579_v12 = vpack.c.bf16 %v491_v9, %v490_v8 }
 0x108   : > { %v580_v13 = vpack.c.bf16 %v493_v11, %v492_v10 }
 0x10e   : > { %4430 = vmatmul.mubr.bf16.gmra.mrb[40].mxu0 %v561_v17  ;;  %v497_v17 = vld [vmem:[%s5586_s29 + $0x2a8] sm:$0xff] }
 0x10f   : > { %4433 = vmatprep.mubr.bf16.mxu0 %v562_v18  ;;  %v5062_v18 = vld [vmem:[#allocation8 + $0x18] sm:$0xff]   ;;  %v582_v20 = vpack.c.bf16 %v497_v17, %v496_v16  ;;  %v528_v16 = vld [vmem:[%s5586_s29 + $0x3a0] sm:$0xff]  ;;  %v529_v17 = vld [vmem:[%s5586_s29 + $0x3a8] sm:$0xff] }
 0x110   : > { %4667 = vmatprep.subr.bf16.mxu0 %v5062_v18 }
 0x111   : > { %4668 = vmatpush3.bf16.msra.mxu0 %v5062_v18 }
 0x112   : > { %4669 = vmatprep.subr.bf16.mxu0 %v5063_v43 }
 0x115   : > { %4670 = vmatpush3.bf16.msra.mxu0 %v5063_v43 }
 0x116   : > { %4434 = vmatmul.mubr.bf16.gmra.mrb[44].mxu0 %v563_v24  ;;  %v501_v24 = vld [vmem:[%s5586_s29 + $0x2c8] sm:$0xff]  ;;  %4671 = vmatprep.subr.bf16.mxu0 %v5064_v21 }
 0x117   : > { %4437 = vmatprep.mubr.bf16.mxu0 %v564_v26  ;;  %v584_v26 = vpack.c.bf16 %v501_v24, %v500_v23  ;;  %v597_v24 = vpack.c.bf16 %v527_v15, %v526_v14 }
 0x119   : > { %4672 = vmatpush3.bf16.msra.mxu0 %v5064_v21 }
 0x11e   : > { %4438 = vmatmul.mubr.bf16.gmra.mrb[48].mxu0 %v565_v33  ;;  %v506_v33 = vld [vmem:[%s5586_s29 + $0x2f0] sm:$0xff] }
 0x11f   : > { %4441 = vmatprep.mubr.bf16.mxu0 %v566_v34  ;;  %v507_v34 = vld [vmem:[%s5586_s29 + $0x2f8] sm:$0xff] }
 0x120   : > { %v587_v37 = vpack.c.bf16 %v507_v34, %v506_v33  ;;  %v531_v33 = vld [vmem:[%s5586_s29 + $0x3b8] sm:$0xff]  ;;  %v532_v34 = vld [vmem:[%s5586_s29 + $0x3c0] sm:$0xff] }
 0x126   : > { %4442 = vmatmul.mubr.bf16.gmra.mrb[52].mxu0 %v567_v39  ;;  %v510_v39 = vld [vmem:[%s5586_s29 + $0x310] sm:$0xff] }
 0x127   : > { %4445 = vmatprep.mubr.bf16.mxu0 %v568_v40  ;;  %v511_v40 = vld [vmem:[%s5586_s29 + $0x318] sm:$0xff] }
 0x128   : > { %v589_v44 = vpack.c.bf16 %v511_v40, %v510_v39 }
 0x12e   : > { %4446 = vmatmul.mubr.bf16.gmra.mrb[56].mxu0 %v569_v45  ;;  %v590_v45 = vpack.c.bf16 %v513_v42, %v512_v41  ;;  %v600_v42 = vpack.c.bf16 %v533_v35, %v532_v34 }
 0x12f   : > { %4449 = vmatprep.mubr.bf16.mxu0 %v570_v46  ;;  %v514_v46 = vld [vmem:[%s5586_s29 + $0x330] sm:$0xff] }
 0x130   : > { %v591_v50 = vpack.c.bf16 %v515_v47, %v514_v46 }
 0x136   : > { %4450 = vmatmul.mubr.bf16.gmra.mrb[60].mxu0 %v571_v51  ;;  %v592_v51 = vpack.c.bf16 %v517_v49, %v516_v48  ;;  %v534_v48 = vld [vmem:[%s5586_s29 + $0x3d0] sm:$0xff]  ;;  %v535_v49 = vld [vmem:[%s5586_s29 + $0x3d8] sm:$0xff] }
 0x137   : > { %4453 = vmatprep.mubr.bf16.mxu0 %v572_v52  ;;  %v1281_v52 = vlaneseq  ;;  %v601_v56 = vpack.c.bf16 %v535_v49, %v534_v48 }
 0x13e   : > { %4454 = vmatmul.mubr.bf16.gmra.mrb[64].mxu0 %v573_v58  ;;  %v1282_v58 = vshrl.u32 %v1281_v52, 7 }
 0x13f   : > { %4457 = vmatprep.mubr.bf16.mxu0 %v574_v59  ;;  %v1277_v59 = vld [vmem:[%s6440_s2] sm:$0x1] }
 0x140   : > { %v1279_v61 = vpack.i.b16 %v1277_v59, %v1277_v59  ;;  %v5713_v62 = vsub.s32 0, %v1282_v58 }
 0x142   : > { %v5720_v5 = vrot.slane %v1279_v61, %v5713_v62 }
 0x146   : > { %4458 = vmatmul.mubr.bf16.gmra.mrb[68].mxu0 %v575_v0  ;;  %v523_v0 = vld [vmem:[%s5586_s29 + $0x378] sm:$0xff] }
 0x147   : > { %4461 = vmatprep.mubr.bf16.mxu0 %v576_v1  ;;  %v524_v1 = vld [vmem:[%s5586_s29 + $0x380] sm:$0xff] }
 0x148   : > { %v596_v8 = vpack.c.bf16 %v525_v2, %v524_v1  ;;  %v538_v1 = vld [vmem:[%s5586_s29 + $0x3f0] sm:$0xff]  ;;  %v539_v2 = vld [vmem:[%s5586_s29 + $0x3f8] sm:$0xff] }
 0x14e   : > { %4462 = vmatmul.mubr.bf16.gmra.mrb[72].mxu0 %v577_v6  ;;  %v595_v6 = vpack.c.bf16 %v523_v0, %v522_v63 }
 0x14f   : > { %4465 = vmatprep.mubr.bf16.mxu0 %v578_v7 }
 0x156   : > { %4466 = vmatmul.mubr.bf16.gmra.mrb[76].mxu0 %v579_v12 }
 0x157   : > { %4469 = vmatprep.mubr.bf16.mxu0 %v580_v13 }
 0x15e   : > { %4470 = vmatmul.mubr.bf16.gmra.mrb[80].mxu0 %v581_v19  ;;  %v5303_v19 = vmov 0  }
 0x15f   : > { %4473 = vmatprep.mubr.bf16.mxu0 %v582_v20 }
 0x166   : > { %4474 = vmatmul.mubr.bf16.gmra.mrb[84].mxu0 %v583_v25 }
 0x167   : > { %4477 = vmatprep.mubr.bf16.mxu0 %v584_v26  ;;  %v598_v26 = vpack.c.bf16 %v529_v17, %v528_v16  ;;  %v5065_v17 = vld [vmem:[#allocation8 + $0x30] sm:$0xff]  }
 0x168   : > { %4673 = vmatprep.subr.bf16.mxu0 %v5065_v17 }
 0x169   : > { %4674 = vmatpush3.bf16.msra.mxu0 %v5065_v17 }
 0x16e   : > { %4478 = vmatmul.mubr.bf16.gmra.mrb[88].mxu0 %v585_v31 }
 0x16f   : > { %4481 = vmatprep.mubr.bf16.mxu0 %v586_v32  ;;  %v530_v32 = vld [vmem:[%s5586_s29 + $0x3b0] sm:$0xff] }
 0x170   : > { %v599_v40 = vpack.c.bf16 %v531_v33, %v530_v32 }
 0x176   : > { %4482 = vmatmul.mubr.bf16.gmra.mrb[92].mxu0 %v587_v37 }
 0x177   : > { %4485 = vmatprep.mubr.bf16.mxu0 %v588_v38 }
 0x17e   : > { %4486 = vmatmul.mubr.bf16.gmra.mrb[96].mxu0 %v589_v44 }
 0x17f   : > { %4489 = vmatprep.mubr.bf16.mxu0 %v590_v45 }
 0x186   : > { %4490 = vmatmul.mubr.bf16.gmra.mrb[100].mxu0 %v591_v50  ;;  %v536_v50 = vld [vmem:[%s5586_s29 + $0x3e0] sm:$0xff] }
 0x187   : > { %4493 = vmatprep.mubr.bf16.mxu0 %v592_v51  ;;  %v537_v51 = vld [vmem:[%s5586_s29 + $0x3e8] sm:$0xff] }
 0x188   : > { %v602_v58 = vpack.c.bf16 %v537_v51, %v536_v50 }
 0x18e   : > { %4494 = vmatmul.mubr.bf16.gmra.mrb[104].mxu0 %v593_v57 }
 0x18f   : > { %4497 = vmatprep.mubr.bf16.mxu0 %v594_v60 }
 0x191   : > { %v4391_v3 = vpop.f32.mrb[0].mxu0 }
 0x192   : > { %v702_v4 = vpop.f32.mrb[1].mxu0 }
 0x193   : > { %v4392_v7 = vpop.f32.mrb[2].mxu0 }
 0x194   : > { %v1214_v9 = vpack.c.bf16 %v4392_v7, %v4391_v3  ;;  %v705_v10 = vpop.f32.mrb[3].mxu0 }
 0x195   : > { %v1213_v11 = vpack.c.bf16 %v705_v10, %v702_v4 }
 0x196   : > { %v1286_v12 = vadd.bf16 %v5720_v5, %v1214_v9  ;;  %4498 = vmatmul.mubr.bf16.gmra.mrb[108].mxu0 %v595_v6 }
 0x197   : > { %v1285_v13 = vadd.bf16 %v5720_v5, %v1213_v11  ;;  %4501 = vmatprep.mubr.bf16.mxu0 %v596_v8  ;;  %v603_v8 = vpack.c.bf16 %v539_v2, %v538_v1 }
 0x198   : > { %v1350_v23 = vmax.bf16 %v5303_v19, %v1286_v12 }
 0x199   : > { %v4395_v18 = vpop.f32.mrb[4].mxu0  ;;  %v1349_v20 = vmax.bf16 %v5303_v19, %v1285_v13 }
 0x19a   : > { %v718_v22 = vpop.f32.mrb[5].mxu0 }
 0x19b   : > { %v4396_v25 = vpop.f32.mrb[6].mxu0  ;;  %4533 = vmatprep.mubr.bf16.mxu1 %v1349_v20 }
 0x19c   : > { %v1216_v27 = vpack.c.bf16 %v4396_v25, %v4395_v18  ;;  %v721_v28 = vpop.f32.mrb[7].mxu0  ;;  %4534 = vmatmul.mubr.bf16.vlgmr.msra.gmra.mrb[0].mxu1 %v1350_v23 }
 0x19d   : > { %v1215_v29 = vpack.c.bf16 %v721_v28, %v718_v22 }
 0x19e   : > { %v1288_v30 = vadd.bf16 %v5720_v5, %v1216_v27  ;;  %4502 = vmatmul.mubr.bf16.gmra.mrb[112].mxu0 %v597_v24 }
 0x19f   : > { %v1287_v31 = vadd.bf16 %v5720_v5, %v1215_v29  ;;  %4505 = vmatprep.mubr.bf16.mxu0 %v598_v26 }
 0x1a0   : > { %v1352_v39 = vmax.bf16 %v5303_v19, %v1288_v30 }
 0x1a1   : > { %v4399_v36 = vpop.f32.mrb[8].mxu0  ;;  %v1351_v37 = vmax.bf16 %v5303_v19, %v1287_v31 }
 0x1a2   : > { %v734_v38 = vpop.f32.mrb[9].mxu0 }
 0x1a3   : > { %v4400_v41 = vpop.f32.mrb[10].mxu0  ;;  %4537 = vmatprep.mubr.bf16.mxu1 %v1351_v37 }
 0x1a4   : > { %v1218_v43 = vpack.c.bf16 %v4400_v41, %v4399_v36  ;;  %v737_v44 = vpop.f32.mrb[11].mxu0  ;;  %4538 = vmatmul.mubr.bf16.gmra.mrb[4].mxu1 %v1352_v39 }
 0x1a5   : > { %v1217_v45 = vpack.c.bf16 %v737_v44, %v734_v38 }
 0x1a6   : > { %v1290_v46 = vadd.bf16 %v5720_v5, %v1218_v43  ;;  %4506 = vmatmul.mubr.bf16.gmra.mrb[116].mxu0 %v599_v40 }
 0x1a7   : > { %v1289_v47 = vadd.bf16 %v5720_v5, %v1217_v45  ;;  %4509 = vmatprep.mubr.bf16.mxu0 %v600_v42 }
 0x1a8   : > { %v1354_v55 = vmax.bf16 %v5303_v19, %v1290_v46 }
 0x1a9   : > { %v4403_v52 = vpop.f32.mrb[12].mxu0  ;;  %v1353_v53 = vmax.bf16 %v5303_v19, %v1289_v47 }
 0x1aa   : > { %v750_v54 = vpop.f32.mrb[13].mxu0 }
 0x1ab   : > { %v4404_v57 = vpop.f32.mrb[14].mxu0  ;;  %4541 = vmatprep.mubr.bf16.mxu1 %v1353_v53 }
 0x1ac   : > { %v1220_v59 = vpack.c.bf16 %v4404_v57, %v4403_v52  ;;  %v753_v60 = vpop.f32.mrb[15].mxu0  ;;  %4542 = vmatmul.mubr.bf16.gmra.mrb[8].mxu1 %v1354_v55  ;;  %v5066_v57 = vld [vmem:[#allocation10] sm:$0xff]  }
 0x1ad   : > { %v1219_v61 = vpack.c.bf16 %v753_v60, %v750_v54  ;;  %4805 = vmatprep.subr.bf16.mxu1 %v5066_v57  ;;  %v5067_v60 = vld [vmem:[#allocation8 + $0x38] sm:$0xff]  }
 0x1ae   : > { %v1292_v63 = vadd.bf16 %v5720_v5, %v1220_v59  ;;  %4510 = vmatmul.mubr.bf16.gmra.mrb[120].mxu0 %v601_v56  ;;  %4806 = vmatpush3.bf16.msra.mxu1 %v5066_v57 }
 0x1af   : > { %v1291_v0 = vadd.bf16 %v5720_v5, %v1219_v61  ;;  %4513 = vmatprep.mubr.bf16.mxu0 %v602_v58  ;;  %4675 = vmatprep.subr.bf16.mxu0 %v5067_v60 }
 0x1b0   : > { %v1356_v7 = vmax.bf16 %v5303_v19, %v1292_v63  ;;  %4676 = vmatpush3.bf16.msra.mxu0 %v5067_v60 }
 0x1b1   : > { %v4407_v3 = vpop.f32.mrb[16].mxu0  ;;  %v1355_v4 = vmax.bf16 %v5303_v19, %v1291_v0 }
 0x1b2   : > { %v766_v6 = vpop.f32.mrb[17].mxu0 }
 0x1b3   : > { %v4408_v9 = vpop.f32.mrb[18].mxu0  ;;  %4545 = vmatprep.mubr.bf16.mxu1 %v1355_v4 }
 0x1b4   : > { %v1222_v10 = vpack.c.bf16 %v4408_v9, %v4407_v3  ;;  %v769_v11 = vpop.f32.mrb[19].mxu0  ;;  %4546 = vmatmul.mubr.bf16.gmra.mrb[12].mxu1 %v1356_v7 }
 0x1b5   : > { %v1221_v12 = vpack.c.bf16 %v769_v11, %v766_v6 }
 0x1b6   : > { %v1294_v13 = vadd.bf16 %v5720_v5, %v1222_v10  ;;  %4514 = vmatmul.mubr.bf16.gmra.mrb[124].mxu0 %v603_v8 }
 0x1b7   : > { %v1293_v14 = vadd.bf16 %v5720_v5, %v1221_v12 }
 0x1b8   : > { %v1358_v20 = vmax.bf16 %v5303_v19, %v1294_v13 }
 0x1b9   : > { %v4411_v15 = vpop.f32.mrb[20].mxu0  ;;  %v1357_v16 = vmax.bf16 %v5303_v19, %v1293_v14 }
 0x1ba   : > { %v782_v18 = vpop.f32.mrb[21].mxu0 }
 0x1bb   : > { %v4412_v21 = vpop.f32.mrb[22].mxu0  ;;  %4549 = vmatprep.mubr.bf16.mxu1 %v1357_v16 }
 0x1bc   : > { %v1224_v22 = vpack.c.bf16 %v4412_v21, %v4411_v15  ;;  %v785_v23 = vpop.f32.mrb[23].mxu0  ;;  %4550 = vmatmul.mubr.bf16.gmra.mrb[16].mxu1 %v1358_v20 }
 0x1bd   : > { %v1223_v24 = vpack.c.bf16 %v785_v23, %v782_v18 }
 0x1be   : > { %v1296_v25 = vadd.bf16 %v5720_v5, %v1224_v22 }
 0x1bf   : > { %v1295_v26 = vadd.bf16 %v5720_v5, %v1223_v24 }
 0x1c0   : > { %v1360_v30 = vmax.bf16 %v5303_v19, %v1296_v25 }
 0x1c1   : > { %v4415_v27 = vpop.f32.mrb[24].mxu0  ;;  %v1359_v28 = vmax.bf16 %v5303_v19, %v1295_v26 }
 0x1c2   : > { %v798_v29 = vpop.f32.mrb[25].mxu0 }
 0x1c3   : > { %v4416_v31 = vpop.f32.mrb[26].mxu0  ;;  %4553 = vmatprep.mubr.bf16.mxu1 %v1359_v28 }
 0x1c4   : > { %v1226_v32 = vpack.c.bf16 %v4416_v31, %v4415_v27  ;;  %v801_v33 = vpop.f32.mrb[27].mxu0  ;;  %4554 = vmatmul.mubr.bf16.gmra.mrb[20].mxu1 %v1360_v30 }
 0x1c5   : > { %v1225_v34 = vpack.c.bf16 %v801_v33, %v798_v29 }
 0x1c6   : > { %v1298_v35 = vadd.bf16 %v5720_v5, %v1226_v32 }
 0x1c7   : > { %v1297_v36 = vadd.bf16 %v5720_v5, %v1225_v34 }
 0x1c8   : > { %v1362_v40 = vmax.bf16 %v5303_v19, %v1298_v35 }
 0x1c9   : > { %v4419_v37 = vpop.f32.mrb[28].mxu0  ;;  %v1361_v38 = vmax.bf16 %v5303_v19, %v1297_v36 }
 0x1ca   : > { %v814_v39 = vpop.f32.mrb[29].mxu0 }
 0x1cb   : > { %v4420_v41 = vpop.f32.mrb[30].mxu0  ;;  %4557 = vmatprep.mubr.bf16.mxu1 %v1361_v38  ;;  %v5068_v38 = vld [vmem:[#allocation10 + $0x8] sm:$0xff]  }
 0x1cc   : > { %v1228_v42 = vpack.c.bf16 %v4420_v41, %v4419_v37  ;;  %v817_v43 = vpop.f32.mrb[31].mxu0  ;;  %4558 = vmatmul.mubr.bf16.gmra.mrb[24].mxu1 %v1362_v40  ;;  %4807 = vmatprep.subr.bf16.mxu1 %v5068_v38 }
 0x1cd   : > { %v1227_v44 = vpack.c.bf16 %v817_v43, %v814_v39  ;;  %4808 = vmatpush3.bf16.msra.mxu1 %v5068_v38 }
 0x1ce   : > { %v1300_v45 = vadd.bf16 %v5720_v5, %v1228_v42 }
 0x1cf   : > { %v1299_v46 = vadd.bf16 %v5720_v5, %v1227_v44 }
 0x1d0   : > { %v1364_v50 = vmax.bf16 %v5303_v19, %v1300_v45 }
 0x1d1   : > { %v4423_v47 = vpop.f32.mrb[32].mxu0  ;;  %v1363_v48 = vmax.bf16 %v5303_v19, %v1299_v46 }
 0x1d2   : > { %v830_v49 = vpop.f32.mrb[33].mxu0 }
 0x1d3   : > { %v4424_v51 = vpop.f32.mrb[34].mxu0  ;;  %4561 = vmatprep.mubr.bf16.mxu1 %v1363_v48 }
 0x1d4   : > { %v1230_v52 = vpack.c.bf16 %v4424_v51, %v4423_v47  ;;  %v833_v53 = vpop.f32.mrb[35].mxu0  ;;  %4562 = vmatmul.mubr.bf16.gmra.mrb[28].mxu1 %v1364_v50 }
 0x1d5   : > { %v1229_v54 = vpack.c.bf16 %v833_v53, %v830_v49 }
 0x1d6   : > { %v1302_v55 = vadd.bf16 %v5720_v5, %v1230_v52 }
 0x1d7   : > { %v1301_v56 = vadd.bf16 %v5720_v5, %v1229_v54 }
 0x1d8   : > { %v1366_v63 = vmax.bf16 %v5303_v19, %v1302_v55 }
 0x1d9   : > { %v4427_v58 = vpop.f32.mrb[36].mxu0  ;;  %v1365_v59 = vmax.bf16 %v5303_v19, %v1301_v56 }
 0x1da   : > { %v846_v61 = vpop.f32.mrb[37].mxu0 }
 0x1db   : > { %v4428_v0 = vpop.f32.mrb[38].mxu0  ;;  %4565 = vmatprep.mubr.bf16.mxu1 %v1365_v59 }
 0x1dc   : > { %v1232_v1 = vpack.c.bf16 %v4428_v0, %v4427_v58  ;;  %v849_v2 = vpop.f32.mrb[39].mxu0  ;;  %4566 = vmatmul.mubr.bf16.gmra.mrb[32].mxu1 %v1366_v63 }
 0x1dd   : > { %v1231_v3 = vpack.c.bf16 %v849_v2, %v846_v61 }
 0x1de   : > { %v1304_v4 = vadd.bf16 %v5720_v5, %v1232_v1 }
 0x1df   : > { %v1303_v6 = vadd.bf16 %v5720_v5, %v1231_v3 }
 0x1e0   : > { %v1368_v10 = vmax.bf16 %v5303_v19, %v1304_v4 }
 0x1e1   : > { %v4431_v7 = vpop.f32.mrb[40].mxu0  ;;  %v1367_v8 = vmax.bf16 %v5303_v19, %v1303_v6 }
 0x1e2   : > { %v862_v9 = vpop.f32.mrb[41].mxu0 }
 0x1e3   : > { %v4432_v11 = vpop.f32.mrb[42].mxu0  ;;  %4569 = vmatprep.mubr.bf16.mxu1 %v1367_v8 }
 0x1e4   : > { %v1234_v12 = vpack.c.bf16 %v4432_v11, %v4431_v7  ;;  %v865_v13 = vpop.f32.mrb[43].mxu0  ;;  %4570 = vmatmul.mubr.bf16.gmra.mrb[36].mxu1 %v1368_v10 }
 0x1e5   : > { %v1233_v14 = vpack.c.bf16 %v865_v13, %v862_v9 }
 0x1e6   : > { %v1306_v15 = vadd.bf16 %v5720_v5, %v1234_v12 }
 0x1e7   : > { %v1305_v16 = vadd.bf16 %v5720_v5, %v1233_v14 }
 0x1e8   : > { %v1370_v21 = vmax.bf16 %v5303_v19, %v1306_v15 }
 0x1e9   : > { %v4435_v17 = vpop.f32.mrb[44].mxu0  ;;  %v1369_v18 = vmax.bf16 %v5303_v19, %v1305_v16 }
 0x1ea   : > { %v878_v20 = vpop.f32.mrb[45].mxu0 }
 0x1eb   : > { %v4436_v22 = vpop.f32.mrb[46].mxu0  ;;  %4573 = vmatprep.mubr.bf16.mxu1 %v1369_v18 }
 0x1ec   : > { %v1236_v23 = vpack.c.bf16 %v4436_v22, %v4435_v17  ;;  %v881_v24 = vpop.f32.mrb[47].mxu0  ;;  %4574 = vmatmul.mubr.bf16.gmra.mrb[40].mxu1 %v1370_v21  ;;  %v5069_v17 = vld [vmem:[#allocation10 + $0x10] sm:$0xff]  }
 0x1ed   : > { %v1235_v25 = vpack.c.bf16 %v881_v24, %v878_v20  ;;  %4809 = vmatprep.subr.bf16.mxu1 %v5069_v17 }
 0x1ee   : > { %v1308_v26 = vadd.bf16 %v5720_v5, %v1236_v23  ;;  %4810 = vmatpush3.bf16.msra.mxu1 %v5069_v17 }
 0x1ef   : > { %v1307_v27 = vadd.bf16 %v5720_v5, %v1235_v25 }
 0x1f0   : > { %v1372_v31 = vmax.bf16 %v5303_v19, %v1308_v26 }
 0x1f1   : > { %v4439_v28 = vpop.f32.mrb[48].mxu0  ;;  %v1371_v29 = vmax.bf16 %v5303_v19, %v1307_v27 }
 0x1f2   : > { %v894_v30 = vpop.f32.mrb[49].mxu0 }
 0x1f3   : > { %v4440_v32 = vpop.f32.mrb[50].mxu0  ;;  %4577 = vmatprep.mubr.bf16.mxu1 %v1371_v29 }
 0x1f4   : > { %v1238_v33 = vpack.c.bf16 %v4440_v32, %v4439_v28  ;;  %v897_v34 = vpop.f32.mrb[51].mxu0  ;;  %4578 = vmatmul.mubr.bf16.gmra.mrb[44].mxu1 %v1372_v31 }
 0x1f5   : > { %v1237_v35 = vpack.c.bf16 %v897_v34, %v894_v30 }
 0x1f6   : > { %v1310_v36 = vadd.bf16 %v5720_v5, %v1238_v33 }
 0x1f7   : > { %v1309_v37 = vadd.bf16 %v5720_v5, %v1237_v35 }
 0x1f8   : > { %v1374_v42 = vmax.bf16 %v5303_v19, %v1310_v36 }
 0x1f9   : > { %v4443_v39 = vpop.f32.mrb[52].mxu0  ;;  %v1373_v40 = vmax.bf16 %v5303_v19, %v1309_v37 }
 0x1fa   : > { %v910_v41 = vpop.f32.mrb[53].mxu0 }
 0x1fb   : > { %v4444_v43 = vpop.f32.mrb[54].mxu0  ;;  %4581 = vmatprep.mubr.bf16.mxu1 %v1373_v40 }
 0x1fc   : > { %v1240_v44 = vpack.c.bf16 %v4444_v43, %v4443_v39  ;;  %v913_v45 = vpop.f32.mrb[55].mxu0  ;;  %4582 = vmatmul.mubr.bf16.gmra.mrb[48].mxu1 %v1374_v42 }
 0x1fd   : > { %v1239_v46 = vpack.c.bf16 %v913_v45, %v910_v41 }
 0x1fe   : > { %v1312_v47 = vadd.bf16 %v5720_v5, %v1240_v44 }
 0x1ff   : > { %v1311_v48 = vadd.bf16 %v5720_v5, %v1239_v46 }
 0x200   : > { %v1376_v52 = vmax.bf16 %v5303_v19, %v1312_v47 }
 0x201   : > { %v4447_v49 = vpop.f32.mrb[56].mxu0  ;;  %v1375_v50 = vmax.bf16 %v5303_v19, %v1311_v48 }
 0x202   : > { %v926_v51 = vpop.f32.mrb[57].mxu0 }
 0x203   : > { %v4448_v53 = vpop.f32.mrb[58].mxu0  ;;  %4585 = vmatprep.mubr.bf16.mxu1 %v1375_v50 }
 0x204   : > { %v1242_v54 = vpack.c.bf16 %v4448_v53, %v4447_v49  ;;  %v929_v55 = vpop.f32.mrb[59].mxu0  ;;  %4586 = vmatmul.mubr.bf16.gmra.mrb[52].mxu1 %v1376_v52 }
 0x205   : > { %v1241_v56 = vpack.c.bf16 %v929_v55, %v926_v51 }
 0x206   : > { %v1314_v57 = vadd.bf16 %v5720_v5, %v1242_v54 }
 0x207   : > { %v1313_v58 = vadd.bf16 %v5720_v5, %v1241_v56 }
 0x208   : > { %v1378_v63 = vmax.bf16 %v5303_v19, %v1314_v57 }
 0x209   : > { %v4451_v59 = vpop.f32.mrb[60].mxu0  ;;  %v1377_v60 = vmax.bf16 %v5303_v19, %v1313_v58 }
 0x20a   : > { %v942_v61 = vpop.f32.mrb[61].mxu0 }
 0x20b   : > { %v4452_v0 = vpop.f32.mrb[62].mxu0  ;;  %4589 = vmatprep.mubr.bf16.mxu1 %v1377_v60 }
 0x20c   : > { %v1244_v1 = vpack.c.bf16 %v4452_v0, %v4451_v59  ;;  %v945_v2 = vpop.f32.mrb[63].mxu0  ;;  %4590 = vmatmul.mubr.bf16.gmra.mrb[56].mxu1 %v1378_v63  ;;  %v5070_v59 = vld [vmem:[#allocation10 + $0x18] sm:$0xff]  }
 0x20d   : > { %v1243_v3 = vpack.c.bf16 %v945_v2, %v942_v61  ;;  %4811 = vmatprep.subr.bf16.mxu1 %v5070_v59 }
 0x20e   : > { %v1316_v4 = vadd.bf16 %v5720_v5, %v1244_v1  ;;  %4812 = vmatpush3.bf16.msra.mxu1 %v5070_v59 }
 0x20f   : > { %v1315_v6 = vadd.bf16 %v5720_v5, %v1243_v3 }
 0x210   : > { %v1380_v10 = vmax.bf16 %v5303_v19, %v1316_v4 }
 0x211   : > { %v4455_v7 = vpop.f32.mrb[64].mxu0  ;;  %v1379_v8 = vmax.bf16 %v5303_v19, %v1315_v6 }
 0x212   : > { %v958_v9 = vpop.f32.mrb[65].mxu0 }
 0x213   : > { %v4456_v11 = vpop.f32.mrb[66].mxu0  ;;  %4593 = vmatprep.mubr.bf16.mxu1 %v1379_v8 }
 0x214   : > { %v1246_v12 = vpack.c.bf16 %v4456_v11, %v4455_v7  ;;  %v961_v13 = vpop.f32.mrb[67].mxu0  ;;  %4594 = vmatmul.mubr.bf16.gmra.mrb[60].mxu1 %v1380_v10 }
 0x215   : > { %v1245_v14 = vpack.c.bf16 %v961_v13, %v958_v9 }
 0x216   : > { %v1318_v15 = vadd.bf16 %v5720_v5, %v1246_v12 }
 0x217   : > { %v1317_v16 = vadd.bf16 %v5720_v5, %v1245_v14 }
 0x218   : > { %v1382_v22 = vmax.bf16 %v5303_v19, %v1318_v15 }
 0x219   : > { %v4459_v18 = vpop.f32.mrb[68].mxu0  ;;  %v1381_v20 = vmax.bf16 %v5303_v19, %v1317_v16 }
 0x21a   : > { %v974_v21 = vpop.f32.mrb[69].mxu0 }
 0x21b   : > { %v4460_v23 = vpop.f32.mrb[70].mxu0  ;;  %4597 = vmatprep.mubr.bf16.mxu1 %v1381_v20 }
 0x21c   : > { %v1248_v24 = vpack.c.bf16 %v4460_v23, %v4459_v18  ;;  %v977_v25 = vpop.f32.mrb[71].mxu0  ;;  %4598 = vmatmul.mubr.bf16.gmra.mrb[64].mxu1 %v1382_v22 }
 0x21d   : > { %v1247_v26 = vpack.c.bf16 %v977_v25, %v974_v21 }
 0x21e   : > { %v1320_v27 = vadd.bf16 %v5720_v5, %v1248_v24 }
 0x21f   : > { %v1319_v28 = vadd.bf16 %v5720_v5, %v1247_v26 }
 0x220   : > { %v1384_v32 = vmax.bf16 %v5303_v19, %v1320_v27 }
 0x221   : > { %v4463_v29 = vpop.f32.mrb[72].mxu0  ;;  %v1383_v30 = vmax.bf16 %v5303_v19, %v1319_v28 }
 0x222   : > { %v990_v31 = vpop.f32.mrb[73].mxu0 }
 0x223   : > { %v4464_v33 = vpop.f32.mrb[74].mxu0  ;;  %4601 = vmatprep.mubr.bf16.mxu1 %v1383_v30 }
 0x224   : > { %v1250_v34 = vpack.c.bf16 %v4464_v33, %v4463_v29  ;;  %v993_v35 = vpop.f32.mrb[75].mxu0  ;;  %4602 = vmatmul.mubr.bf16.gmra.mrb[68].mxu1 %v1384_v32 }
 0x225   : > { %v1249_v36 = vpack.c.bf16 %v993_v35, %v990_v31 }
 0x226   : > { %v1322_v37 = vadd.bf16 %v5720_v5, %v1250_v34 }
 0x227   : > { %v1321_v38 = vadd.bf16 %v5720_v5, %v1249_v36 }
 0x228   : > { %v1386_v42 = vmax.bf16 %v5303_v19, %v1322_v37 }
 0x229   : > { %v4467_v39 = vpop.f32.mrb[76].mxu0  ;;  %v1385_v40 = vmax.bf16 %v5303_v19, %v1321_v38 }
 0x22a   : > { %v1006_v41 = vpop.f32.mrb[77].mxu0 }
 0x22b   : > { %v4468_v43 = vpop.f32.mrb[78].mxu0  ;;  %4605 = vmatprep.mubr.bf16.mxu1 %v1385_v40 }
 0x22c   : > { %v1252_v44 = vpack.c.bf16 %v4468_v43, %v4467_v39  ;;  %v1009_v45 = vpop.f32.mrb[79].mxu0  ;;  %4606 = vmatmul.mubr.bf16.gmra.mrb[72].mxu1 %v1386_v42  ;;  %v5071_v39 = vld [vmem:[#allocation10 + $0x20] sm:$0xff]  }
 0x22d   : > { %v1251_v46 = vpack.c.bf16 %v1009_v45, %v1006_v41  ;;  %4813 = vmatprep.subr.bf16.mxu1 %v5071_v39 }
 0x22e   : > { %v1324_v47 = vadd.bf16 %v5720_v5, %v1252_v44  ;;  %4814 = vmatpush3.bf16.msra.mxu1 %v5071_v39 }
 0x22f   : > { %v1323_v48 = vadd.bf16 %v5720_v5, %v1251_v46 }
 0x230   : > { %v1388_v52 = vmax.bf16 %v5303_v19, %v1324_v47 }
 0x231   : > { %v4471_v49 = vpop.f32.mrb[80].mxu0  ;;  %v1387_v50 = vmax.bf16 %v5303_v19, %v1323_v48 }
 0x232   : > { %v1022_v51 = vpop.f32.mrb[81].mxu0 }
 0x233   : > { %v4472_v53 = vpop.f32.mrb[82].mxu0  ;;  %4609 = vmatprep.mubr.bf16.mxu1 %v1387_v50 }
 0x234   : > { %v1254_v54 = vpack.c.bf16 %v4472_v53, %v4471_v49  ;;  %v1025_v55 = vpop.f32.mrb[83].mxu0  ;;  %4610 = vmatmul.mubr.bf16.gmra.mrb[76].mxu1 %v1388_v52 }
 0x235   : > { %v1253_v56 = vpack.c.bf16 %v1025_v55, %v1022_v51 }
 0x236   : > { %v1326_v57 = vadd.bf16 %v5720_v5, %v1254_v54 }
 0x237   : > { %v1325_v58 = vadd.bf16 %v5720_v5, %v1253_v56 }
 0x238   : > { %v1390_v0 = vmax.bf16 %v5303_v19, %v1326_v57 }
 0x239   : > { %v4475_v60 = vpop.f32.mrb[84].mxu0  ;;  %v1389_v61 = vmax.bf16 %v5303_v19, %v1325_v58 }
 0x23a   : > { %v1038_v63 = vpop.f32.mrb[85].mxu0 }
 0x23b   : > { %v4476_v1 = vpop.f32.mrb[86].mxu0  ;;  %4613 = vmatprep.mubr.bf16.mxu1 %v1389_v61 }
 0x23c   : > { %v1256_v2 = vpack.c.bf16 %v4476_v1, %v4475_v60  ;;  %v1041_v3 = vpop.f32.mrb[87].mxu0  ;;  %4614 = vmatmul.mubr.bf16.gmra.mrb[80].mxu1 %v1390_v0 }
 0x23d   : > { %v1255_v4 = vpack.c.bf16 %v1041_v3, %v1038_v63  ;;  %v2086_v63 = vld [vmem:[%s6442_s4] sm:$0x1] }
 0x23e   : > { %v1328_v6 = vadd.bf16 %v5720_v5, %v1256_v2 }
 0x23f   : > { %v1327_v7 = vadd.bf16 %v5720_v5, %v1255_v4 }
 0x240   : > { %v1392_v11 = vmax.bf16 %v5303_v19, %v1328_v6  ;;  %v2088_v6 = vpack.i.b16 %v2086_v63, %v2086_v63 }
 0x241   : > { %v4479_v8 = vpop.f32.mrb[88].mxu0  ;;  %v1391_v9 = vmax.bf16 %v5303_v19, %v1327_v7 }
 0x242   : > { %v1054_v10 = vpop.f32.mrb[89].mxu0 }
 0x243   : > { %v4480_v12 = vpop.f32.mrb[90].mxu0  ;;  %4617 = vmatprep.mubr.bf16.mxu1 %v1391_v9 }
 0x244   : > { %v1258_v13 = vpack.c.bf16 %v4480_v12, %v4479_v8  ;;  %v1057_v14 = vpop.f32.mrb[91].mxu0  ;;  %4618 = vmatmul.mubr.bf16.gmra.mrb[84].mxu1 %v1392_v11  ;;  %v5850_v12 = vrot.slane %v2088_v6, %v5713_v62 }
 0x245   : > { %v1257_v15 = vpack.c.bf16 %v1057_v14, %v1054_v10 }
 0x246   : > { %v1330_v16 = vadd.bf16 %v5720_v5, %v1258_v13 }
 0x247   : > { %v1329_v17 = vadd.bf16 %v5720_v5, %v1257_v15 }
 0x248   : > { %v1394_v22 = vmax.bf16 %v5303_v19, %v1330_v16 }
 0x249   : > { %v4483_v18 = vpop.f32.mrb[92].mxu0  ;;  %v1393_v20 = vmax.bf16 %v5303_v19, %v1329_v17 }
 0x24a   : > { %v1070_v21 = vpop.f32.mrb[93].mxu0 }
 0x24b   : > { %v4484_v23 = vpop.f32.mrb[94].mxu0  ;;  %4621 = vmatprep.mubr.bf16.mxu1 %v1393_v20 }
 0x24c   : > { %v1260_v24 = vpack.c.bf16 %v4484_v23, %v4483_v18  ;;  %v1073_v25 = vpop.f32.mrb[95].mxu0  ;;  %4622 = vmatmul.mubr.bf16.gmra.mrb[88].mxu1 %v1394_v22 }
 0x24d   : > { %v1259_v26 = vpack.c.bf16 %v1073_v25, %v1070_v21 }
 0x24e   : > { %v1332_v27 = vadd.bf16 %v5720_v5, %v1260_v24 }
 0x24f   : > { %v1331_v28 = vadd.bf16 %v5720_v5, %v1259_v26 }
 0x250   : > { %v1396_v32 = vmax.bf16 %v5303_v19, %v1332_v27 }
 0x251   : > { %v4487_v29 = vpop.f32.mrb[96].mxu0  ;;  %v1395_v30 = vmax.bf16 %v5303_v19, %v1331_v28 }
 0x252   : > { %v1086_v31 = vpop.f32.mrb[97].mxu0 }
 0x253   : > { %v4488_v33 = vpop.f32.mrb[98].mxu0  ;;  %4625 = vmatprep.mubr.bf16.mxu1 %v1395_v30 }
 0x254   : > { %v1262_v34 = vpack.c.bf16 %v4488_v33, %v4487_v29  ;;  %v1089_v35 = vpop.f32.mrb[99].mxu0  ;;  %4626 = vmatmul.mubr.bf16.gmra.mrb[92].mxu1 %v1396_v32  ;;  %v5072_v32 = vld [vmem:[#allocation10 + $0x28] sm:$0xff]  }
 0x255   : > { %v1261_v36 = vpack.c.bf16 %v1089_v35, %v1086_v31  ;;  %4815 = vmatprep.subr.bf16.mxu1 %v5072_v32 }
 0x256   : > { %v1334_v37 = vadd.bf16 %v5720_v5, %v1262_v34  ;;  %4816 = vmatpush3.bf16.msra.mxu1 %v5072_v32 }
 0x257   : > { %v1333_v38 = vadd.bf16 %v5720_v5, %v1261_v36 }
 0x258   : > { %v1398_v43 = vmax.bf16 %v5303_v19, %v1334_v37 }
 0x259   : > { %v4491_v40 = vpop.f32.mrb[100].mxu0  ;;  %v1397_v41 = vmax.bf16 %v5303_v19, %v1333_v38 }
 0x25a   : > { %v1102_v42 = vpop.f32.mrb[101].mxu0 }
 0x25b   : > { %v4492_v44 = vpop.f32.mrb[102].mxu0  ;;  %4629 = vmatprep.mubr.bf16.mxu1 %v1397_v41 }
 0x25c   : > { %v1264_v45 = vpack.c.bf16 %v4492_v44, %v4491_v40  ;;  %v1105_v46 = vpop.f32.mrb[103].mxu0  ;;  %4630 = vmatmul.mubr.bf16.gmra.mrb[96].mxu1 %v1398_v43 }
 0x25d   : > { %v1263_v47 = vpack.c.bf16 %v1105_v46, %v1102_v42 }
 0x25e   : > { %v1336_v48 = vadd.bf16 %v5720_v5, %v1264_v45 }
 0x25f   : > { %v1335_v49 = vadd.bf16 %v5720_v5, %v1263_v47 }
 0x260   : > { %v1400_v53 = vmax.bf16 %v5303_v19, %v1336_v48 }
 0x261   : > { %v4495_v50 = vpop.f32.mrb[104].mxu0  ;;  %v1399_v51 = vmax.bf16 %v5303_v19, %v1335_v49 }
 0x262   : > { %v1118_v52 = vpop.f32.mrb[105].mxu0 }
 0x263   : > { %v4496_v54 = vpop.f32.mrb[106].mxu0  ;;  %4633 = vmatprep.mubr.bf16.mxu1 %v1399_v51 }
 0x264   : > { %v1266_v55 = vpack.c.bf16 %v4496_v54, %v4495_v50  ;;  %v1121_v56 = vpop.f32.mrb[107].mxu0  ;;  %4634 = vmatmul.mubr.bf16.gmra.mrb[100].mxu1 %v1400_v53 }
 0x265   : > { %v1265_v57 = vpack.c.bf16 %v1121_v56, %v1118_v52 }
 0x266   : > { %v1338_v58 = vadd.bf16 %v5720_v5, %v1266_v55 }
 0x267   : > { %v1337_v59 = vadd.bf16 %v5720_v5, %v1265_v57 }
 0x268   : > { %v1402_v1 = vmax.bf16 %v5303_v19, %v1338_v58 }
 0x269   : > { %v4499_v60 = vpop.f32.mrb[108].mxu0  ;;  %v1401_v61 = vmax.bf16 %v5303_v19, %v1337_v59 }
 0x26a   : > { %v1134_v0 = vpop.f32.mrb[109].mxu0 }
 0x26b   : > { %v4500_v2 = vpop.f32.mrb[110].mxu0  ;;  %4637 = vmatprep.mubr.bf16.mxu1 %v1401_v61 }
 0x26c   : > { %v1268_v3 = vpack.c.bf16 %v4500_v2, %v4499_v60  ;;  %v1137_v4 = vpop.f32.mrb[111].mxu0  ;;  %4638 = vmatmul.mubr.bf16.gmra.mrb[104].mxu1 %v1402_v1 }
 0x26d   : > { %v1267_v7 = vpack.c.bf16 %v1137_v4, %v1134_v0 }
 0x26e   : > { %v1340_v8 = vadd.bf16 %v5720_v5, %v1268_v3 }
 0x26f   : > { %v1339_v9 = vadd.bf16 %v5720_v5, %v1267_v7  ;;  %v4535_v10 = vpop.f32.mrb[0].mxu1 }
 0x270   : > { %v1511_v11 = vpop.f32.mrb[1].mxu1  ;;  %v1404_v20 = vmax.bf16 %v5303_v19, %v1340_v8 }
 0x271   : > { %v4503_v13 = vpop.f32.mrb[112].mxu0  ;;  %v4536_v14 = vpop.f32.mrb[2].mxu1  ;;  %v1403_v15 = vmax.bf16 %v5303_v19, %v1339_v9 }
 0x272   : > { %v2023_v16 = vpack.c.bf16 %v4536_v14, %v4535_v10  ;;  %v1150_v17 = vpop.f32.mrb[113].mxu0  ;;  %v1514_v18 = vpop.f32.mrb[3].mxu1 }
 0x273   : > { %v2022_v21 = vpack.c.bf16 %v1514_v18, %v1511_v11  ;;  %v4504_v22 = vpop.f32.mrb[114].mxu0  ;;  %4641 = vmatprep.mubr.bf16.mxu1 %v1403_v15 }
 0x274   : > { %v2095_v23 = vadd.bf16 %v5850_v12, %v2023_v16  ;;  %v1270_v24 = vpack.c.bf16 %v4504_v22, %v4503_v13  ;;  %v1153_v25 = vpop.f32.mrb[115].mxu0  ;;  %4642 = vmatmul.mubr.bf16.gmra.mrb[108].mxu1 %v1404_v20 }
 0x275   : > { %v2094_v26 = vadd.bf16 %v5850_v12, %v2022_v21  ;;  %v1269_v27 = vpack.c.bf16 %v1153_v25, %v1150_v17 }
 0x276   : > { %v1342_v28 = vadd.bf16 %v5720_v5, %v1270_v24  ;;  %v2159_v33 = vmax.bf16 %v5303_v19, %v2095_v23 }
 0x277   : > { %v1341_v29 = vadd.bf16 %v5720_v5, %v1269_v27  ;;  %v4539_v30 = vpop.f32.mrb[4].mxu1  ;;  %v2158_v31 = vmax.bf16 %v5303_v19, %v2094_v26 }
 0x278   : > { %v1527_v34 = vpop.f32.mrb[5].mxu1  ;;  %v1406_v41 = vmax.bf16 %v5303_v19, %v1342_v28 }
 0x279   : > { %v4507_v35 = vpop.f32.mrb[116].mxu0  ;;  %v4540_v36 = vpop.f32.mrb[6].mxu1  ;;  %4677 = vmatprep.mubr.bf16.mxu0 %v2158_v31  ;;  %v1405_v37 = vmax.bf16 %v5303_v19, %v1341_v29 }
 0x27a   : > { %v2025_v38 = vpack.c.bf16 %v4540_v36, %v4539_v30  ;;  %v1166_v39 = vpop.f32.mrb[117].mxu0  ;;  %v1530_v40 = vpop.f32.mrb[7].mxu1  ;;  %4678 = vmatmul.mubr.bf16.vlgmr.msra.gmra.mrb[128].mxu0 %v2159_v33 }
 0x27b   : > { %v2024_v42 = vpack.c.bf16 %v1530_v40, %v1527_v34  ;;  %v4508_v43 = vpop.f32.mrb[118].mxu0  ;;  %4645 = vmatprep.mubr.bf16.mxu1 %v1405_v37 }
 0x27c   : > { %v2097_v44 = vadd.bf16 %v5850_v12, %v2025_v38  ;;  %v1272_v45 = vpack.c.bf16 %v4508_v43, %v4507_v35  ;;  %v1169_v46 = vpop.f32.mrb[119].mxu0  ;;  %4646 = vmatmul.mubr.bf16.gmra.mrb[112].mxu1 %v1406_v41 }
 0x27d   : > { %v2096_v47 = vadd.bf16 %v5850_v12, %v2024_v42  ;;  %v1271_v48 = vpack.c.bf16 %v1169_v46, %v1166_v39 }
 0x27e   : > { %v1344_v49 = vadd.bf16 %v5720_v5, %v1272_v45  ;;  %v2161_v54 = vmax.bf16 %v5303_v19, %v2097_v44  ;;  %v5073_v44 = vld [vmem:[#allocation10 + $0x30] sm:$0xff]  }
 0x27f   : > { %v1343_v50 = vadd.bf16 %v5720_v5, %v1271_v48  ;;  %v4543_v51 = vpop.f32.mrb[8].mxu1  ;;  %v2160_v52 = vmax.bf16 %v5303_v19, %v2096_v47  ;;  %4817 = vmatprep.subr.bf16.mxu1 %v5073_v44 }
 0x280   : > { %v1543_v53 = vpop.f32.mrb[9].mxu1  ;;  %v1408_v61 = vmax.bf16 %v5303_v19, %v1344_v49  ;;  %4818 = vmatpush3.bf16.msra.mxu1 %v5073_v44 }
 0x281   : > { %v4511_v55 = vpop.f32.mrb[120].mxu0  ;;  %v4544_v56 = vpop.f32.mrb[10].mxu1  ;;  %4681 = vmatprep.mubr.bf16.mxu0 %v2160_v52  ;;  %v1407_v57 = vmax.bf16 %v5303_v19, %v1343_v50 }
 0x282   : > { %v2027_v58 = vpack.c.bf16 %v4544_v56, %v4543_v51  ;;  %v1182_v59 = vpop.f32.mrb[121].mxu0  ;;  %v1546_v60 = vpop.f32.mrb[11].mxu1  ;;  %4682 = vmatmul.mubr.bf16.gmra.mrb[132].mxu0 %v2161_v54 }
 0x283   : > { %v2026_v63 = vpack.c.bf16 %v1546_v60, %v1543_v53  ;;  %v4512_v0 = vpop.f32.mrb[122].mxu0  ;;  %4649 = vmatprep.mubr.bf16.mxu1 %v1407_v57 }
 0x284   : > { %v2099_v1 = vadd.bf16 %v5850_v12, %v2027_v58  ;;  %v1274_v2 = vpack.c.bf16 %v4512_v0, %v4511_v55  ;;  %v1185_v3 = vpop.f32.mrb[123].mxu0  ;;  %4650 = vmatmul.mubr.bf16.gmra.mrb[116].mxu1 %v1408_v61 }
 0x285   : > { %v2098_v4 = vadd.bf16 %v5850_v12, %v2026_v63  ;;  %v1273_v6 = vpack.c.bf16 %v1185_v3, %v1182_v59 }
 0x286   : > { %v1346_v7 = vadd.bf16 %v5720_v5, %v1274_v2  ;;  %v2163_v13 = vmax.bf16 %v5303_v19, %v2099_v1 }
 0x287   : > { %v1345_v8 = vadd.bf16 %v5720_v5, %v1273_v6  ;;  %v4547_v9 = vpop.f32.mrb[12].mxu1  ;;  %v2162_v10 = vmax.bf16 %v5303_v19, %v2098_v4 }
 0x288   : > { %v1559_v11 = vpop.f32.mrb[13].mxu1  ;;  %v1410_v21 = vmax.bf16 %v5303_v19, %v1346_v7 }
 0x289   : > { %v4515_v14 = vpop.f32.mrb[124].mxu0  ;;  %v4548_v15 = vpop.f32.mrb[14].mxu1  ;;  %4685 = vmatprep.mubr.bf16.mxu0 %v2162_v10  ;;  %v1409_v16 = vmax.bf16 %v5303_v19, %v1345_v8 }
 0x28a   : > { %v2029_v17 = vpack.c.bf16 %v4548_v15, %v4547_v9  ;;  %v1198_v18 = vpop.f32.mrb[125].mxu0  ;;  %v1562_v20 = vpop.f32.mrb[15].mxu1  ;;  %4686 = vmatmul.mubr.bf16.gmra.mrb[136].mxu0 %v2163_v13 }
 0x28b   : > { %v2028_v22 = vpack.c.bf16 %v1562_v20, %v1559_v11  ;;  %v4516_v23 = vpop.f32.mrb[126].mxu0  ;;  %4653 = vmatprep.mubr.bf16.mxu1 %v1409_v16 }
 0x28c   : > { %v2101_v24 = vadd.bf16 %v5850_v12, %v2029_v17  ;;  %v1276_v25 = vpack.c.bf16 %v4516_v23, %v4515_v14  ;;  %v1201_v26 = vpop.f32.mrb[127].mxu0  ;;  %4654 = vmatmul.mubr.bf16.gmra.mrb[120].mxu1 %v1410_v21 }
 0x28d   : > { %v2100_v27 = vadd.bf16 %v5850_v12, %v2028_v22  ;;  %v1275_v28 = vpack.c.bf16 %v1201_v26, %v1198_v18 }
 0x28e   : > { %v1348_v29 = vadd.bf16 %v5720_v5, %v1276_v25  ;;  %v2165_v34 = vmax.bf16 %v5303_v19, %v2101_v24  ;;  %v5074_v25 = vld [vmem:[#allocation10 + $0x38] sm:$0xff]  }
 0x28f   : > { %v1347_v30 = vadd.bf16 %v5720_v5, %v1275_v28  ;;  %v4551_v31 = vpop.f32.mrb[16].mxu1  ;;  %v2164_v32 = vmax.bf16 %v5303_v19, %v2100_v27  ;;  %4819 = vmatprep.subr.bf16.mxu1 %v5074_v25 }
 0x290   : > { %v1575_v33 = vpop.f32.mrb[17].mxu1  ;;  %v1412_v39 = vmax.bf16 %v5303_v19, %v1348_v29  ;;  %4820 = vmatpush3.bf16.msra.mxu1 %v5074_v25 }
 0x291   : > { %v4552_v35 = vpop.f32.mrb[18].mxu1  ;;  %4689 = vmatprep.mubr.bf16.mxu0 %v2164_v32  ;;  %v1411_v36 = vmax.bf16 %v5303_v19, %v1347_v30 }
 0x292   : > { %v2031_v37 = vpack.c.bf16 %v4552_v35, %v4551_v31  ;;  %v1578_v38 = vpop.f32.mrb[19].mxu1  ;;  %4690 = vmatmul.mubr.bf16.gmra.mrb[140].mxu0 %v2165_v34 }
 0x293   : > { %v2030_v40 = vpack.c.bf16 %v1578_v38, %v1575_v33  ;;  %4657 = vmatprep.mubr.bf16.mxu1 %v1411_v36 }
 0x294   : > { %v2103_v41 = vadd.bf16 %v5850_v12, %v2031_v37  ;;  %4658 = vmatmul.mubr.bf16.gmra.mrb[124].mxu1 %v1412_v39 }
 0x295   : > { %v2102_v5 = vadd.bf16 %v5850_v12, %v2030_v40 }
 0x296   : > { %v2167_v46 = vmax.bf16 %v5303_v19, %v2103_v41 }
 0x297   : > { %v4555_v42 = vpop.f32.mrb[20].mxu1  ;;  %v2166_v43 = vmax.bf16 %v5303_v19, %v2102_v5 }
 0x298   : > { %v1591_v45 = vpop.f32.mrb[21].mxu1 }
 0x299   : > { %v4556_v47 = vpop.f32.mrb[22].mxu1  ;;  %4693 = vmatprep.mubr.bf16.mxu0 %v2166_v43 }
 0x29a   : > { %v2033_v48 = vpack.c.bf16 %v4556_v47, %v4555_v42  ;;  %v1594_v49 = vpop.f32.mrb[23].mxu1  ;;  %4694 = vmatmul.mubr.bf16.gmra.mrb[144].mxu0 %v2167_v46 }
 0x29b   : > { %v2032_v50 = vpack.c.bf16 %v1594_v49, %v1591_v45 }
 0x29c   : > { %v2105_v51 = vadd.bf16 %v5850_v12, %v2033_v48 }
 0x29d   : > { %v2104_v52 = vadd.bf16 %v5850_v12, %v2032_v50 }
 0x29e   : > { %v2169_v56 = vmax.bf16 %v5303_v19, %v2105_v51 }
 0x29f   : > { %v4559_v53 = vpop.f32.mrb[24].mxu1  ;;  %v2168_v54 = vmax.bf16 %v5303_v19, %v2104_v52 }
 0x2a0   : > { %v1607_v55 = vpop.f32.mrb[25].mxu1 }
 0x2a1   : > { %v4560_v57 = vpop.f32.mrb[26].mxu1  ;;  %4697 = vmatprep.mubr.bf16.mxu0 %v2168_v54 }
 0x2a2   : > { %v2035_v58 = vpack.c.bf16 %v4560_v57, %v4559_v53  ;;  %v1610_v59 = vpop.f32.mrb[27].mxu1  ;;  %4698 = vmatmul.mubr.bf16.gmra.mrb[148].mxu0 %v2169_v56 }
 0x2a3   : > { %v2034_v60 = vpack.c.bf16 %v1610_v59, %v1607_v55 }
 0x2a4   : > { %v2107_v61 = vadd.bf16 %v5850_v12, %v2035_v58 }
 0x2a5   : > { %v2106_v63 = vadd.bf16 %v5850_v12, %v2034_v60 }
 0x2a6   : > { %v2171_v3 = vmax.bf16 %v5303_v19, %v2107_v61 }
 0x2a7   : > { %v4563_v0 = vpop.f32.mrb[28].mxu1  ;;  %v2170_v1 = vmax.bf16 %v5303_v19, %v2106_v63 }
 0x2a8   : > { %v1623_v2 = vpop.f32.mrb[29].mxu1 }
 0x2a9   : > { %v4564_v4 = vpop.f32.mrb[30].mxu1  ;;  %4701 = vmatprep.mubr.bf16.mxu0 %v2170_v1 }
 0x2aa   : > { %v2037_v6 = vpack.c.bf16 %v4564_v4, %v4563_v0  ;;  %v1626_v7 = vpop.f32.mrb[31].mxu1  ;;  %4702 = vmatmul.mubr.bf16.gmra.mrb[152].mxu0 %v2171_v3 }
 0x2ab   : > { %v2036_v8 = vpack.c.bf16 %v1626_v7, %v1623_v2 }
 0x2ac   : > { %v2109_v9 = vadd.bf16 %v5850_v12, %v2037_v6 }
 0x2ad   : > { %v2108_v10 = vadd.bf16 %v5850_v12, %v2036_v8 }
 0x2ae   : > { %v2173_v15 = vmax.bf16 %v5303_v19, %v2109_v9 }
 0x2af   : > { %v4567_v11 = vpop.f32.mrb[32].mxu1  ;;  %v2172_v13 = vmax.bf16 %v5303_v19, %v2108_v10 }
 0x2b0   : > { %v1639_v14 = vpop.f32.mrb[33].mxu1 }
 0x2b1   : > { %v4568_v16 = vpop.f32.mrb[34].mxu1  ;;  %4705 = vmatprep.mubr.bf16.mxu0 %v2172_v13 }
 0x2b2   : > { %v2039_v17 = vpack.c.bf16 %v4568_v16, %v4567_v11  ;;  %v1642_v18 = vpop.f32.mrb[35].mxu1  ;;  %4706 = vmatmul.mubr.bf16.gmra.mrb[156].mxu0 %v2173_v15 }
 0x2b3   : > { %v2038_v20 = vpack.c.bf16 %v1642_v18, %v1639_v14 }
 0x2b4   : > { %v2111_v21 = vadd.bf16 %v5850_v12, %v2039_v17 }
 0x2b5   : > { %v2110_v22 = vadd.bf16 %v5850_v12, %v2038_v20 }
 0x2b6   : > { %v2175_v27 = vmax.bf16 %v5303_v19, %v2111_v21 }
 0x2b7   : > { %v4571_v23 = vpop.f32.mrb[36].mxu1  ;;  %v2174_v24 = vmax.bf16 %v5303_v19, %v2110_v22 }
 0x2b8   : > { %v1655_v26 = vpop.f32.mrb[37].mxu1 }
 0x2b9   : > { %v4572_v28 = vpop.f32.mrb[38].mxu1  ;;  %4709 = vmatprep.mubr.bf16.mxu0 %v2174_v24 }
 0x2ba   : > { %v2041_v29 = vpack.c.bf16 %v4572_v28, %v4571_v23  ;;  %v1658_v30 = vpop.f32.mrb[39].mxu1  ;;  %4710 = vmatmul.mubr.bf16.gmra.mrb[160].mxu0 %v2175_v27 }
 0x2bb   : > { %v2040_v31 = vpack.c.bf16 %v1658_v30, %v1655_v26 }
 0x2bc   : > { %v2113_v32 = vadd.bf16 %v5850_v12, %v2041_v29 }
 0x2bd   : > { %v2112_v33 = vadd.bf16 %v5850_v12, %v2040_v31 }
 0x2be   : > { %v2177_v37 = vmax.bf16 %v5303_v19, %v2113_v32 }
 0x2bf   : > { %v4575_v34 = vpop.f32.mrb[40].mxu1  ;;  %v2176_v35 = vmax.bf16 %v5303_v19, %v2112_v33 }
 0x2c0   : > { %v1671_v36 = vpop.f32.mrb[41].mxu1 }
 0x2c1   : > { %v4576_v38 = vpop.f32.mrb[42].mxu1  ;;  %4713 = vmatprep.mubr.bf16.mxu0 %v2176_v35 }
 0x2c2   : > { %v2043_v39 = vpack.c.bf16 %v4576_v38, %v4575_v34  ;;  %v1674_v40 = vpop.f32.mrb[43].mxu1  ;;  %4714 = vmatmul.mubr.bf16.gmra.mrb[164].mxu0 %v2177_v37 }
 0x2c3   : > { %v2042_v41 = vpack.c.bf16 %v1674_v40, %v1671_v36 }
 0x2c4   : > { %v2115_v5 = vadd.bf16 %v5850_v12, %v2043_v39 }
 0x2c5   : > { %v2114_v42 = vadd.bf16 %v5850_v12, %v2042_v41 }
 0x2c6   : > { %v2179_v46 = vmax.bf16 %v5303_v19, %v2115_v5 }
 0x2c7   : > { %v4579_v43 = vpop.f32.mrb[44].mxu1  ;;  %v2178_v44 = vmax.bf16 %v5303_v19, %v2114_v42 }
 0x2c8   : > { %v1687_v45 = vpop.f32.mrb[45].mxu1 }
 0x2c9   : > { %v4580_v47 = vpop.f32.mrb[46].mxu1  ;;  %4717 = vmatprep.mubr.bf16.mxu0 %v2178_v44 }
 0x2ca   : > { %v2045_v48 = vpack.c.bf16 %v4580_v47, %v4579_v43  ;;  %v1690_v49 = vpop.f32.mrb[47].mxu1  ;;  %4718 = vmatmul.mubr.bf16.gmra.mrb[168].mxu0 %v2179_v46 }
 0x2cb   : > { %v2044_v50 = vpack.c.bf16 %v1690_v49, %v1687_v45 }
 0x2cc   : > { %v2117_v51 = vadd.bf16 %v5850_v12, %v2045_v48 }
 0x2cd   : > { %v2116_v52 = vadd.bf16 %v5850_v12, %v2044_v50 }
 0x2ce   : > { %v2181_v56 = vmax.bf16 %v5303_v19, %v2117_v51 }
 0x2cf   : > { %v4583_v53 = vpop.f32.mrb[48].mxu1  ;;  %v2180_v54 = vmax.bf16 %v5303_v19, %v2116_v52 }
 0x2d0   : > { %v1703_v55 = vpop.f32.mrb[49].mxu1 }
 0x2d1   : > { %v4584_v57 = vpop.f32.mrb[50].mxu1  ;;  %4721 = vmatprep.mubr.bf16.mxu0 %v2180_v54 }
 0x2d2   : > { %v2047_v58 = vpack.c.bf16 %v4584_v57, %v4583_v53  ;;  %v1706_v59 = vpop.f32.mrb[51].mxu1  ;;  %4722 = vmatmul.mubr.bf16.gmra.mrb[172].mxu0 %v2181_v56 }
 0x2d3   : > { %v2046_v60 = vpack.c.bf16 %v1706_v59, %v1703_v55 }
 0x2d4   : > { %v2119_v61 = vadd.bf16 %v5850_v12, %v2047_v58 }
 0x2d5   : > { %v2118_v63 = vadd.bf16 %v5850_v12, %v2046_v60 }
 0x2d6   : > { %v2183_v3 = vmax.bf16 %v5303_v19, %v2119_v61 }
 0x2d7   : > { %v4587_v0 = vpop.f32.mrb[52].mxu1  ;;  %v2182_v1 = vmax.bf16 %v5303_v19, %v2118_v63 }
 0x2d8   : > { %v1719_v2 = vpop.f32.mrb[53].mxu1 }
 0x2d9   : > { %v4588_v4 = vpop.f32.mrb[54].mxu1  ;;  %4725 = vmatprep.mubr.bf16.mxu0 %v2182_v1 }
 0x2da   : > { %v2049_v6 = vpack.c.bf16 %v4588_v4, %v4587_v0  ;;  %v1722_v7 = vpop.f32.mrb[55].mxu1  ;;  %4726 = vmatmul.mubr.bf16.gmra.mrb[176].mxu0 %v2183_v3 }
 0x2db   : > { %v2048_v8 = vpack.c.bf16 %v1722_v7, %v1719_v2 }
 0x2dc   : > { %v2121_v9 = vadd.bf16 %v5850_v12, %v2049_v6 }
 0x2dd   : > { %v2120_v10 = vadd.bf16 %v5850_v12, %v2048_v8 }
 0x2de   : > { %v2185_v15 = vmax.bf16 %v5303_v19, %v2121_v9 }
 0x2df   : > { %v4591_v11 = vpop.f32.mrb[56].mxu1  ;;  %v2184_v13 = vmax.bf16 %v5303_v19, %v2120_v10 }
 0x2e0   : > { %v1735_v14 = vpop.f32.mrb[57].mxu1 }
 0x2e1   : > { %v4592_v16 = vpop.f32.mrb[58].mxu1  ;;  %4729 = vmatprep.mubr.bf16.mxu0 %v2184_v13 }
 0x2e2   : > { %v2051_v17 = vpack.c.bf16 %v4592_v16, %v4591_v11  ;;  %v1738_v18 = vpop.f32.mrb[59].mxu1  ;;  %4730 = vmatmul.mubr.bf16.gmra.mrb[180].mxu0 %v2185_v15 }
 0x2e3   : > { %v2050_v20 = vpack.c.bf16 %v1738_v18, %v1735_v14 }
 0x2e4   : > { %v2123_v21 = vadd.bf16 %v5850_v12, %v2051_v17 }
 0x2e5   : > { %v2122_v22 = vadd.bf16 %v5850_v12, %v2050_v20 }
 0x2e6   : > { %v2187_v26 = vmax.bf16 %v5303_v19, %v2123_v21 }
 0x2e7   : > { %v4595_v23 = vpop.f32.mrb[60].mxu1  ;;  %v2186_v24 = vmax.bf16 %v5303_v19, %v2122_v22 }
 0x2e8   : > { %v1751_v25 = vpop.f32.mrb[61].mxu1 }
 0x2e9   : > { %v4596_v27 = vpop.f32.mrb[62].mxu1  ;;  %4733 = vmatprep.mubr.bf16.mxu0 %v2186_v24 }
 0x2ea   : > { %v2053_v28 = vpack.c.bf16 %v4596_v27, %v4595_v23  ;;  %v1754_v29 = vpop.f32.mrb[63].mxu1  ;;  %4734 = vmatmul.mubr.bf16.gmra.mrb[184].mxu0 %v2187_v26 }
 0x2eb   : > { %v2052_v30 = vpack.c.bf16 %v1754_v29, %v1751_v25 }
 0x2ec   : > { %v2125_v31 = vadd.bf16 %v5850_v12, %v2053_v28 }
 0x2ed   : > { %v2124_v32 = vadd.bf16 %v5850_v12, %v2052_v30 }
 0x2ee   : > { %v2189_v36 = vmax.bf16 %v5303_v19, %v2125_v31 }
 0x2ef   : > { %v4599_v33 = vpop.f32.mrb[64].mxu1  ;;  %v2188_v34 = vmax.bf16 %v5303_v19, %v2124_v32 }
 0x2f0   : > { %v1767_v35 = vpop.f32.mrb[65].mxu1 }
 0x2f1   : > { %v4600_v37 = vpop.f32.mrb[66].mxu1  ;;  %4737 = vmatprep.mubr.bf16.mxu0 %v2188_v34 }
 0x2f2   : > { %v2055_v38 = vpack.c.bf16 %v4600_v37, %v4599_v33  ;;  %v1770_v39 = vpop.f32.mrb[67].mxu1  ;;  %4738 = vmatmul.mubr.bf16.gmra.mrb[188].mxu0 %v2189_v36 }
 0x2f3   : > { %v2054_v40 = vpack.c.bf16 %v1770_v39, %v1767_v35 }
 0x2f4   : > { %v2127_v41 = vadd.bf16 %v5850_v12, %v2055_v38 }
 0x2f5   : > { %v2126_v5 = vadd.bf16 %v5850_v12, %v2054_v40 }
 0x2f6   : > { %v2191_v45 = vmax.bf16 %v5303_v19, %v2127_v41 }
 0x2f7   : > { %v4603_v42 = vpop.f32.mrb[68].mxu1  ;;  %v2190_v43 = vmax.bf16 %v5303_v19, %v2126_v5 }
 0x2f8   : > { %v1783_v44 = vpop.f32.mrb[69].mxu1 }
 0x2f9   : > { %v4604_v46 = vpop.f32.mrb[70].mxu1  ;;  %4741 = vmatprep.mubr.bf16.mxu0 %v2190_v43 }
 0x2fa   : > { %v2057_v47 = vpack.c.bf16 %v4604_v46, %v4603_v42  ;;  %v1786_v48 = vpop.f32.mrb[71].mxu1  ;;  %4742 = vmatmul.mubr.bf16.gmra.mrb[192].mxu0 %v2191_v45 }
 0x2fb   : > { %v2056_v49 = vpack.c.bf16 %v1786_v48, %v1783_v44 }
 0x2fc   : > { %v2129_v50 = vadd.bf16 %v5850_v12, %v2057_v47 }
 0x2fd   : > { %v2128_v51 = vadd.bf16 %v5850_v12, %v2056_v49 }
 0x2fe   : > { %v2193_v55 = vmax.bf16 %v5303_v19, %v2129_v50 }
 0x2ff   : > { %v4607_v52 = vpop.f32.mrb[72].mxu1  ;;  %v2192_v53 = vmax.bf16 %v5303_v19, %v2128_v51 }
 0x300   : > { %v1799_v54 = vpop.f32.mrb[73].mxu1 }
 0x301   : > { %v4608_v56 = vpop.f32.mrb[74].mxu1  ;;  %4745 = vmatprep.mubr.bf16.mxu0 %v2192_v53 }
 0x302   : > { %v2059_v57 = vpack.c.bf16 %v4608_v56, %v4607_v52  ;;  %v1802_v58 = vpop.f32.mrb[75].mxu1  ;;  %4746 = vmatmul.mubr.bf16.gmra.mrb[196].mxu0 %v2193_v55 }
 0x303   : > { %v2058_v59 = vpack.c.bf16 %v1802_v58, %v1799_v54 }
 0x304   : > { %v2131_v60 = vadd.bf16 %v5850_v12, %v2059_v57 }
 0x305   : > { %v2130_v61 = vadd.bf16 %v5850_v12, %v2058_v59 }
 0x306   : > { %v2195_v2 = vmax.bf16 %v5303_v19, %v2131_v60 }
 0x307   : > { %v4611_v63 = vpop.f32.mrb[76].mxu1  ;;  %v2194_v0 = vmax.bf16 %v5303_v19, %v2130_v61 }
 0x308   : > { %v1815_v1 = vpop.f32.mrb[77].mxu1 }
 0x309   : > { %v4612_v3 = vpop.f32.mrb[78].mxu1  ;;  %4749 = vmatprep.mubr.bf16.mxu0 %v2194_v0 }
 0x30a   : > { %v2061_v4 = vpack.c.bf16 %v4612_v3, %v4611_v63  ;;  %v1818_v6 = vpop.f32.mrb[79].mxu1  ;;  %4750 = vmatmul.mubr.bf16.gmra.mrb[200].mxu0 %v2195_v2 }
 0x30b   : > { %v2060_v7 = vpack.c.bf16 %v1818_v6, %v1815_v1 }
 0x30c   : > { %v2133_v8 = vadd.bf16 %v5850_v12, %v2061_v4 }
 0x30d   : > { %v2132_v9 = vadd.bf16 %v5850_v12, %v2060_v7 }
 0x30e   : > { %v2197_v14 = vmax.bf16 %v5303_v19, %v2133_v8 }
 0x30f   : > { %v4615_v10 = vpop.f32.mrb[80].mxu1  ;;  %v2196_v11 = vmax.bf16 %v5303_v19, %v2132_v9 }
 0x310   : > { %v1831_v13 = vpop.f32.mrb[81].mxu1 }
 0x311   : > { %v4616_v15 = vpop.f32.mrb[82].mxu1  ;;  %4753 = vmatprep.mubr.bf16.mxu0 %v2196_v11 }
 0x312   : > { %v2063_v16 = vpack.c.bf16 %v4616_v15, %v4615_v10  ;;  %v1834_v17 = vpop.f32.mrb[83].mxu1  ;;  %4754 = vmatmul.mubr.bf16.gmra.mrb[204].mxu0 %v2197_v14 }
 0x313   : > { %v2062_v18 = vpack.c.bf16 %v1834_v17, %v1831_v13 }
 0x314   : > { %v2135_v20 = vadd.bf16 %v5850_v12, %v2063_v16 }
 0x315   : > { %v2134_v21 = vadd.bf16 %v5850_v12, %v2062_v18 }
 0x316   : > { %v2199_v25 = vmax.bf16 %v5303_v19, %v2135_v20 }
 0x317   : > { %v4619_v22 = vpop.f32.mrb[84].mxu1  ;;  %v2198_v23 = vmax.bf16 %v5303_v19, %v2134_v21 }
 0x318   : > { %v1847_v24 = vpop.f32.mrb[85].mxu1 }
 0x319   : > { %v4620_v26 = vpop.f32.mrb[86].mxu1  ;;  %4757 = vmatprep.mubr.bf16.mxu0 %v2198_v23  ;;  %v2895_v23 = vld [vmem:[%s6444_s6] sm:$0x1] }
 0x31a   : > { %v2065_v27 = vpack.c.bf16 %v4620_v26, %v4619_v22  ;;  %v1850_v28 = vpop.f32.mrb[87].mxu1  ;;  %4758 = vmatmul.mubr.bf16.gmra.mrb[208].mxu0 %v2199_v25 }
 0x31b   : > { %v2064_v29 = vpack.c.bf16 %v1850_v28, %v1847_v24 }
 0x31c   : > { %v2137_v30 = vadd.bf16 %v5850_v12, %v2065_v27 }
 0x31d   : > { %v2136_v31 = vadd.bf16 %v5850_v12, %v2064_v29  ;;  %v2897_v29 = vpack.i.b16 %v2895_v23, %v2895_v23 }
 0x31e   : > { %v2201_v35 = vmax.bf16 %v5303_v19, %v2137_v30 }
 0x31f   : > { %v4623_v32 = vpop.f32.mrb[88].mxu1  ;;  %v2200_v33 = vmax.bf16 %v5303_v19, %v2136_v31 }
 0x320   : > { %v1863_v34 = vpop.f32.mrb[89].mxu1 }
 0x321   : > { %v4624_v36 = vpop.f32.mrb[90].mxu1  ;;  %4761 = vmatprep.mubr.bf16.mxu0 %v2200_v33 }
 0x322   : > { %v2067_v37 = vpack.c.bf16 %v4624_v36, %v4623_v32  ;;  %v1866_v38 = vpop.f32.mrb[91].mxu1  ;;  %4762 = vmatmul.mubr.bf16.gmra.mrb[212].mxu0 %v2201_v35  ;;  %v5984_v35 = vrot.slane %v2897_v29, %v5713_v62 }
 0x323   : > { %v2066_v39 = vpack.c.bf16 %v1866_v38, %v1863_v34 }
 0x324   : > { %v2139_v40 = vadd.bf16 %v5850_v12, %v2067_v37 }
 0x325   : > { %v2138_v41 = vadd.bf16 %v5850_v12, %v2066_v39 }
 0x326   : > { %v2203_v44 = vmax.bf16 %v5303_v19, %v2139_v40 }
 0x327   : > { %v4627_v5 = vpop.f32.mrb[92].mxu1  ;;  %v2202_v42 = vmax.bf16 %v5303_v19, %v2138_v41 }
 0x328   : > { %v1879_v43 = vpop.f32.mrb[93].mxu1 }
 0x329   : > { %v4628_v45 = vpop.f32.mrb[94].mxu1  ;;  %4765 = vmatprep.mubr.bf16.mxu0 %v2202_v42 }
 0x32a   : > { %v2069_v46 = vpack.c.bf16 %v4628_v45, %v4627_v5  ;;  %v1882_v47 = vpop.f32.mrb[95].mxu1  ;;  %4766 = vmatmul.mubr.bf16.gmra.mrb[216].mxu0 %v2203_v44 }
 0x32b   : > { %v2068_v48 = vpack.c.bf16 %v1882_v47, %v1879_v43 }
 0x32c   : > { %v2141_v49 = vadd.bf16 %v5850_v12, %v2069_v46 }
 0x32d   : > { %v2140_v50 = vadd.bf16 %v5850_v12, %v2068_v48 }
 0x32e   : > { %v2205_v54 = vmax.bf16 %v5303_v19, %v2141_v49 }
 0x32f   : > { %v4631_v51 = vpop.f32.mrb[96].mxu1  ;;  %v2204_v52 = vmax.bf16 %v5303_v19, %v2140_v50 }
 0x330   : > { %v1895_v53 = vpop.f32.mrb[97].mxu1 }
 0x331   : > { %v4632_v55 = vpop.f32.mrb[98].mxu1  ;;  %4769 = vmatprep.mubr.bf16.mxu0 %v2204_v52 }
 0x332   : > { %v2071_v56 = vpack.c.bf16 %v4632_v55, %v4631_v51  ;;  %v1898_v57 = vpop.f32.mrb[99].mxu1  ;;  %4770 = vmatmul.mubr.bf16.gmra.mrb[220].mxu0 %v2205_v54 }
 0x333   : > { %v2070_v58 = vpack.c.bf16 %v1898_v57, %v1895_v53 }
 0x334   : > { %v2143_v59 = vadd.bf16 %v5850_v12, %v2071_v56 }
 0x335   : > { %v2142_v60 = vadd.bf16 %v5850_v12, %v2070_v58 }
 0x336   : > { %v2207_v1 = vmax.bf16 %v5303_v19, %v2143_v59 }
 0x337   : > { %v4635_v61 = vpop.f32.mrb[100].mxu1  ;;  %v2206_v63 = vmax.bf16 %v5303_v19, %v2142_v60 }
 0x338   : > { %v1911_v0 = vpop.f32.mrb[101].mxu1 }
 0x339   : > { %v4636_v2 = vpop.f32.mrb[102].mxu1  ;;  %4773 = vmatprep.mubr.bf16.mxu0 %v2206_v63 }
 0x33a   : > { %v2073_v3 = vpack.c.bf16 %v4636_v2, %v4635_v61  ;;  %v1914_v4 = vpop.f32.mrb[103].mxu1  ;;  %4774 = vmatmul.mubr.bf16.gmra.mrb[224].mxu0 %v2207_v1 }
 0x33b   : > { %v2072_v6 = vpack.c.bf16 %v1914_v4, %v1911_v0 }
 0x33c   : > { %v2145_v7 = vadd.bf16 %v5850_v12, %v2073_v3 }
 0x33d   : > { %v2144_v8 = vadd.bf16 %v5850_v12, %v2072_v6 }
 0x33e   : > { %v2209_v13 = vmax.bf16 %v5303_v19, %v2145_v7 }
 0x33f   : > { %v4639_v9 = vpop.f32.mrb[104].mxu1  ;;  %v2208_v10 = vmax.bf16 %v5303_v19, %v2144_v8 }
 0x340   : > { %v1927_v11 = vpop.f32.mrb[105].mxu1 }
 0x341   : > { %v4640_v14 = vpop.f32.mrb[106].mxu1  ;;  %4777 = vmatprep.mubr.bf16.mxu0 %v2208_v10 }
 0x342   : > { %v2075_v15 = vpack.c.bf16 %v4640_v14, %v4639_v9  ;;  %v1930_v16 = vpop.f32.mrb[107].mxu1  ;;  %4778 = vmatmul.mubr.bf16.gmra.mrb[228].mxu0 %v2209_v13 }
 0x343   : > { %v2074_v17 = vpack.c.bf16 %v1930_v16, %v1927_v11 }
 0x344   : > { %v2147_v18 = vadd.bf16 %v5850_v12, %v2075_v15 }
 0x345   : > { %v2146_v20 = vadd.bf16 %v5850_v12, %v2074_v17 }
 0x346   : > { %v2211_v25 = vmax.bf16 %v5303_v19, %v2147_v18 }
 0x347   : > { %v4643_v21 = vpop.f32.mrb[108].mxu1  ;;  %v2210_v22 = vmax.bf16 %v5303_v19, %v2146_v20 }
 0x348   : > { %v1943_v24 = vpop.f32.mrb[109].mxu1 }
 0x349   : > { %v4644_v26 = vpop.f32.mrb[110].mxu1  ;;  %4781 = vmatprep.mubr.bf16.mxu0 %v2210_v22 }
 0x34a   : > { %v2077_v27 = vpack.c.bf16 %v4644_v26, %v4643_v21  ;;  %v1946_v28 = vpop.f32.mrb[111].mxu1  ;;  %4782 = vmatmul.mubr.bf16.gmra.mrb[232].mxu0 %v2211_v25 }
 0x34b   : > { %v2076_v30 = vpack.c.bf16 %v1946_v28, %v1943_v24 }
 0x34c   : > { %v2149_v31 = vadd.bf16 %v5850_v12, %v2077_v27 }
 0x34d   : > { %v2148_v32 = vadd.bf16 %v5850_v12, %v2076_v30  ;;  %v4679_v33 = vpop.f32.mrb[128].mxu0 }
 0x34e   : > { %v2320_v34 = vpop.f32.mrb[129].mxu0  ;;  %v2213_v5 = vmax.bf16 %v5303_v19, %v2149_v31 }
 0x34f   : > { %v4647_v36 = vpop.f32.mrb[112].mxu1  ;;  %v4680_v37 = vpop.f32.mrb[130].mxu0  ;;  %v2212_v38 = vmax.bf16 %v5303_v19, %v2148_v32 }
 0x350   : > { %v2832_v39 = vpack.c.bf16 %v4680_v37, %v4679_v33  ;;  %v1959_v40 = vpop.f32.mrb[113].mxu1  ;;  %v2323_v41 = vpop.f32.mrb[131].mxu0 }
 0x351   : > { %v2831_v42 = vpack.c.bf16 %v2323_v41, %v2320_v34  ;;  %v4648_v43 = vpop.f32.mrb[114].mxu1  ;;  %4785 = vmatprep.mubr.bf16.mxu0 %v2212_v38 }
 0x352   : > { %v2904_v44 = vadd.bf16 %v5984_v35, %v2832_v39  ;;  %v2079_v45 = vpack.c.bf16 %v4648_v43, %v4647_v36  ;;  %v1962_v46 = vpop.f32.mrb[115].mxu1  ;;  %4786 = vmatmul.mubr.bf16.gmra.mrb[236].mxu0 %v2213_v5 }
 0x353   : > { %v2903_v62 = vadd.bf16 %v5984_v35, %v2831_v42  ;;  %v2078_v47 = vpack.c.bf16 %v1962_v46, %v1959_v40 }
 0x354   : > { %v2151_v48 = vadd.bf16 %v5850_v12, %v2079_v45  ;;  %v2968_v52 = vmax.bf16 %v5303_v19, %v2904_v44 }
 0x355   : > { %v2150_v49 = vadd.bf16 %v5850_v12, %v2078_v47  ;;  %v4683_v50 = vpop.f32.mrb[132].mxu0  ;;  %v2967_v51 = vmax.bf16 %v5303_v19, %v2903_v62 }
 0x356   : > { %v2336_v53 = vpop.f32.mrb[133].mxu0  ;;  %v2215_v60 = vmax.bf16 %v5303_v19, %v2151_v48 }
 0x357   : > { %v4651_v54 = vpop.f32.mrb[116].mxu1  ;;  %v4684_v55 = vpop.f32.mrb[134].mxu0  ;;  %4821 = vmatprep.mubr.bf16.mxu1 %v2967_v51  ;;  %v2214_v56 = vmax.bf16 %v5303_v19, %v2150_v49 }
 0x358   : > { %v2834_v57 = vpack.c.bf16 %v4684_v55, %v4683_v50  ;;  %v1975_v58 = vpop.f32.mrb[117].mxu1  ;;  %v2339_v59 = vpop.f32.mrb[135].mxu0  ;;  %4822 = vmatmul.mubr.bf16.vlgmr.msra.gmra.mrb[128].mxu1 %v2968_v52 }
 0x359   : > { %v2833_v61 = vpack.c.bf16 %v2339_v59, %v2336_v53  ;;  %v4652_v63 = vpop.f32.mrb[118].mxu1  ;;  %4789 = vmatprep.mubr.bf16.mxu0 %v2214_v56 }
 0x35a   : > { %v2906_v0 = vadd.bf16 %v5984_v35, %v2834_v57  ;;  %v2081_v1 = vpack.c.bf16 %v4652_v63, %v4651_v54  ;;  %v1978_v2 = vpop.f32.mrb[119].mxu1  ;;  %4790 = vmatmul.mubr.bf16.gmra.mrb[240].mxu0 %v2215_v60 }
 0x35b   : > { %v2905_v3 = vadd.bf16 %v5984_v35, %v2833_v61  ;;  %v2080_v4 = vpack.c.bf16 %v1978_v2, %v1975_v58 }
 0x35c   : > { %v2153_v6 = vadd.bf16 %v5850_v12, %v2081_v1  ;;  %v2970_v11 = vmax.bf16 %v5303_v19, %v2906_v0 }
 0x35d   : > { %v2152_v7 = vadd.bf16 %v5850_v12, %v2080_v4  ;;  %v4687_v8 = vpop.f32.mrb[136].mxu0  ;;  %v2969_v9 = vmax.bf16 %v5303_v19, %v2905_v3 }
 0x35e   : > { %v2352_v10 = vpop.f32.mrb[137].mxu0  ;;  %v2217_v20 = vmax.bf16 %v5303_v19, %v2153_v6 }
 0x35f   : > { %v4655_v13 = vpop.f32.mrb[120].mxu1  ;;  %v4688_v14 = vpop.f32.mrb[138].mxu0  ;;  %4825 = vmatprep.mubr.bf16.mxu1 %v2969_v9  ;;  %v2216_v15 = vmax.bf16 %v5303_v19, %v2152_v7 }
 0x360   : > { %v2836_v16 = vpack.c.bf16 %v4688_v14, %v4687_v8  ;;  %v1991_v17 = vpop.f32.mrb[121].mxu1  ;;  %v2355_v18 = vpop.f32.mrb[139].mxu0  ;;  %4826 = vmatmul.mubr.bf16.gmra.mrb[132].mxu1 %v2970_v11 }
 0x361   : > { %v2835_v21 = vpack.c.bf16 %v2355_v18, %v2352_v10  ;;  %v4656_v22 = vpop.f32.mrb[122].mxu1  ;;  %4793 = vmatprep.mubr.bf16.mxu0 %v2216_v15 }
 0x362   : > { %v2908_v23 = vadd.bf16 %v5984_v35, %v2836_v16  ;;  %v2083_v24 = vpack.c.bf16 %v4656_v22, %v4655_v13  ;;  %v1994_v25 = vpop.f32.mrb[123].mxu1  ;;  %4794 = vmatmul.mubr.bf16.gmra.mrb[244].mxu0 %v2217_v20 }
 0x363   : > { %v2907_v26 = vadd.bf16 %v5984_v35, %v2835_v21  ;;  %v2082_v27 = vpack.c.bf16 %v1994_v25, %v1991_v17 }
 0x364   : > { %v2155_v28 = vadd.bf16 %v5850_v12, %v2083_v24  ;;  %v2972_v33 = vmax.bf16 %v5303_v19, %v2908_v23 }
 0x365   : > { %v2154_v29 = vadd.bf16 %v5850_v12, %v2082_v27  ;;  %v4691_v30 = vpop.f32.mrb[140].mxu0  ;;  %v2971_v31 = vmax.bf16 %v5303_v19, %v2907_v26 }
 0x366   : > { %v2368_v32 = vpop.f32.mrb[141].mxu0  ;;  %v2219_v41 = vmax.bf16 %v5303_v19, %v2155_v28 }
 0x367   : > { %v4659_v34 = vpop.f32.mrb[124].mxu1  ;;  %v4692_v36 = vpop.f32.mrb[142].mxu0  ;;  %4829 = vmatprep.mubr.bf16.mxu1 %v2971_v31  ;;  %v2218_v37 = vmax.bf16 %v5303_v19, %v2154_v29 }
 0x368   : > { %v2838_v38 = vpack.c.bf16 %v4692_v36, %v4691_v30  ;;  %v2007_v39 = vpop.f32.mrb[125].mxu1  ;;  %v2371_v40 = vpop.f32.mrb[143].mxu0  ;;  %4830 = vmatmul.mubr.bf16.gmra.mrb[136].mxu1 %v2972_v33 }
 0x369   : > { %v2837_v5 = vpack.c.bf16 %v2371_v40, %v2368_v32  ;;  %v4660_v42 = vpop.f32.mrb[126].mxu1  ;;  %4797 = vmatprep.mubr.bf16.mxu0 %v2218_v37 }
 0x36a   : > { %v2910_v43 = vadd.bf16 %v5984_v35, %v2838_v38  ;;  %v2085_v44 = vpack.c.bf16 %v4660_v42, %v4659_v34  ;;  %v2010_v45 = vpop.f32.mrb[127].mxu1  ;;  %4798 = vmatmul.mubr.bf16.gmra.mrb[248].mxu0 %v2219_v41 }
 0x36b   : > { %v2909_v46 = vadd.bf16 %v5984_v35, %v2837_v5  ;;  %v2084_v62 = vpack.c.bf16 %v2010_v45, %v2007_v39 }
 0x36c   : > { %v2157_v47 = vadd.bf16 %v5850_v12, %v2085_v44  ;;  %v2974_v52 = vmax.bf16 %v5303_v19, %v2910_v43 }
 0x36d   : > { %v2156_v48 = vadd.bf16 %v5850_v12, %v2084_v62  ;;  %v4695_v49 = vpop.f32.mrb[144].mxu0  ;;  %v2973_v50 = vmax.bf16 %v5303_v19, %v2909_v46 }
 0x36e   : > { %v2384_v51 = vpop.f32.mrb[145].mxu0  ;;  %v2221_v57 = vmax.bf16 %v5303_v19, %v2157_v47 }
 0x36f   : > { %v4696_v53 = vpop.f32.mrb[146].mxu0  ;;  %4833 = vmatprep.mubr.bf16.mxu1 %v2973_v50  ;;  %v2220_v54 = vmax.bf16 %v5303_v19, %v2156_v48 }
 0x370   : > { %v2840_v55 = vpack.c.bf16 %v4696_v53, %v4695_v49  ;;  %v2387_v56 = vpop.f32.mrb[147].mxu0  ;;  %4834 = vmatmul.mubr.bf16.gmra.mrb[140].mxu1 %v2974_v52 }
 0x371   : > { %v2839_v58 = vpack.c.bf16 %v2387_v56, %v2384_v51  ;;  %4801 = vmatprep.mubr.bf16.mxu0 %v2220_v54 }
 0x372   : > { %v2912_v59 = vadd.bf16 %v5984_v35, %v2840_v55  ;;  %4802 = vmatmul.mubr.bf16.gmra.mrb[252].mxu0 %v2221_v57 }
 0x373   : > { %v2911_v12 = vadd.bf16 %v5984_v35, %v2839_v58 }
 0x374   : > { %v2976_v0 = vmax.bf16 %v5303_v19, %v2912_v59 }
 0x375   : > { %v4699_v60 = vpop.f32.mrb[148].mxu0  ;;  %v2975_v61 = vmax.bf16 %v5303_v19, %v2911_v12 }
 0x376   : > { %v2400_v63 = vpop.f32.mrb[149].mxu0 }
 0x377   : > { %v4700_v1 = vpop.f32.mrb[150].mxu0  ;;  %4837 = vmatprep.mubr.bf16.mxu1 %v2975_v61 }
 0x378   : > { %v2842_v2 = vpack.c.bf16 %v4700_v1, %v4699_v60  ;;  %v2403_v3 = vpop.f32.mrb[151].mxu0  ;;  %4838 = vmatmul.mubr.bf16.gmra.mrb[144].mxu1 %v2976_v0 }
 0x379   : > { %v2841_v4 = vpack.c.bf16 %v2403_v3, %v2400_v63 }
 0x37a   : > { %v2914_v6 = vadd.bf16 %v5984_v35, %v2842_v2 }
 0x37b   : > { %v2913_v7 = vadd.bf16 %v5984_v35, %v2841_v4 }
 0x37c   : > { %v2978_v11 = vmax.bf16 %v5303_v19, %v2914_v6 }
 0x37d   : > { %v4703_v8 = vpop.f32.mrb[152].mxu0  ;;  %v2977_v9 = vmax.bf16 %v5303_v19, %v2913_v7 }
 0x37e   : > { %v2416_v10 = vpop.f32.mrb[153].mxu0 }
 0x37f   : > { %v4704_v13 = vpop.f32.mrb[154].mxu0  ;;  %4841 = vmatprep.mubr.bf16.mxu1 %v2977_v9 }
 0x380   : > { %v2844_v14 = vpack.c.bf16 %v4704_v13, %v4703_v8  ;;  %v2419_v15 = vpop.f32.mrb[155].mxu0  ;;  %4842 = vmatmul.mubr.bf16.gmra.mrb[148].mxu1 %v2978_v11 }
 0x381   : > { %v2843_v16 = vpack.c.bf16 %v2419_v15, %v2416_v10 }
 0x382   : > { %v2916_v17 = vadd.bf16 %v5984_v35, %v2844_v14 }
 0x383   : > { %v2915_v18 = vadd.bf16 %v5984_v35, %v2843_v16 }
 0x384   : > { %v2980_v23 = vmax.bf16 %v5303_v19, %v2916_v17 }
 0x385   : > { %v4707_v20 = vpop.f32.mrb[156].mxu0  ;;  %v2979_v21 = vmax.bf16 %v5303_v19, %v2915_v18 }
 0x386   : > { %v2432_v22 = vpop.f32.mrb[157].mxu0 }
 0x387   : > { %v4708_v24 = vpop.f32.mrb[158].mxu0  ;;  %4845 = vmatprep.mubr.bf16.mxu1 %v2979_v21 }
 0x388   : > { %v2846_v25 = vpack.c.bf16 %v4708_v24, %v4707_v20  ;;  %v2435_v26 = vpop.f32.mrb[159].mxu0  ;;  %4846 = vmatmul.mubr.bf16.gmra.mrb[152].mxu1 %v2980_v23 }
 0x389   : > { %v2845_v27 = vpack.c.bf16 %v2435_v26, %v2432_v22 }
 0x38a   : > { %v2918_v28 = vadd.bf16 %v5984_v35, %v2846_v25 }
 0x38b   : > { %v2917_v29 = vadd.bf16 %v5984_v35, %v2845_v27 }
 0x38c   : > { %v2982_v33 = vmax.bf16 %v5303_v19, %v2918_v28 }
 0x38d   : > { %v4711_v30 = vpop.f32.mrb[160].mxu0  ;;  %v2981_v31 = vmax.bf16 %v5303_v19, %v2917_v29 }
 0x38e   : > { %v2448_v32 = vpop.f32.mrb[161].mxu0 }
 0x38f   : > { %v4712_v34 = vpop.f32.mrb[162].mxu0  ;;  %4849 = vmatprep.mubr.bf16.mxu1 %v2981_v31 }
 0x390   : > { %v2848_v36 = vpack.c.bf16 %v4712_v34, %v4711_v30  ;;  %v2451_v37 = vpop.f32.mrb[163].mxu0  ;;  %4850 = vmatmul.mubr.bf16.gmra.mrb[156].mxu1 %v2982_v33 }
 0x391   : > { %v2847_v38 = vpack.c.bf16 %v2451_v37, %v2448_v32 }
 0x392   : > { %v2920_v39 = vadd.bf16 %v5984_v35, %v2848_v36 }
 0x393   : > { %v2919_v40 = vadd.bf16 %v5984_v35, %v2847_v38 }
 0x394   : > { %v2984_v43 = vmax.bf16 %v5303_v19, %v2920_v39 }
 0x395   : > { %v4715_v41 = vpop.f32.mrb[164].mxu0  ;;  %v2983_v5 = vmax.bf16 %v5303_v19, %v2919_v40 }
 0x396   : > { %v2464_v42 = vpop.f32.mrb[165].mxu0 }
 0x397   : > { %v4716_v44 = vpop.f32.mrb[166].mxu0  ;;  %4853 = vmatprep.mubr.bf16.mxu1 %v2983_v5 }
 0x398   : > { %v2850_v45 = vpack.c.bf16 %v4716_v44, %v4715_v41  ;;  %v2467_v46 = vpop.f32.mrb[167].mxu0  ;;  %4854 = vmatmul.mubr.bf16.gmra.mrb[160].mxu1 %v2984_v43 }
 0x399   : > { %v2849_v62 = vpack.c.bf16 %v2467_v46, %v2464_v42 }
 0x39a   : > { %v2922_v47 = vadd.bf16 %v5984_v35, %v2850_v45 }
 0x39b   : > { %v2921_v48 = vadd.bf16 %v5984_v35, %v2849_v62 }
 0x39c   : > { %v2986_v52 = vmax.bf16 %v5303_v19, %v2922_v47 }
 0x39d   : > { %v4719_v49 = vpop.f32.mrb[168].mxu0  ;;  %v2985_v50 = vmax.bf16 %v5303_v19, %v2921_v48 }
 0x39e   : > { %v2480_v51 = vpop.f32.mrb[169].mxu0 }
 0x39f   : > { %v4720_v53 = vpop.f32.mrb[170].mxu0  ;;  %4857 = vmatprep.mubr.bf16.mxu1 %v2985_v50 }
 0x3a0   : > { %v2852_v54 = vpack.c.bf16 %v4720_v53, %v4719_v49  ;;  %v2483_v55 = vpop.f32.mrb[171].mxu0  ;;  %4858 = vmatmul.mubr.bf16.gmra.mrb[164].mxu1 %v2986_v52 }
 0x3a1   : > { %v2851_v56 = vpack.c.bf16 %v2483_v55, %v2480_v51 }
 0x3a2   : > { %v2924_v57 = vadd.bf16 %v5984_v35, %v2852_v54 }
 0x3a3   : > { %v2923_v58 = vadd.bf16 %v5984_v35, %v2851_v56 }
 0x3a4   : > { %v2988_v61 = vmax.bf16 %v5303_v19, %v2924_v57 }
 0x3a5   : > { %v4723_v59 = vpop.f32.mrb[172].mxu0  ;;  %v2987_v12 = vmax.bf16 %v5303_v19, %v2923_v58 }
 0x3a6   : > { %v2496_v60 = vpop.f32.mrb[173].mxu0 }
 0x3a7   : > { %v4724_v63 = vpop.f32.mrb[174].mxu0  ;;  %4861 = vmatprep.mubr.bf16.mxu1 %v2987_v12 }
 0x3a8   : > { %v2854_v0 = vpack.c.bf16 %v4724_v63, %v4723_v59  ;;  %v2499_v1 = vpop.f32.mrb[175].mxu0  ;;  %4862 = vmatmul.mubr.bf16.gmra.mrb[168].mxu1 %v2988_v61 }
 0x3a9   : > { %v2853_v2 = vpack.c.bf16 %v2499_v1, %v2496_v60 }
 0x3aa   : > { %v2926_v3 = vadd.bf16 %v5984_v35, %v2854_v0 }
 0x3ab   : > { %v2925_v4 = vadd.bf16 %v5984_v35, %v2853_v2 }
 0x3ac   : > { %v2990_v9 = vmax.bf16 %v5303_v19, %v2926_v3 }
 0x3ad   : > { %v4727_v6 = vpop.f32.mrb[176].mxu0  ;;  %v2989_v7 = vmax.bf16 %v5303_v19, %v2925_v4 }
 0x3ae   : > { %v2512_v8 = vpop.f32.mrb[177].mxu0 }
 0x3af   : > { %v4728_v10 = vpop.f32.mrb[178].mxu0  ;;  %4865 = vmatprep.mubr.bf16.mxu1 %v2989_v7 }
 0x3b0   : > { %v2856_v11 = vpack.c.bf16 %v4728_v10, %v4727_v6  ;;  %v2515_v13 = vpop.f32.mrb[179].mxu0  ;;  %4866 = vmatmul.mubr.bf16.gmra.mrb[172].mxu1 %v2990_v9 }
 0x3b1   : > { %v2855_v14 = vpack.c.bf16 %v2515_v13, %v2512_v8 }
 0x3b2   : > { %v2928_v15 = vadd.bf16 %v5984_v35, %v2856_v11 }
 0x3b3   : > { %v2927_v16 = vadd.bf16 %v5984_v35, %v2855_v14 }
 0x3b4   : > { %v2992_v21 = vmax.bf16 %v5303_v19, %v2928_v15 }
 0x3b5   : > { %v4731_v17 = vpop.f32.mrb[180].mxu0  ;;  %v2991_v18 = vmax.bf16 %v5303_v19, %v2927_v16 }
 0x3b6   : > { %v2528_v20 = vpop.f32.mrb[181].mxu0 }
 0x3b7   : > { %v4732_v22 = vpop.f32.mrb[182].mxu0  ;;  %4869 = vmatprep.mubr.bf16.mxu1 %v2991_v18 }
 0x3b8   : > { %v2858_v23 = vpack.c.bf16 %v4732_v22, %v4731_v17  ;;  %v2531_v24 = vpop.f32.mrb[183].mxu0  ;;  %4870 = vmatmul.mubr.bf16.gmra.mrb[176].mxu1 %v2992_v21 }
 0x3b9   : > { %v2857_v25 = vpack.c.bf16 %v2531_v24, %v2528_v20 }
 0x3ba   : > { %v2930_v26 = vadd.bf16 %v5984_v35, %v2858_v23 }
 0x3bb   : > { %v2929_v27 = vadd.bf16 %v5984_v35, %v2857_v25 }
 0x3bc   : > { %v2994_v31 = vmax.bf16 %v5303_v19, %v2930_v26 }
 0x3bd   : > { %v4735_v28 = vpop.f32.mrb[184].mxu0  ;;  %v2993_v29 = vmax.bf16 %v5303_v19, %v2929_v27 }
 0x3be   : > { %v2544_v30 = vpop.f32.mrb[185].mxu0 }
 0x3bf   : > { %v4736_v32 = vpop.f32.mrb[186].mxu0  ;;  %4873 = vmatprep.mubr.bf16.mxu1 %v2993_v29 }
 0x3c0   : > { %v2860_v33 = vpack.c.bf16 %v4736_v32, %v4735_v28  ;;  %v2547_v34 = vpop.f32.mrb[187].mxu0  ;;  %4874 = vmatmul.mubr.bf16.gmra.mrb[180].mxu1 %v2994_v31 }
 0x3c1   : > { %v2859_v36 = vpack.c.bf16 %v2547_v34, %v2544_v30 }
 0x3c2   : > { %v2932_v37 = vadd.bf16 %v5984_v35, %v2860_v33 }
 0x3c3   : > { %v2931_v38 = vadd.bf16 %v5984_v35, %v2859_v36 }
 0x3c4   : > { %v2996_v5 = vmax.bf16 %v5303_v19, %v2932_v37 }
 0x3c5   : > { %v4739_v39 = vpop.f32.mrb[188].mxu0  ;;  %v2995_v40 = vmax.bf16 %v5303_v19, %v2931_v38 }
 0x3c6   : > { %v2560_v41 = vpop.f32.mrb[189].mxu0 }
 0x3c7   : > { %v4740_v42 = vpop.f32.mrb[190].mxu0  ;;  %4877 = vmatprep.mubr.bf16.mxu1 %v2995_v40 }
 0x3c8   : > { %v2862_v43 = vpack.c.bf16 %v4740_v42, %v4739_v39  ;;  %v2563_v44 = vpop.f32.mrb[191].mxu0  ;;  %4878 = vmatmul.mubr.bf16.gmra.mrb[184].mxu1 %v2996_v5 }
 0x3c9   : > { %v2861_v45 = vpack.c.bf16 %v2563_v44, %v2560_v41 }
 0x3ca   : > { %v2934_v46 = vadd.bf16 %v5984_v35, %v2862_v43 }
 0x3cb   : > { %v2933_v62 = vadd.bf16 %v5984_v35, %v2861_v45 }
 0x3cc   : > { %v2998_v50 = vmax.bf16 %v5303_v19, %v2934_v46 }
 0x3cd   : > { %v4743_v47 = vpop.f32.mrb[192].mxu0  ;;  %v2997_v48 = vmax.bf16 %v5303_v19, %v2933_v62 }
 0x3ce   : > { %v2576_v49 = vpop.f32.mrb[193].mxu0 }
 0x3cf   : > { %v4744_v51 = vpop.f32.mrb[194].mxu0  ;;  %4881 = vmatprep.mubr.bf16.mxu1 %v2997_v48 }
 0x3d0   : > { %v2864_v52 = vpack.c.bf16 %v4744_v51, %v4743_v47  ;;  %v2579_v53 = vpop.f32.mrb[195].mxu0  ;;  %4882 = vmatmul.mubr.bf16.gmra.mrb[188].mxu1 %v2998_v50 }
 0x3d1   : > { %v2863_v54 = vpack.c.bf16 %v2579_v53, %v2576_v49 }
 0x3d2   : > { %v2936_v55 = vadd.bf16 %v5984_v35, %v2864_v52 }
 0x3d3   : > { %v2935_v56 = vadd.bf16 %v5984_v35, %v2863_v54 }
 0x3d4   : > { %v3000_v12 = vmax.bf16 %v5303_v19, %v2936_v55 }
 0x3d5   : > { %v4747_v57 = vpop.f32.mrb[196].mxu0  ;;  %v2999_v58 = vmax.bf16 %v5303_v19, %v2935_v56 }
 0x3d6   : > { %v2592_v59 = vpop.f32.mrb[197].mxu0 }
 0x3d7   : > { %v4748_v60 = vpop.f32.mrb[198].mxu0  ;;  %4885 = vmatprep.mubr.bf16.mxu1 %v2999_v58 }
 0x3d8   : > { %v2866_v61 = vpack.c.bf16 %v4748_v60, %v4747_v57  ;;  %v2595_v63 = vpop.f32.mrb[199].mxu0  ;;  %4886 = vmatmul.mubr.bf16.gmra.mrb[192].mxu1 %v3000_v12 }
 0x3d9   : > { %v2865_v0 = vpack.c.bf16 %v2595_v63, %v2592_v59 }
 0x3da   : > { %v2938_v1 = vadd.bf16 %v5984_v35, %v2866_v61 }
 0x3db   : > { %v2937_v2 = vadd.bf16 %v5984_v35, %v2865_v0 }
 0x3dc   : > { %v3002_v7 = vmax.bf16 %v5303_v19, %v2938_v1 }
 0x3dd   : > { %v4751_v3 = vpop.f32.mrb[200].mxu0  ;;  %v3001_v4 = vmax.bf16 %v5303_v19, %v2937_v2 }
 0x3de   : > { %v2608_v6 = vpop.f32.mrb[201].mxu0 }
 0x3df   : > { %v4752_v8 = vpop.f32.mrb[202].mxu0  ;;  %4889 = vmatprep.mubr.bf16.mxu1 %v3001_v4 }
 0x3e0   : > { %v2868_v9 = vpack.c.bf16 %v4752_v8, %v4751_v3  ;;  %v2611_v10 = vpop.f32.mrb[203].mxu0  ;;  %4890 = vmatmul.mubr.bf16.gmra.mrb[196].mxu1 %v3002_v7 }
 0x3e1   : > { %v2867_v11 = vpack.c.bf16 %v2611_v10, %v2608_v6 }
 0x3e2   : > { %v2940_v13 = vadd.bf16 %v5984_v35, %v2868_v9 }
 0x3e3   : > { %v2939_v14 = vadd.bf16 %v5984_v35, %v2867_v11 }
 0x3e4   : > { %v3004_v18 = vmax.bf16 %v5303_v19, %v2940_v13 }
 0x3e5   : > { %v4755_v15 = vpop.f32.mrb[204].mxu0  ;;  %v3003_v16 = vmax.bf16 %v5303_v19, %v2939_v14 }
 0x3e6   : > { %v2624_v17 = vpop.f32.mrb[205].mxu0 }
 0x3e7   : > { %v4756_v20 = vpop.f32.mrb[206].mxu0  ;;  %4893 = vmatprep.mubr.bf16.mxu1 %v3003_v16 }
 0x3e8   : > { %v2870_v21 = vpack.c.bf16 %v4756_v20, %v4755_v15  ;;  %v2627_v22 = vpop.f32.mrb[207].mxu0  ;;  %4894 = vmatmul.mubr.bf16.gmra.mrb[200].mxu1 %v3004_v18 }
 0x3e9   : > { %v2869_v23 = vpack.c.bf16 %v2627_v22, %v2624_v17 }
 0x3ea   : > { %v2942_v24 = vadd.bf16 %v5984_v35, %v2870_v21 }
 0x3eb   : > { %v2941_v25 = vadd.bf16 %v5984_v35, %v2869_v23 }
 0x3ec   : > { %v3006_v29 = vmax.bf16 %v5303_v19, %v2942_v24 }
 0x3ed   : > { %v4759_v26 = vpop.f32.mrb[208].mxu0  ;;  %v3005_v27 = vmax.bf16 %v5303_v19, %v2941_v25 }
 0x3ee   : > { %v2640_v28 = vpop.f32.mrb[209].mxu0 }
 0x3ef   : > { %v4760_v30 = vpop.f32.mrb[210].mxu0  ;;  %4897 = vmatprep.mubr.bf16.mxu1 %v3005_v27 }
 0x3f0   : > { %v2872_v31 = vpack.c.bf16 %v4760_v30, %v4759_v26  ;;  %v2643_v32 = vpop.f32.mrb[211].mxu0  ;;  %4898 = vmatmul.mubr.bf16.gmra.mrb[204].mxu1 %v3006_v29 }
 0x3f1   : > { %v2871_v33 = vpack.c.bf16 %v2643_v32, %v2640_v28 }
 0x3f2   : > { %v2944_v34 = vadd.bf16 %v5984_v35, %v2872_v31 }
 0x3f3   : > { %v2943_v36 = vadd.bf16 %v5984_v35, %v2871_v33 }
 0x3f4   : > { %v3008_v40 = vmax.bf16 %v5303_v19, %v2944_v34 }
 0x3f5   : > { %v4763_v37 = vpop.f32.mrb[212].mxu0  ;;  %v3007_v38 = vmax.bf16 %v5303_v19, %v2943_v36 }
 0x3f6   : > { %v2656_v39 = vpop.f32.mrb[213].mxu0 }
 0x3f7   : > { %v4764_v41 = vpop.f32.mrb[214].mxu0  ;;  %4901 = vmatprep.mubr.bf16.mxu1 %v3007_v38 }
 0x3f8   : > { %v2874_v5 = vpack.c.bf16 %v4764_v41, %v4763_v37  ;;  %v2659_v42 = vpop.f32.mrb[215].mxu0  ;;  %4902 = vmatmul.mubr.bf16.gmra.mrb[208].mxu1 %v3008_v40 }
 0x3f9   : > { %v2873_v43 = vpack.c.bf16 %v2659_v42, %v2656_v39  ;;  %v6115_v42 = vld [vmem:[%s6446_s8] ss:$0 sm:$0xff] }
 0x3fa   : > { %v2946_v44 = vadd.bf16 %v5984_v35, %v2874_v5 }
 0x3fb   : > { %v2945_v45 = vadd.bf16 %v5984_v35, %v2873_v43 }
 0x3fc   : > { %v3010_v48 = vmax.bf16 %v5303_v19, %v2946_v44 }
 0x3fd   : > { %v4767_v46 = vpop.f32.mrb[216].mxu0  ;;  %v3009_v62 = vmax.bf16 %v5303_v19, %v2945_v45 }
 0x3fe   : > { %v2672_v47 = vpop.f32.mrb[217].mxu0 }
 0x3ff   : > { %v4768_v49 = vpop.f32.mrb[218].mxu0  ;;  %4905 = vmatprep.mubr.bf16.mxu1 %v3009_v62 }
 0x400   : > { %v2876_v50 = vpack.c.bf16 %v4768_v49, %v4767_v46  ;;  %v2675_v51 = vpop.f32.mrb[219].mxu0  ;;  %4906 = vmatmul.mubr.bf16.gmra.mrb[212].mxu1 %v3010_v48 }
 0x401   : > { %v2875_v52 = vpack.c.bf16 %v2675_v51, %v2672_v47 }
 0x402   : > { %v2948_v53 = vadd.bf16 %v5984_v35, %v2876_v50 }
 0x403   : > { %v2947_v54 = vadd.bf16 %v5984_v35, %v2875_v52 }
 0x404   : > { %v3012_v58 = vmax.bf16 %v5303_v19, %v2948_v53 }
 0x405   : > { %v4771_v55 = vpop.f32.mrb[220].mxu0  ;;  %v3011_v56 = vmax.bf16 %v5303_v19, %v2947_v54 }
 0x406   : > { %v2688_v57 = vpop.f32.mrb[221].mxu0 }
 0x407   : > { %v4772_v59 = vpop.f32.mrb[222].mxu0  ;;  %4909 = vmatprep.mubr.bf16.mxu1 %v3011_v56 }
 0x408   : > { %v2878_v12 = vpack.c.bf16 %v4772_v59, %v4771_v55  ;;  %v2691_v60 = vpop.f32.mrb[223].mxu0  ;;  %4910 = vmatmul.mubr.bf16.gmra.mrb[216].mxu1 %v3012_v58 }
 0x409   : > { %v2877_v61 = vpack.c.bf16 %v2691_v60, %v2688_v57 }
 0x40a   : > { %v2950_v63 = vadd.bf16 %v5984_v35, %v2878_v12 }
 0x40b   : > { %v2949_v0 = vadd.bf16 %v5984_v35, %v2877_v61 }
 0x40c   : > { %v3014_v4 = vmax.bf16 %v5303_v19, %v2950_v63 }
 0x40d   : > { %v4775_v1 = vpop.f32.mrb[224].mxu0  ;;  %v3013_v2 = vmax.bf16 %v5303_v19, %v2949_v0 }
 0x40e   : > { %v2704_v3 = vpop.f32.mrb[225].mxu0 }
 0x40f   : > { %v4776_v6 = vpop.f32.mrb[226].mxu0  ;;  %4913 = vmatprep.mubr.bf16.mxu1 %v3013_v2 }
 0x410   : > { %v2880_v7 = vpack.c.bf16 %v4776_v6, %v4775_v1  ;;  %v2707_v8 = vpop.f32.mrb[227].mxu0  ;;  %4914 = vmatmul.mubr.bf16.gmra.mrb[220].mxu1 %v3014_v4 }
 0x411   : > { %v2879_v9 = vpack.c.bf16 %v2707_v8, %v2704_v3 }
 0x412   : > { %v2952_v10 = vadd.bf16 %v5984_v35, %v2880_v7 }
 0x413   : > { %v2951_v11 = vadd.bf16 %v5984_v35, %v2879_v9 }
 0x414   : > { %v3016_v16 = vmax.bf16 %v5303_v19, %v2952_v10 }
 0x415   : > { %v4779_v13 = vpop.f32.mrb[228].mxu0  ;;  %v3015_v14 = vmax.bf16 %v5303_v19, %v2951_v11 }
 0x416   : > { %v2720_v15 = vpop.f32.mrb[229].mxu0 }
 0x417   : > { %v4780_v17 = vpop.f32.mrb[230].mxu0  ;;  %4917 = vmatprep.mubr.bf16.mxu1 %v3015_v14 }
 0x418   : > { %v2882_v18 = vpack.c.bf16 %v4780_v17, %v4779_v13  ;;  %v2723_v20 = vpop.f32.mrb[231].mxu0  ;;  %4918 = vmatmul.mubr.bf16.gmra.mrb[224].mxu1 %v3016_v16 }
 0x419   : > { %v2881_v21 = vpack.c.bf16 %v2723_v20, %v2720_v15 }
 0x41a   : > { %v2954_v22 = vadd.bf16 %v5984_v35, %v2882_v18 }
 0x41b   : > { %v2953_v23 = vadd.bf16 %v5984_v35, %v2881_v21 }
 0x41c   : > { %v3018_v27 = vmax.bf16 %v5303_v19, %v2954_v22 }
 0x41d   : > { %v4783_v24 = vpop.f32.mrb[232].mxu0  ;;  %v3017_v25 = vmax.bf16 %v5303_v19, %v2953_v23 }
 0x41e   : > { %v2736_v26 = vpop.f32.mrb[233].mxu0 }
 0x41f   : > { %v4784_v28 = vpop.f32.mrb[234].mxu0  ;;  %4921 = vmatprep.mubr.bf16.mxu1 %v3017_v25 }
 0x420   : > { %v2884_v29 = vpack.c.bf16 %v4784_v28, %v4783_v24  ;;  %v2739_v30 = vpop.f32.mrb[235].mxu0  ;;  %4922 = vmatmul.mubr.bf16.gmra.mrb[228].mxu1 %v3018_v27 }
 0x421   : > { %v2883_v31 = vpack.c.bf16 %v2739_v30, %v2736_v26 }
 0x422   : > { %v2956_v32 = vadd.bf16 %v5984_v35, %v2884_v29 }
 0x423   : > { %v2955_v33 = vadd.bf16 %v5984_v35, %v2883_v31 }
 0x424   : > { %v3020_v38 = vmax.bf16 %v5303_v19, %v2956_v32 }
 0x425   : > { %v4787_v34 = vpop.f32.mrb[236].mxu0  ;;  %v3019_v36 = vmax.bf16 %v5303_v19, %v2955_v33 }
 0x426   : > { %v2752_v37 = vpop.f32.mrb[237].mxu0 }
 0x427   : > { %v4788_v39 = vpop.f32.mrb[238].mxu0  ;;  %4925 = vmatprep.mubr.bf16.mxu1 %v3019_v36 }
 0x428   : > { %v2886_v40 = vpack.c.bf16 %v4788_v39, %v4787_v34  ;;  %v2755_v41 = vpop.f32.mrb[239].mxu0  ;;  %4926 = vmatmul.mubr.bf16.gmra.mrb[232].mxu1 %v3020_v38 }
 0x429   : > { %v2885_v5 = vpack.c.bf16 %v2755_v41, %v2752_v37 }
 0x42a   : > { %v2958_v43 = vadd.bf16 %v5984_v35, %v2886_v40 }
 0x42b   : > { %v2957_v44 = vadd.bf16 %v5984_v35, %v2885_v5  ;;  %v4823_v45 = vpop.f32.mrb[128].mxu1 }
 0x42c   : > { %v3145_v46 = vadd.f32 %v4823_v45, %v6115_v42  ;;  %v3136_v62 = vpop.f32.mrb[129].mxu1  ;;  %v3022_v55 = vmax.bf16 %v5303_v19, %v2958_v43 }
 0x42d   : > { %v3137_v47 = vadd.f32 %v6115_v42, %v3136_v62  ;;  %v4791_v48 = vpop.f32.mrb[240].mxu0  ;;  %v4824_v49 = vpop.f32.mrb[130].mxu1  ;;  %v3021_v50 = vmax.bf16 %v5303_v19, %v2957_v44 }
 0x42e   : > { %v3649_v51 = vmax.f32 %v3145_v46, 0.0  ;;  %v3148_v52 = vadd.f32 %v4824_v49, %v6115_v42  ;;  %v2768_v53 = vpop.f32.mrb[241].mxu0  ;;  %v3139_v54 = vpop.f32.mrb[131].mxu1 }
 0x42f   : > { %v3647_v56 = vmax.f32 %v3137_v47, 0.0  ;;  %v3140_v57 = vadd.f32 %v6115_v42, %v3139_v54  ;;  %v4792_v58 = vpop.f32.mrb[242].mxu0  ;;  %4929 = vmatprep.mubr.bf16.mxu1 %v3021_v50 }
 0x430   : > { %3777 = vst [vmem:[%s6127_s20 + $0x10] sm:$0xff] %v3649_v51  ;;  %v3650_v59 = vmax.f32 %v3148_v52, 0.0  ;;  %v2888_v12 = vpack.c.bf16 %v4792_v58, %v4791_v48  ;;  %v2771_v60 = vpop.f32.mrb[243].mxu0  ;;  %4930 = vmatmul.mubr.bf16.gmra.mrb[236].mxu1 %v3022_v55 }
 0x431   : > { %3775 = vst [vmem:[%s6127_s20] sm:$0xff] %v3647_v56  ;;  %v3648_v61 = vmax.f32 %v3140_v57, 0.0  ;;  %v2887_v63 = vpack.c.bf16 %v2771_v60, %v2768_v53 }
 0x432   : > { %3778 = vst [vmem:[%s6127_s20 + $0x18] sm:$0xff] %v3650_v59  ;;  %v2960_v0 = vadd.bf16 %v5984_v35, %v2888_v12 }
 0x433   : > { %3776 = vst [vmem:[%s6127_s20 + $0x8] sm:$0xff] %v3648_v61  ;;  %v2959_v1 = vadd.bf16 %v5984_v35, %v2887_v63  ;;  %v4827_v2 = vpop.f32.mrb[132].mxu1 }
 0x434   : > { %v3161_v3 = vadd.f32 %v4827_v2, %v6115_v42  ;;  %v3152_v4 = vpop.f32.mrb[133].mxu1  ;;  %v3024_v15 = vmax.bf16 %v5303_v19, %v2960_v0 }
 0x435   : > { %v3153_v6 = vadd.f32 %v6115_v42, %v3152_v4  ;;  %v4795_v7 = vpop.f32.mrb[244].mxu0  ;;  %v4828_v8 = vpop.f32.mrb[134].mxu1  ;;  %v3023_v9 = vmax.bf16 %v5303_v19, %v2959_v1 }
 0x436   : > { %v3653_v10 = vmax.f32 %v3161_v3, 0.0  ;;  %v3164_v11 = vadd.f32 %v4828_v8, %v6115_v42  ;;  %v2784_v13 = vpop.f32.mrb[245].mxu0  ;;  %v3155_v14 = vpop.f32.mrb[135].mxu1 }
 0x437   : > { %v3651_v16 = vmax.f32 %v3153_v6, 0.0  ;;  %v3156_v17 = vadd.f32 %v6115_v42, %v3155_v14  ;;  %v4796_v18 = vpop.f32.mrb[246].mxu0  ;;  %4933 = vmatprep.mubr.bf16.mxu1 %v3023_v9 }
 0x438   : > { %3781 = vst [vmem:[%s6127_s20 + $0x30] sm:$0xff] %v3653_v10  ;;  %v3654_v20 = vmax.f32 %v3164_v11, 0.0  ;;  %v2890_v21 = vpack.c.bf16 %v4796_v18, %v4795_v7  ;;  %v2787_v22 = vpop.f32.mrb[247].mxu0  ;;  %4934 = vmatmul.mubr.bf16.gmra.mrb[240].mxu1 %v3024_v15 }
 0x439   : > { %3779 = vst [vmem:[%s6127_s20 + $0x20] sm:$0xff] %v3651_v16  ;;  %v3652_v23 = vmax.f32 %v3156_v17, 0.0  ;;  %v2889_v24 = vpack.c.bf16 %v2787_v22, %v2784_v13 }
 0x43a   : > { %3782 = vst [vmem:[%s6127_s20 + $0x38] sm:$0xff] %v3654_v20  ;;  %v2962_v25 = vadd.bf16 %v5984_v35, %v2890_v21 }
 0x43b   : > { %3780 = vst [vmem:[%s6127_s20 + $0x28] sm:$0xff] %v3652_v23  ;;  %v2961_v26 = vadd.bf16 %v5984_v35, %v2889_v24  ;;  %v4831_v27 = vpop.f32.mrb[136].mxu1 }
 0x43c   : > { %v3177_v28 = vadd.f32 %v4831_v27, %v6115_v42  ;;  %v3168_v29 = vpop.f32.mrb[137].mxu1  ;;  %v3026_v39 = vmax.bf16 %v5303_v19, %v2962_v25 }
 0x43d   : > { %v3169_v30 = vadd.f32 %v6115_v42, %v3168_v29  ;;  %v4799_v31 = vpop.f32.mrb[248].mxu0  ;;  %v4832_v32 = vpop.f32.mrb[138].mxu1  ;;  %v3025_v33 = vmax.bf16 %v5303_v19, %v2961_v26 }
 0x43e   : > { %v3657_v34 = vmax.f32 %v3177_v28, 0.0  ;;  %v3180_v36 = vadd.f32 %v4832_v32, %v6115_v42  ;;  %v2800_v37 = vpop.f32.mrb[249].mxu0  ;;  %v3171_v38 = vpop.f32.mrb[139].mxu1 }
 0x43f   : > { %v3655_v40 = vmax.f32 %v3169_v30, 0.0  ;;  %v3172_v41 = vadd.f32 %v6115_v42, %v3171_v38  ;;  %v4800_v5 = vpop.f32.mrb[250].mxu0  ;;  %4937 = vmatprep.mubr.bf16.mxu1 %v3025_v33 }
 0x440   : > { %3785 = vst [vmem:[%s6127_s20 + $0x50] sm:$0xff] %v3657_v34  ;;  %v3658_v43 = vmax.f32 %v3180_v36, 0.0  ;;  %v2892_v44 = vpack.c.bf16 %v4800_v5, %v4799_v31  ;;  %v2803_v45 = vpop.f32.mrb[251].mxu0  ;;  %4938 = vmatmul.mubr.bf16.gmra.mrb[244].mxu1 %v3026_v39 }
 0x441   : > { %3783 = vst [vmem:[%s6127_s20 + $0x40] sm:$0xff] %v3655_v40  ;;  %v3656_v46 = vmax.f32 %v3172_v41, 0.0  ;;  %v2891_v62 = vpack.c.bf16 %v2803_v45, %v2800_v37 }
 0x442   : > { %3786 = vst [vmem:[%s6127_s20 + $0x58] sm:$0xff] %v3658_v43  ;;  %v2964_v47 = vadd.bf16 %v5984_v35, %v2892_v44 }
 0x443   : > { %3784 = vst [vmem:[%s6127_s20 + $0x48] sm:$0xff] %v3656_v46  ;;  %v2963_v48 = vadd.bf16 %v5984_v35, %v2891_v62  ;;  %v4835_v49 = vpop.f32.mrb[140].mxu1 }
 0x444   : > { %v3193_v50 = vadd.f32 %v4835_v49, %v6115_v42  ;;  %v3184_v51 = vpop.f32.mrb[141].mxu1  ;;  %v3028_v12 = vmax.bf16 %v5303_v19, %v2964_v47 }
 0x445   : > { %v3185_v52 = vadd.f32 %v6115_v42, %v3184_v51  ;;  %v4803_v53 = vpop.f32.mrb[252].mxu0  ;;  %v4836_v54 = vpop.f32.mrb[142].mxu1  ;;  %v3027_v55 = vmax.bf16 %v5303_v19, %v2963_v48 }
 0x446   : > { %v3661_v56 = vmax.f32 %v3193_v50, 0.0  ;;  %v3196_v57 = vadd.f32 %v4836_v54, %v6115_v42  ;;  %v2816_v58 = vpop.f32.mrb[253].mxu0  ;;  %v3187_v59 = vpop.f32.mrb[143].mxu1 }
 0x447   : > { %v3659_v60 = vmax.f32 %v3185_v52, 0.0  ;;  %v3188_v61 = vadd.f32 %v6115_v42, %v3187_v59  ;;  %v4804_v63 = vpop.f32.mrb[254].mxu0  ;;  %4941 = vmatprep.mubr.bf16.mxu1 %v3027_v55 }
 0x448   : > { %3789 = vst [vmem:[%s6127_s20 + $0x70] sm:$0xff] %v3661_v56  ;;  %v3662_v0 = vmax.f32 %v3196_v57, 0.0  ;;  %v2894_v1 = vpack.c.bf16 %v4804_v63, %v4803_v53  ;;  %v2819_v2 = vpop.f32.mrb[255].mxu0  ;;  %4942 = vmatmul.mubr.bf16.gmra.mrb[248].mxu1 %v3028_v12 }
 0x449   : > { %3787 = vst [vmem:[%s6127_s20 + $0x60] sm:$0xff] %v3659_v60  ;;  %v3660_v3 = vmax.f32 %v3188_v61, 0.0  ;;  %v2893_v4 = vpack.c.bf16 %v2819_v2, %v2816_v58 }
 0x44a   : > { %3790 = vst [vmem:[%s6127_s20 + $0x78] sm:$0xff] %v3662_v0  ;;  %v2966_v6 = vadd.bf16 %v5984_v35, %v2894_v1 }
 0x44b   : > { %3788 = vst [vmem:[%s6127_s20 + $0x68] sm:$0xff] %v3660_v3  ;;  %v2965_v7 = vadd.bf16 %v5984_v35, %v2893_v4  ;;  %v4839_v8 = vpop.f32.mrb[144].mxu1 }
 0x44c   : > { %v3209_v9 = vadd.f32 %v4839_v8, %v6115_v42  ;;  %v3200_v10 = vpop.f32.mrb[145].mxu1  ;;  %v3030_v18 = vmax.bf16 %v5303_v19, %v2966_v6 }
 0x44d   : > { %v3201_v11 = vadd.f32 %v6115_v42, %v3200_v10  ;;  %v4840_v13 = vpop.f32.mrb[146].mxu1  ;;  %v3029_v14 = vmax.bf16 %v5303_v19, %v2965_v7 }
 0x44e   : > { %v3665_v15 = vmax.f32 %v3209_v9, 0.0  ;;  %v3212_v16 = vadd.f32 %v4840_v13, %v6115_v42  ;;  %v3203_v17 = vpop.f32.mrb[147].mxu1 }
 0x44f   : > { %v3663_v20 = vmax.f32 %v3201_v11, 0.0  ;;  %v3204_v35 = vadd.f32 %v6115_v42, %v3203_v17  ;;  %4945 = vmatprep.mubr.bf16.mxu1 %v3029_v14 }
 0x450   : > { %3793 = vst [vmem:[%s6127_s20 + $0x90] sm:$0xff] %v3665_v15  ;;  %v3666_v21 = vmax.f32 %v3212_v16, 0.0  ;;  %4946 = vmatmul.mubr.bf16.gmra.mrb[252].mxu1 %v3030_v18 }
 0x451   : > { %3791 = vst [vmem:[%s6127_s20 + $0x80] sm:$0xff] %v3663_v20  ;;  %v3664_v22 = vmax.f32 %v3204_v35, 0.0 }
 0x452   : > { %3794 = vst [vmem:[%s6127_s20 + $0x98] sm:$0xff] %v3666_v21 }
 0x453   : > { %3792 = vst [vmem:[%s6127_s20 + $0x88] sm:$0xff] %v3664_v22  ;;  %v4843_v23 = vpop.f32.mrb[148].mxu1 }
 0x454   : > { %v3225_v24 = vadd.f32 %v4843_v23, %v6115_v42  ;;  %v3216_v25 = vpop.f32.mrb[149].mxu1 }
 0x455   : > { %v3217_v19 = vadd.f32 %v6115_v42, %v3216_v25  ;;  %v4844_v26 = vpop.f32.mrb[150].mxu1 }
 0x456   : > { %v3669_v27 = vmax.f32 %v3225_v24, 0.0  ;;  %v3228_v28 = vadd.f32 %v4844_v26, %v6115_v42  ;;  %v3219_v29 = vpop.f32.mrb[151].mxu1 }
 0x457   : > { %v3667_v30 = vmax.f32 %v3217_v19, 0.0  ;;  %v3220_v31 = vadd.f32 %v6115_v42, %v3219_v29 }
 0x458   : > { %3797 = vst [vmem:[%s6127_s20 + $0xb0] sm:$0xff] %v3669_v27  ;;  %v3670_v32 = vmax.f32 %v3228_v28, 0.0 }
 0x459   : > { %3795 = vst [vmem:[%s6127_s20 + $0xa0] sm:$0xff] %v3667_v30  ;;  %v3668_v33 = vmax.f32 %v3220_v31, 0.0 }
 0x45a   : > { %3798 = vst [vmem:[%s6127_s20 + $0xb8] sm:$0xff] %v3670_v32 }
 0x45b   : > { %3796 = vst [vmem:[%s6127_s20 + $0xa8] sm:$0xff] %v3668_v33  ;;  %v4847_v34 = vpop.f32.mrb[152].mxu1 }
 0x45c   : > { %v3241_v36 = vadd.f32 %v4847_v34, %v6115_v42  ;;  %v3232_v37 = vpop.f32.mrb[153].mxu1 }
 0x45d   : > { %v3233_v38 = vadd.f32 %v6115_v42, %v3232_v37  ;;  %v4848_v39 = vpop.f32.mrb[154].mxu1 }
 0x45e   : > { %v3673_v40 = vmax.f32 %v3241_v36, 0.0  ;;  %v3244_v41 = vadd.f32 %v4848_v39, %v6115_v42  ;;  %v3235_v5 = vpop.f32.mrb[155].mxu1 }
 0x45f   : > { %v3671_v43 = vmax.f32 %v3233_v38, 0.0  ;;  %v3236_v44 = vadd.f32 %v6115_v42, %v3235_v5 }
 0x460   : > { %3801 = vst [vmem:[%s6127_s20 + $0xd0] sm:$0xff] %v3673_v40  ;;  %v3674_v45 = vmax.f32 %v3244_v41, 0.0 }
 0x461   : > { %3799 = vst [vmem:[%s6127_s20 + $0xc0] sm:$0xff] %v3671_v43  ;;  %v3672_v46 = vmax.f32 %v3236_v44, 0.0 }
 0x462   : > { %3802 = vst [vmem:[%s6127_s20 + $0xd8] sm:$0xff] %v3674_v45 }
 0x463   : > { %3800 = vst [vmem:[%s6127_s20 + $0xc8] sm:$0xff] %v3672_v46  ;;  %v4851_v62 = vpop.f32.mrb[156].mxu1 }
 0x464   : > { %v3257_v47 = vadd.f32 %v4851_v62, %v6115_v42  ;;  %v3248_v48 = vpop.f32.mrb[157].mxu1 }
 0x465   : > { %v3249_v49 = vadd.f32 %v6115_v42, %v3248_v48  ;;  %v4852_v50 = vpop.f32.mrb[158].mxu1 }
 0x466   : > { %v3677_v51 = vmax.f32 %v3257_v47, 0.0  ;;  %v3260_v52 = vadd.f32 %v4852_v50, %v6115_v42  ;;  %v3251_v53 = vpop.f32.mrb[159].mxu1 }
 0x467   : > { %v3675_v54 = vmax.f32 %v3249_v49, 0.0  ;;  %v3252_v55 = vadd.f32 %v6115_v42, %v3251_v53 }
 0x468   : > { %3805 = vst [vmem:[%s6127_s20 + $0xf0] sm:$0xff] %v3677_v51  ;;  %v3678_v56 = vmax.f32 %v3260_v52, 0.0 }
 0x469   : > { %3803 = vst [vmem:[%s6127_s20 + $0xe0] sm:$0xff] %v3675_v54  ;;  %v3676_v57 = vmax.f32 %v3252_v55, 0.0 }
 0x46a   : > { %3806 = vst [vmem:[%s6127_s20 + $0xf8] sm:$0xff] %v3678_v56 }
 0x46b   : > { %3804 = vst [vmem:[%s6127_s20 + $0xe8] sm:$0xff] %v3676_v57  ;;  %v4855_v58 = vpop.f32.mrb[160].mxu1 }
 0x46c   : > { %v3273_v59 = vadd.f32 %v4855_v58, %v6115_v42  ;;  %v3264_v12 = vpop.f32.mrb[161].mxu1 }
 0x46d   : > { %v3265_v60 = vadd.f32 %v6115_v42, %v3264_v12  ;;  %v4856_v61 = vpop.f32.mrb[162].mxu1 }
 0x46e   : > { %v3681_v63 = vmax.f32 %v3273_v59, 0.0  ;;  %v3276_v0 = vadd.f32 %v4856_v61, %v6115_v42  ;;  %v3267_v1 = vpop.f32.mrb[163].mxu1 }
 0x46f   : > { %v3679_v2 = vmax.f32 %v3265_v60, 0.0  ;;  %v3268_v3 = vadd.f32 %v6115_v42, %v3267_v1 }
 0x470   : > { %3809 = vst [vmem:[%s6127_s20 + $0x110] sm:$0xff] %v3681_v63  ;;  %v3682_v4 = vmax.f32 %v3276_v0, 0.0 }
 0x471   : > { %3807 = vst [vmem:[%s6127_s20 + $0x100] sm:$0xff] %v3679_v2  ;;  %v3680_v6 = vmax.f32 %v3268_v3, 0.0 }
 0x472   : > { %3810 = vst [vmem:[%s6127_s20 + $0x118] sm:$0xff] %v3682_v4 }
 0x473   : > { %3808 = vst [vmem:[%s6127_s20 + $0x108] sm:$0xff] %v3680_v6  ;;  %v4859_v7 = vpop.f32.mrb[164].mxu1 }
 0x474   : > { %v3289_v8 = vadd.f32 %v4859_v7, %v6115_v42  ;;  %v3280_v9 = vpop.f32.mrb[165].mxu1 }
 0x475   : > { %v3281_v10 = vadd.f32 %v6115_v42, %v3280_v9  ;;  %v4860_v11 = vpop.f32.mrb[166].mxu1 }
 0x476   : > { %v3685_v13 = vmax.f32 %v3289_v8, 0.0  ;;  %v3292_v14 = vadd.f32 %v4860_v11, %v6115_v42  ;;  %v3283_v15 = vpop.f32.mrb[167].mxu1 }
 0x477   : > { %v3683_v16 = vmax.f32 %v3281_v10, 0.0  ;;  %v3284_v17 = vadd.f32 %v6115_v42, %v3283_v15 }
 0x478   : > { %3813 = vst [vmem:[%s6127_s20 + $0x130] sm:$0xff] %v3685_v13  ;;  %v3686_v18 = vmax.f32 %v3292_v14, 0.0 }
 0x479   : > { %3811 = vst [vmem:[%s6127_s20 + $0x120] sm:$0xff] %v3683_v16  ;;  %v3684_v20 = vmax.f32 %v3284_v17, 0.0 }
 0x47a   : > { %3814 = vst [vmem:[%s6127_s20 + $0x138] sm:$0xff] %v3686_v18 }
 0x47b   : > { %3812 = vst [vmem:[%s6127_s20 + $0x128] sm:$0xff] %v3684_v20  ;;  %v4863_v35 = vpop.f32.mrb[168].mxu1 }
 0x47c   : > { %v3305_v21 = vadd.f32 %v4863_v35, %v6115_v42  ;;  %v3296_v22 = vpop.f32.mrb[169].mxu1 }
 0x47d   : > { %v3297_v23 = vadd.f32 %v6115_v42, %v3296_v22  ;;  %v4864_v24 = vpop.f32.mrb[170].mxu1 }
 0x47e   : > { %v3689_v25 = vmax.f32 %v3305_v21, 0.0  ;;  %v3308_v19 = vadd.f32 %v4864_v24, %v6115_v42  ;;  %v3299_v26 = vpop.f32.mrb[171].mxu1 }
 0x47f   : > { %v3687_v27 = vmax.f32 %v3297_v23, 0.0  ;;  %v3300_v28 = vadd.f32 %v6115_v42, %v3299_v26 }
 0x480   : > { %3817 = vst [vmem:[%s6127_s20 + $0x150] sm:$0xff] %v3689_v25  ;;  %v3690_v29 = vmax.f32 %v3308_v19, 0.0 }
 0x481   : > { %3815 = vst [vmem:[%s6127_s20 + $0x140] sm:$0xff] %v3687_v27  ;;  %v3688_v30 = vmax.f32 %v3300_v28, 0.0 }
 0x482   : > { %3818 = vst [vmem:[%s6127_s20 + $0x158] sm:$0xff] %v3690_v29 }
 0x483   : > { %3816 = vst [vmem:[%s6127_s20 + $0x148] sm:$0xff] %v3688_v30  ;;  %v4867_v31 = vpop.f32.mrb[172].mxu1 }
 0x484   : > { %v3321_v32 = vadd.f32 %v4867_v31, %v6115_v42  ;;  %v3312_v33 = vpop.f32.mrb[173].mxu1 }
 0x485   : > { %v3313_v34 = vadd.f32 %v6115_v42, %v3312_v33  ;;  %v4868_v36 = vpop.f32.mrb[174].mxu1 }
 0x486   : > { %v3693_v37 = vmax.f32 %v3321_v32, 0.0  ;;  %v3324_v38 = vadd.f32 %v4868_v36, %v6115_v42  ;;  %v3315_v39 = vpop.f32.mrb[175].mxu1 }
 0x487   : > { %v3691_v40 = vmax.f32 %v3313_v34, 0.0  ;;  %v3316_v41 = vadd.f32 %v6115_v42, %v3315_v39 }
 0x488   : > { %3821 = vst [vmem:[%s6127_s20 + $0x170] sm:$0xff] %v3693_v37  ;;  %v3694_v5 = vmax.f32 %v3324_v38, 0.0 }
 0x489   : > { %3819 = vst [vmem:[%s6127_s20 + $0x160] sm:$0xff] %v3691_v40  ;;  %v3692_v43 = vmax.f32 %v3316_v41, 0.0 }
 0x48a   : > { %3822 = vst [vmem:[%s6127_s20 + $0x178] sm:$0xff] %v3694_v5 }
 0x48b   : > { %3820 = vst [vmem:[%s6127_s20 + $0x168] sm:$0xff] %v3692_v43  ;;  %v4871_v44 = vpop.f32.mrb[176].mxu1 }
 0x48c   : > { %v3337_v45 = vadd.f32 %v4871_v44, %v6115_v42  ;;  %v3328_v46 = vpop.f32.mrb[177].mxu1 }
 0x48d   : > { %v3329_v62 = vadd.f32 %v6115_v42, %v3328_v46  ;;  %v4872_v47 = vpop.f32.mrb[178].mxu1 }
 0x48e   : > { %v3697_v48 = vmax.f32 %v3337_v45, 0.0  ;;  %v3340_v49 = vadd.f32 %v4872_v47, %v6115_v42  ;;  %v3331_v50 = vpop.f32.mrb[179].mxu1 }
 0x48f   : > { %v3695_v51 = vmax.f32 %v3329_v62, 0.0  ;;  %v3332_v52 = vadd.f32 %v6115_v42, %v3331_v50 }
 0x490   : > { %3825 = vst [vmem:[%s6127_s20 + $0x190] sm:$0xff] %v3697_v48  ;;  %v3698_v53 = vmax.f32 %v3340_v49, 0.0 }
 0x491   : > { %3823 = vst [vmem:[%s6127_s20 + $0x180] sm:$0xff] %v3695_v51  ;;  %v3696_v54 = vmax.f32 %v3332_v52, 0.0 }
 0x492   : > { %3826 = vst [vmem:[%s6127_s20 + $0x198] sm:$0xff] %v3698_v53 }
 0x493   : > { %3824 = vst [vmem:[%s6127_s20 + $0x188] sm:$0xff] %v3696_v54  ;;  %v4875_v55 = vpop.f32.mrb[180].mxu1 }
 0x494   : > { %v3353_v56 = vadd.f32 %v4875_v55, %v6115_v42  ;;  %v3344_v57 = vpop.f32.mrb[181].mxu1 }
 0x495   : > { %v3345_v58 = vadd.f32 %v6115_v42, %v3344_v57  ;;  %v4876_v59 = vpop.f32.mrb[182].mxu1 }
 0x496   : > { %v3701_v12 = vmax.f32 %v3353_v56, 0.0  ;;  %v3356_v60 = vadd.f32 %v4876_v59, %v6115_v42  ;;  %v3347_v61 = vpop.f32.mrb[183].mxu1 }
 0x497   : > { %v3699_v63 = vmax.f32 %v3345_v58, 0.0  ;;  %v3348_v0 = vadd.f32 %v6115_v42, %v3347_v61 }
 0x498   : > { %3829 = vst [vmem:[%s6127_s20 + $0x1b0] sm:$0xff] %v3701_v12  ;;  %v3702_v1 = vmax.f32 %v3356_v60, 0.0 }
 0x499   : > { %3827 = vst [vmem:[%s6127_s20 + $0x1a0] sm:$0xff] %v3699_v63  ;;  %v3700_v2 = vmax.f32 %v3348_v0, 0.0 }
 0x49a   : > { %3830 = vst [vmem:[%s6127_s20 + $0x1b8] sm:$0xff] %v3702_v1 }
 0x49b   : > { %3828 = vst [vmem:[%s6127_s20 + $0x1a8] sm:$0xff] %v3700_v2  ;;  %v4879_v3 = vpop.f32.mrb[184].mxu1 }
 0x49c   : > { %v3369_v4 = vadd.f32 %v4879_v3, %v6115_v42  ;;  %v3360_v6 = vpop.f32.mrb[185].mxu1 }
 0x49d   : > { %v3361_v7 = vadd.f32 %v6115_v42, %v3360_v6  ;;  %v4880_v8 = vpop.f32.mrb[186].mxu1 }
 0x49e   : > { %v3705_v9 = vmax.f32 %v3369_v4, 0.0  ;;  %v3372_v10 = vadd.f32 %v4880_v8, %v6115_v42  ;;  %v3363_v11 = vpop.f32.mrb[187].mxu1 }
 0x49f   : > { %v3703_v13 = vmax.f32 %v3361_v7, 0.0  ;;  %v3364_v14 = vadd.f32 %v6115_v42, %v3363_v11 }
 0x4a0   : > { %3833 = vst [vmem:[%s6127_s20 + $0x1d0] sm:$0xff] %v3705_v9  ;;  %v3706_v15 = vmax.f32 %v3372_v10, 0.0 }
 0x4a1   : > { %3831 = vst [vmem:[%s6127_s20 + $0x1c0] sm:$0xff] %v3703_v13  ;;  %v3704_v16 = vmax.f32 %v3364_v14, 0.0 }
 0x4a2   : > { %3834 = vst [vmem:[%s6127_s20 + $0x1d8] sm:$0xff] %v3706_v15 }
 0x4a3   : > { %3832 = vst [vmem:[%s6127_s20 + $0x1c8] sm:$0xff] %v3704_v16  ;;  %v4883_v17 = vpop.f32.mrb[188].mxu1 }
 0x4a4   : > { %v3385_v18 = vadd.f32 %v4883_v17, %v6115_v42  ;;  %v3376_v20 = vpop.f32.mrb[189].mxu1 }
 0x4a5   : > { %v3377_v35 = vadd.f32 %v6115_v42, %v3376_v20  ;;  %v4884_v21 = vpop.f32.mrb[190].mxu1 }
 0x4a6   : > { %v3709_v22 = vmax.f32 %v3385_v18, 0.0  ;;  %v3388_v23 = vadd.f32 %v4884_v21, %v6115_v42  ;;  %v3379_v24 = vpop.f32.mrb[191].mxu1 }
 0x4a7   : > { %v3707_v25 = vmax.f32 %v3377_v35, 0.0  ;;  %v3380_v19 = vadd.f32 %v6115_v42, %v3379_v24 }
 0x4a8   : > { %3837 = vst [vmem:[%s6127_s20 + $0x1f0] sm:$0xff] %v3709_v22  ;;  %v3710_v26 = vmax.f32 %v3388_v23, 0.0 }
 0x4a9   : > { %3835 = vst [vmem:[%s6127_s20 + $0x1e0] sm:$0xff] %v3707_v25  ;;  %v3708_v27 = vmax.f32 %v3380_v19, 0.0 }
 0x4aa   : > { %3838 = vst [vmem:[%s6127_s20 + $0x1f8] sm:$0xff] %v3710_v26 }
 0x4ab   : > { %3836 = vst [vmem:[%s6127_s20 + $0x1e8] sm:$0xff] %v3708_v27  ;;  %v4887_v28 = vpop.f32.mrb[192].mxu1 }
 0x4ac   : > { %v3401_v29 = vadd.f32 %v4887_v28, %v6115_v42  ;;  %v3392_v30 = vpop.f32.mrb[193].mxu1 }
 0x4ad   : > { %v3393_v31 = vadd.f32 %v6115_v42, %v3392_v30  ;;  %v4888_v32 = vpop.f32.mrb[194].mxu1 }
 0x4ae   : > { %v3713_v33 = vmax.f32 %v3401_v29, 0.0  ;;  %v3404_v34 = vadd.f32 %v4888_v32, %v6115_v42  ;;  %v3395_v36 = vpop.f32.mrb[195].mxu1 }
 0x4af   : > { %v3711_v37 = vmax.f32 %v3393_v31, 0.0  ;;  %v3396_v38 = vadd.f32 %v6115_v42, %v3395_v36 }
 0x4b0   : > { %3841 = vst [vmem:[%s6127_s20 + $0x210] sm:$0xff] %v3713_v33  ;;  %v3714_v39 = vmax.f32 %v3404_v34, 0.0 }
 0x4b1   : > { %3839 = vst [vmem:[%s6127_s20 + $0x200] sm:$0xff] %v3711_v37  ;;  %v3712_v40 = vmax.f32 %v3396_v38, 0.0 }
 0x4b2   : > { %3842 = vst [vmem:[%s6127_s20 + $0x218] sm:$0xff] %v3714_v39 }
 0x4b3   : > { %3840 = vst [vmem:[%s6127_s20 + $0x208] sm:$0xff] %v3712_v40  ;;  %v4891_v41 = vpop.f32.mrb[196].mxu1 }
 0x4b4   : > { %v3417_v5 = vadd.f32 %v4891_v41, %v6115_v42  ;;  %v3408_v43 = vpop.f32.mrb[197].mxu1 }
 0x4b5   : > { %v3409_v44 = vadd.f32 %v6115_v42, %v3408_v43  ;;  %v4892_v45 = vpop.f32.mrb[198].mxu1 }
 0x4b6   : > { %v3717_v46 = vmax.f32 %v3417_v5, 0.0  ;;  %v3420_v62 = vadd.f32 %v4892_v45, %v6115_v42  ;;  %v3411_v47 = vpop.f32.mrb[199].mxu1 }
 0x4b7   : > { %v3715_v48 = vmax.f32 %v3409_v44, 0.0  ;;  %v3412_v49 = vadd.f32 %v6115_v42, %v3411_v47 }
 0x4b8   : > { %3845 = vst [vmem:[%s6127_s20 + $0x230] sm:$0xff] %v3717_v46  ;;  %v3718_v50 = vmax.f32 %v3420_v62, 0.0 }
 0x4b9   : > { %3843 = vst [vmem:[%s6127_s20 + $0x220] sm:$0xff] %v3715_v48  ;;  %v3716_v51 = vmax.f32 %v3412_v49, 0.0 }
 0x4ba   : > { %3846 = vst [vmem:[%s6127_s20 + $0x238] sm:$0xff] %v3718_v50 }
 0x4bb   : > { %3844 = vst [vmem:[%s6127_s20 + $0x228] sm:$0xff] %v3716_v51  ;;  %v4895_v52 = vpop.f32.mrb[200].mxu1 }
 0x4bc   : > { %v3433_v53 = vadd.f32 %v4895_v52, %v6115_v42  ;;  %v3424_v54 = vpop.f32.mrb[201].mxu1 }
 0x4bd   : > { %v3425_v55 = vadd.f32 %v6115_v42, %v3424_v54  ;;  %v4896_v56 = vpop.f32.mrb[202].mxu1 }
 0x4be   : > { %v3721_v57 = vmax.f32 %v3433_v53, 0.0  ;;  %v3436_v58 = vadd.f32 %v4896_v56, %v6115_v42  ;;  %v3427_v59 = vpop.f32.mrb[203].mxu1 }
 0x4bf   : > { %v3719_v12 = vmax.f32 %v3425_v55, 0.0  ;;  %v3428_v60 = vadd.f32 %v6115_v42, %v3427_v59 }
 0x4c0   : > { %3849 = vst [vmem:[%s6127_s20 + $0x250] sm:$0xff] %v3721_v57  ;;  %v3722_v61 = vmax.f32 %v3436_v58, 0.0 }
 0x4c1   : > { %3847 = vst [vmem:[%s6127_s20 + $0x240] sm:$0xff] %v3719_v12  ;;  %v3720_v63 = vmax.f32 %v3428_v60, 0.0 }
 0x4c2   : > { %3850 = vst [vmem:[%s6127_s20 + $0x258] sm:$0xff] %v3722_v61 }
 0x4c3   : > { %3848 = vst [vmem:[%s6127_s20 + $0x248] sm:$0xff] %v3720_v63  ;;  %v4899_v0 = vpop.f32.mrb[204].mxu1 }
 0x4c4   : > { %v3449_v1 = vadd.f32 %v4899_v0, %v6115_v42  ;;  %v3440_v2 = vpop.f32.mrb[205].mxu1 }
 0x4c5   : > { %v3441_v3 = vadd.f32 %v6115_v42, %v3440_v2  ;;  %v4900_v4 = vpop.f32.mrb[206].mxu1 }
 0x4c6   : > { %v3725_v6 = vmax.f32 %v3449_v1, 0.0  ;;  %v3452_v7 = vadd.f32 %v4900_v4, %v6115_v42  ;;  %v3443_v8 = vpop.f32.mrb[207].mxu1 }
 0x4c7   : > { %v3723_v9 = vmax.f32 %v3441_v3, 0.0  ;;  %v3444_v10 = vadd.f32 %v6115_v42, %v3443_v8 }
 0x4c8   : > { %3853 = vst [vmem:[%s6127_s20 + $0x270] sm:$0xff] %v3725_v6  ;;  %v3726_v11 = vmax.f32 %v3452_v7, 0.0 }
 0x4c9   : > { %3851 = vst [vmem:[%s6127_s20 + $0x260] sm:$0xff] %v3723_v9  ;;  %v3724_v13 = vmax.f32 %v3444_v10, 0.0 }
 0x4ca   : > { %3854 = vst [vmem:[%s6127_s20 + $0x278] sm:$0xff] %v3726_v11 }
 0x4cb   : > { %3852 = vst [vmem:[%s6127_s20 + $0x268] sm:$0xff] %v3724_v13  ;;  %v4903_v14 = vpop.f32.mrb[208].mxu1 }
 0x4cc   : > { %v3465_v15 = vadd.f32 %v4903_v14, %v6115_v42  ;;  %v3456_v16 = vpop.f32.mrb[209].mxu1 }
 0x4cd   : > { %v3457_v17 = vadd.f32 %v6115_v42, %v3456_v16  ;;  %v4904_v18 = vpop.f32.mrb[210].mxu1 }
 0x4ce   : > { %v3729_v20 = vmax.f32 %v3465_v15, 0.0  ;;  %v3468_v35 = vadd.f32 %v4904_v18, %v6115_v42  ;;  %v3459_v21 = vpop.f32.mrb[211].mxu1 }
 0x4cf   : > { %v3727_v22 = vmax.f32 %v3457_v17, 0.0  ;;  %v3460_v23 = vadd.f32 %v6115_v42, %v3459_v21 }
 0x4d0   : > { %3857 = vst [vmem:[%s6127_s20 + $0x290] sm:$0xff] %v3729_v20  ;;  %v3730_v24 = vmax.f32 %v3468_v35, 0.0 }
 0x4d1   : > { %3855 = vst [vmem:[%s6127_s20 + $0x280] sm:$0xff] %v3727_v22  ;;  %v3728_v25 = vmax.f32 %v3460_v23, 0.0 }
 0x4d2   : > { %3858 = vst [vmem:[%s6127_s20 + $0x298] sm:$0xff] %v3730_v24 }
 0x4d3   : > { %3856 = vst [vmem:[%s6127_s20 + $0x288] sm:$0xff] %v3728_v25  ;;  %v4907_v19 = vpop.f32.mrb[212].mxu1 }
 0x4d4   : > { %v3481_v26 = vadd.f32 %v4907_v19, %v6115_v42  ;;  %v3472_v27 = vpop.f32.mrb[213].mxu1 }
 0x4d5   : > { %v3473_v28 = vadd.f32 %v6115_v42, %v3472_v27  ;;  %v4908_v29 = vpop.f32.mrb[214].mxu1 }
 0x4d6   : > { %v3733_v30 = vmax.f32 %v3481_v26, 0.0  ;;  %v3484_v31 = vadd.f32 %v4908_v29, %v6115_v42  ;;  %v3475_v32 = vpop.f32.mrb[215].mxu1 }
 0x4d7   : > { %v3731_v33 = vmax.f32 %v3473_v28, 0.0  ;;  %v3476_v34 = vadd.f32 %v6115_v42, %v3475_v32 }
 0x4d8   : > { %3861 = vst [vmem:[%s6127_s20 + $0x2b0] sm:$0xff] %v3733_v30  ;;  %v3734_v36 = vmax.f32 %v3484_v31, 0.0 }
 0x4d9   : > { %3859 = vst [vmem:[%s6127_s20 + $0x2a0] sm:$0xff] %v3731_v33  ;;  %v3732_v37 = vmax.f32 %v3476_v34, 0.0 }
 0x4da   : > { %3862 = vst [vmem:[%s6127_s20 + $0x2b8] sm:$0xff] %v3734_v36 }
 0x4db   : > { %3860 = vst [vmem:[%s6127_s20 + $0x2a8] sm:$0xff] %v3732_v37  ;;  %v4911_v38 = vpop.f32.mrb[216].mxu1 }
 0x4dc   : > { %v3497_v39 = vadd.f32 %v4911_v38, %v6115_v42  ;;  %v3488_v40 = vpop.f32.mrb[217].mxu1 }
 0x4dd   : > { %v3489_v41 = vadd.f32 %v6115_v42, %v3488_v40  ;;  %v4912_v5 = vpop.f32.mrb[218].mxu1 }
 0x4de   : > { %v3737_v43 = vmax.f32 %v3497_v39, 0.0  ;;  %v3500_v44 = vadd.f32 %v4912_v5, %v6115_v42  ;;  %v3491_v45 = vpop.f32.mrb[219].mxu1 }
 0x4df   : > { %v3735_v46 = vmax.f32 %v3489_v41, 0.0  ;;  %v3492_v62 = vadd.f32 %v6115_v42, %v3491_v45 }
 0x4e0   : > { %3865 = vst [vmem:[%s6127_s20 + $0x2d0] sm:$0xff] %v3737_v43  ;;  %v3738_v47 = vmax.f32 %v3500_v44, 0.0 }
 0x4e1   : > { %3863 = vst [vmem:[%s6127_s20 + $0x2c0] sm:$0xff] %v3735_v46  ;;  %v3736_v48 = vmax.f32 %v3492_v62, 0.0 }
 0x4e2   : > { %3866 = vst [vmem:[%s6127_s20 + $0x2d8] sm:$0xff] %v3738_v47 }
 0x4e3   : > { %3864 = vst [vmem:[%s6127_s20 + $0x2c8] sm:$0xff] %v3736_v48  ;;  %v4915_v49 = vpop.f32.mrb[220].mxu1 }
 0x4e4   : > { %v3513_v50 = vadd.f32 %v4915_v49, %v6115_v42  ;;  %v3504_v51 = vpop.f32.mrb[221].mxu1 }
 0x4e5   : > { %v3505_v52 = vadd.f32 %v6115_v42, %v3504_v51  ;;  %v4916_v53 = vpop.f32.mrb[222].mxu1 }
 0x4e6   : > { %v3741_v54 = vmax.f32 %v3513_v50, 0.0  ;;  %v3516_v55 = vadd.f32 %v4916_v53, %v6115_v42  ;;  %v3507_v56 = vpop.f32.mrb[223].mxu1 }
 0x4e7   : > { %v3739_v57 = vmax.f32 %v3505_v52, 0.0  ;;  %v3508_v58 = vadd.f32 %v6115_v42, %v3507_v56 }
 0x4e8   : > { %3869 = vst [vmem:[%s6127_s20 + $0x2f0] sm:$0xff] %v3741_v54  ;;  %v3742_v59 = vmax.f32 %v3516_v55, 0.0  ;;  %v5075_v55 = vld [vmem:[%s6446_s8] ss:$0 sm:$0xff] }
 0x4e9   : > { %3867 = vst [vmem:[%s6127_s20 + $0x2e0] sm:$0xff] %v3739_v57  ;;  %v3740_v12 = vmax.f32 %v3508_v58, 0.0 }
 0x4ea   : > { %3870 = vst [vmem:[%s6127_s20 + $0x2f8] sm:$0xff] %v3742_v59 }
 0x4eb   : > { %3868 = vst [vmem:[%s6127_s20 + $0x2e8] sm:$0xff] %v3740_v12  ;;  %v4919_v60 = vpop.f32.mrb[224].mxu1 }
 0x4ec   : > { %v3529_v61 = vadd.f32 %v4919_v60, %v6115_v42  ;;  %v3520_v63 = vpop.f32.mrb[225].mxu1 }
 0x4ed   : > { %v3521_v0 = vadd.f32 %v6115_v42, %v3520_v63  ;;  %v4920_v1 = vpop.f32.mrb[226].mxu1 }
 0x4ee   : > { %v3745_v2 = vmax.f32 %v3529_v61, 0.0  ;;  %v3532_v3 = vadd.f32 %v4920_v1, %v6115_v42  ;;  %v3523_v4 = vpop.f32.mrb[227].mxu1 }
 0x4ef   : > { %v3743_v6 = vmax.f32 %v3521_v0, 0.0  ;;  %v3524_v7 = vadd.f32 %v6115_v42, %v3523_v4 }
 0x4f0   : > { %3873 = vst [vmem:[%s6127_s20 + $0x310] sm:$0xff] %v3745_v2  ;;  %v3746_v8 = vmax.f32 %v3532_v3, 0.0 }
 0x4f1   : > { %3871 = vst [vmem:[%s6127_s20 + $0x300] sm:$0xff] %v3743_v6  ;;  %v3744_v9 = vmax.f32 %v3524_v7, 0.0 }
 0x4f2   : > { %3874 = vst [vmem:[%s6127_s20 + $0x318] sm:$0xff] %v3746_v8 }
 0x4f3   : > { %3872 = vst [vmem:[%s6127_s20 + $0x308] sm:$0xff] %v3744_v9  ;;  %v4923_v10 = vpop.f32.mrb[228].mxu1 }
 0x4f4   : > { %v3545_v11 = vadd.f32 %v4923_v10, %v6115_v42  ;;  %v3536_v13 = vpop.f32.mrb[229].mxu1 }
 0x4f5   : > { %v3537_v14 = vadd.f32 %v6115_v42, %v3536_v13  ;;  %v4924_v15 = vpop.f32.mrb[230].mxu1 }
 0x4f6   : > { %v3749_v16 = vmax.f32 %v3545_v11, 0.0  ;;  %v3548_v17 = vadd.f32 %v4924_v15, %v6115_v42  ;;  %v3539_v18 = vpop.f32.mrb[231].mxu1 }
 0x4f7   : > { %v3747_v20 = vmax.f32 %v3537_v14, 0.0  ;;  %v3540_v35 = vadd.f32 %v6115_v42, %v3539_v18 }
 0x4f8   : > { %3877 = vst [vmem:[%s6127_s20 + $0x330] sm:$0xff] %v3749_v16  ;;  %v3750_v21 = vmax.f32 %v3548_v17, 0.0 }
 0x4f9   : > { %3875 = vst [vmem:[%s6127_s20 + $0x320] sm:$0xff] %v3747_v20  ;;  %v3748_v22 = vmax.f32 %v3540_v35, 0.0 }
 0x4fa   : > { %3878 = vst [vmem:[%s6127_s20 + $0x338] sm:$0xff] %v3750_v21 }
 0x4fb   : > { %3876 = vst [vmem:[%s6127_s20 + $0x328] sm:$0xff] %v3748_v22  ;;  %v4927_v23 = vpop.f32.mrb[232].mxu1 }
 0x4fc   : > { %v3561_v24 = vadd.f32 %v4927_v23, %v6115_v42  ;;  %v3552_v25 = vpop.f32.mrb[233].mxu1 }
 0x4fd   : > { %v3553_v19 = vadd.f32 %v6115_v42, %v3552_v25  ;;  %v4928_v26 = vpop.f32.mrb[234].mxu1 }
 0x4fe   : > { %v3753_v27 = vmax.f32 %v3561_v24, 0.0  ;;  %v3564_v28 = vadd.f32 %v4928_v26, %v6115_v42  ;;  %v3555_v29 = vpop.f32.mrb[235].mxu1 }
 0x4ff   : > { %v3751_v30 = vmax.f32 %v3553_v19, 0.0  ;;  %v3556_v31 = vadd.f32 %v6115_v42, %v3555_v29 }
 0x500   : > { %3881 = vst [vmem:[%s6127_s20 + $0x350] sm:$0xff] %v3753_v27  ;;  %v3754_v32 = vmax.f32 %v3564_v28, 0.0 }
 0x501   : > { %3879 = vst [vmem:[%s6127_s20 + $0x340] sm:$0xff] %v3751_v30  ;;  %v3752_v33 = vmax.f32 %v3556_v31, 0.0 }
 0x502   : > { %3882 = vst [vmem:[%s6127_s20 + $0x358] sm:$0xff] %v3754_v32 }
 0x503   : > { %3880 = vst [vmem:[%s6127_s20 + $0x348] sm:$0xff] %v3752_v33  ;;  %v4931_v34 = vpop.f32.mrb[236].mxu1 }
 0x504   : > { %v3577_v36 = vadd.f32 %v4931_v34, %v6115_v42  ;;  %v3568_v37 = vpop.f32.mrb[237].mxu1 }
 0x505   : > { %v3569_v38 = vadd.f32 %v6115_v42, %v3568_v37  ;;  %v4932_v39 = vpop.f32.mrb[238].mxu1 }
 0x506   : > { %v3757_v40 = vmax.f32 %v3577_v36, 0.0  ;;  %v3580_v41 = vadd.f32 %v4932_v39, %v6115_v42  ;;  %v3571_v5 = vpop.f32.mrb[239].mxu1 }
 0x507   : > { %v3755_v43 = vmax.f32 %v3569_v38, 0.0  ;;  %v3572_v44 = vadd.f32 %v6115_v42, %v3571_v5 }
 0x508   : > { %3885 = vst [vmem:[%s6127_s20 + $0x370] sm:$0xff] %v3757_v40  ;;  %v3758_v45 = vmax.f32 %v3580_v41, 0.0 }
 0x509   : > { %3883 = vst [vmem:[%s6127_s20 + $0x360] sm:$0xff] %v3755_v43  ;;  %v3756_v46 = vmax.f32 %v3572_v44, 0.0 }
 0x50a   : > { %3886 = vst [vmem:[%s6127_s20 + $0x378] sm:$0xff] %v3758_v45 }
 0x50b   : > { %3884 = vst [vmem:[%s6127_s20 + $0x368] sm:$0xff] %v3756_v46  ;;  %v4935_v62 = vpop.f32.mrb[240].mxu1 }
 0x50c   : > { %v3593_v47 = vadd.f32 %v4935_v62, %v6115_v42  ;;  %v3584_v48 = vpop.f32.mrb[241].mxu1 }
 0x50d   : > { %v3585_v49 = vadd.f32 %v6115_v42, %v3584_v48  ;;  %v4936_v50 = vpop.f32.mrb[242].mxu1 }
 0x50e   : > { %v3761_v51 = vmax.f32 %v3593_v47, 0.0  ;;  %v3596_v52 = vadd.f32 %v4936_v50, %v6115_v42  ;;  %v3587_v53 = vpop.f32.mrb[243].mxu1 }
 0x50f   : > { %v3759_v54 = vmax.f32 %v3585_v49, 0.0  ;;  %v3588_v56 = vadd.f32 %v5075_v55, %v3587_v53 }
 0x510   : > { %3889 = vst [vmem:[%s6127_s20 + $0x390] sm:$0xff] %v3761_v51  ;;  %v3762_v57 = vmax.f32 %v3596_v52, 0.0 }
 0x511   : > { %3887 = vst [vmem:[%s6127_s20 + $0x380] sm:$0xff] %v3759_v54  ;;  %v3760_v58 = vmax.f32 %v3588_v56, 0.0 }
 0x512   : > { %3890 = vst [vmem:[%s6127_s20 + $0x398] sm:$0xff] %v3762_v57 }
 0x513   : > { %3888 = vst [vmem:[%s6127_s20 + $0x388] sm:$0xff] %v3760_v58  ;;  %v4939_v59 = vpop.f32.mrb[244].mxu1 }
 0x514   : > { %v3609_v12 = vadd.f32 %v5075_v55, %v4939_v59  ;;  %v3600_v42 = vpop.f32.mrb[245].mxu1 }
 0x515   : > { %v3601_v60 = vadd.f32 %v5075_v55, %v3600_v42  ;;  %v4940_v61 = vpop.f32.mrb[246].mxu1 }
 0x516   : > { %v3765_v63 = vmax.f32 %v3609_v12, 0.0  ;;  %v3612_v0 = vadd.f32 %v5075_v55, %v4940_v61  ;;  %v3603_v1 = vpop.f32.mrb[247].mxu1 }
 0x517   : > { %v3763_v2 = vmax.f32 %v3601_v60, 0.0  ;;  %v3604_v3 = vadd.f32 %v5075_v55, %v3603_v1 }
 0x518   : > { %3893 = vst [vmem:[%s6127_s20 + $0x3b0] sm:$0xff] %v3765_v63  ;;  %v3766_v4 = vmax.f32 %v3612_v0, 0.0 }
 0x519   : > { %3891 = vst [vmem:[%s6127_s20 + $0x3a0] sm:$0xff] %v3763_v2  ;;  %v3764_v6 = vmax.f32 %v3604_v3, 0.0 }
 0x51a   : > { %3894 = vst [vmem:[%s6127_s20 + $0x3b8] sm:$0xff] %v3766_v4 }
 0x51b   : > { %3892 = vst [vmem:[%s6127_s20 + $0x3a8] sm:$0xff] %v3764_v6  ;;  %v4943_v7 = vpop.f32.mrb[248].mxu1 }
 0x51c   : > { %v3625_v8 = vadd.f32 %v5075_v55, %v4943_v7  ;;  %v3616_v9 = vpop.f32.mrb[249].mxu1 }
 0x51d   : > { %v3617_v10 = vadd.f32 %v5075_v55, %v3616_v9  ;;  %v4944_v11 = vpop.f32.mrb[250].mxu1 }
 0x51e   : > { %v3769_v13 = vmax.f32 %v3625_v8, 0.0  ;;  %v3628_v14 = vadd.f32 %v5075_v55, %v4944_v11  ;;  %v3619_v15 = vpop.f32.mrb[251].mxu1 }
 0x51f   : > { %v3767_v16 = vmax.f32 %v3617_v10, 0.0  ;;  %v3620_v17 = vadd.f32 %v5075_v55, %v3619_v15 }
 0x520   : > { %3897 = vst [vmem:[%s6127_s20 + $0x3d0] sm:$0xff] %v3769_v13  ;;  %v3770_v18 = vmax.f32 %v3628_v14, 0.0 }
 0x521   : > { %3895 = vst [vmem:[%s6127_s20 + $0x3c0] sm:$0xff] %v3767_v16  ;;  %v3768_v20 = vmax.f32 %v3620_v17, 0.0 }
 0x522   : > { %3898 = vst [vmem:[%s6127_s20 + $0x3d8] sm:$0xff] %v3770_v18 }
 0x523   : > { %3896 = vst [vmem:[%s6127_s20 + $0x3c8] sm:$0xff] %v3768_v20  ;;  %v4947_v35 = vpop.f32.mrb[252].mxu1 }
 0x524   : > { %v3641_v21 = vadd.f32 %v5075_v55, %v4947_v35  ;;  %v3632_v22 = vpop.f32.mrb[253].mxu1 }
 0x525   : > { %v3633_v23 = vadd.f32 %v5075_v55, %v3632_v22  ;;  %v4948_v24 = vpop.f32.mrb[254].mxu1 }
 0x526   : > { %v3773_v25 = vmax.f32 %v3641_v21, 0.0  ;;  %v3644_v19 = vadd.f32 %v5075_v55, %v4948_v24  ;;  %v3635_v26 = vpop.f32.mrb[255].mxu1 }
 0x527   : > { %v3771_v27 = vmax.f32 %v3633_v23, 0.0  ;;  %v3636_v28 = vadd.f32 %v5075_v55, %v3635_v26 }
 0x528   : > { %3901 = vst [vmem:[%s6127_s20 + $0x3f0] sm:$0xff] %v3773_v25  ;;  %v3774_v29 = vmax.f32 %v3644_v19, 0.0 }
 0x529   : > { %3899 = vst [vmem:[%s6127_s20 + $0x3e0] sm:$0xff] %v3771_v27  ;;  %v3772_v30 = vmax.f32 %v3636_v28, 0.0 }
 0x52a   : > { %3902 = vst [vmem:[%s6127_s20 + $0x3f8] sm:$0xff] %v3774_v29 }
 0x52b   : > { %3900 = vst [vmem:[%s6127_s20 + $0x3e8] sm:$0xff] %v3772_v30 }
 0x52c   : > { %5231 = shalt.err (!%p5228_p13)
}
 0x52d   : > { %s5232_s23 = scalar_lea.hbm %s6389_s21, 16384  ;;  %s5236_s30 = scalar_lea.hbm %s6471_s17, 32768 }
 0x52e   : > { %p5233_p9 = scmp.ne.s32.totalorder %s6389_s21, %s5232_s23  ;;  %p5237_p4 = scmp.lt.u32.totalorder %s6389_s21, %s6471_s17 }
 0x52f   : > { %p5238_p8 = scmp.lt.u32.totalorder %s5236_s30, %s5232_s23  ;;  %p5240_p3 = scmp.lt.u32.totalorder %s5232_s23, %s6389_s21 }
 0x530   : > { %p5234_p0 = pnand %p5233_p9, %p5528_p10 }
 0x531   : > { %p5239_p6 = por %p5238_p8, %p5237_p4 }
 0x532   : > { %p5235_p11 = pneg %p5234_p0 }
 0x533   : > { %p5241_p5 = por %p5240_p3, %p5239_p6 }
 0x535   : > { %p5242_p7 = pnand %p5241_p5, %p5235_p11 }
 0x537   : > { %5245 = shalt.err (!%p5242_p7)
}
 0x538   : > { %s5305_s15 = smov 128   ;;  %s5306_s19 = smov 8  }
 0x539   : > { %4967 = dma.vmem_to_hbm [thread:$0]  (%p5528_p10), %s6391_s26, 16384, %s6389_s21, %s3904_s13, %s5305_s15, %s5305_s15, %s5306_s19  }
 0x53a PF: > { %s6472_s24 = sld [smem:[#allocation16_spill]]  ;;  %s6473_s22 = sld [smem:[#allocation17_spill]] }
 0x53b   : > { %p6475_p1 = scmp.ge.s32.totalorder %s5292_s12, 2 }
 0x540   : > { %s3932_s16 = sand.u32 1, %s6472_s24   ;;  %p6474_p12 = scmp.ne.s32.totalorder %s6473_s22, 0 }
 0x541   : > { %s3933_s23 = scalar_lea.sflag [#allocation4], %s3932_s16 }
 0x542   : > { %p4987_p2 = pnand %p6475_p1, %p6474_p12 }
 0x544   : > { %5275 = dma.done.wait (!%p4987_p2), %s3933_s23, 16384  }
 0x545   : > { %5277 = vsyncadd (!%p4987_p2), %s3933_s23, 4294950912  ;;  %p24_p13 = scmp.ge.s32.totalorder %s5518_s14, 4   ;;  %s6476_s30 = smov %s5284_s10 }
 0x546   : > { %s6477_s10 = smov %s5288_s11  ;;  %s6478_s11 = smov %s5534_s28 }
 0x547   : > { %s6479_s12 = smov %s5518_s14  ;;  %26 = sbr.rel (!%p24_p13) target bundleno = 9 (0x9), region = 117 }
 0x54e   :  { %3938 = vsyncpa [#allocation3], 1 }
 0x54f   :  { %3940 = vsyncpa [#allocation3 + $0x1], 1 }
 0x550   :  { %3941 = vsyncpa [#allocation6], 1 }
 0x551   :  { %3942 = vsyncpa [#allocation9], 1 }
 0x552   :  { %3943 = vsyncpa [#allocation4], 1 }
 0x553   :  { %3945 = vsyncpa [#allocation4 + $0x1], 1 }

</bundles_post_ra>
